<compile_context>
chip_gen: v7x
topology: tpu7x:2x2x1
jax: 0.10.0
libtpu: 0.0.40
codegen_flags: <defaults>
</compile_context>

<pallas_src>
import math

import jax
import jax.numpy as jnp
from jax import lax
from jax.experimental import pallas as pl
from jax.experimental.pallas import tpu as pltpu

NUM_RES_BLOCKS = 3
EPS = 1e-5


# ----------------------------------------------------------------------------
# Fused kernel: ResidualMLP -> relayout -> Conv1d stack
# ----------------------------------------------------------------------------
def _make_fused_kernel(num_hidden_layers, num_res_blocks, waveform_len, batch_tile):
    L, R, Wf, TB = num_hidden_layers, num_res_blocks, waveform_len, batch_tile
    N = TB * Wf  # flattened (batch, time) lane count per grid step

    def kernel(scal_ref,     # SMEM (3,)  f32: [gamma, beta, cout_bias]
               x_ref,        # (TB, P)    f32
               w_in_ref,     # (P, H)     f32
               w_hid_ref,    # (max(L,1), H, H) f32
               w_out_ref,    # (H, Wf)    f32
               b_hid_ref,    # (L+1, 1, H) f32  (row 0 = input-layer bias)
               b_out_ref,    # (1, Wf)    f32
               cin_w_ref,    # (32, 3)    bf16  (taps: [x[t-1], x[t], x[t+1]])
               cin_b_ref,    # (32, 1)    f32
               res_w_ref,    # (2R, 32, 96) bf16 (tap-fused: col = k*32 + c)
               res_b_ref,    # (2R, 32, 1) f32
               cout_w_ref,   # (1, 96)    bf16
               out_ref):     # (1, N)     f32   (lane n = b*Wf + t)
        gamma = scal_ref[0]
        beta = scal_ref[1]
        cout_b = scal_ref[2]

        # ------------------------- ResidualMLP (f32) -------------------------
        x = x_ref[...]
        h = jnp.dot(x, w_in_ref[...],
                    preferred_element_type=jnp.float32) + b_hid_ref[0]
        h = jnp.maximum(h, 0.0)
        for l in range(L):
            res = h
            h = jnp.dot(h, w_hid_ref[l],
                        preferred_element_type=jnp.float32) + b_hid_ref[l + 1]
            h = jnp.maximum(h + res, 0.0)
            # InstanceNorm1d(1, affine=True) applied to (B, 1, H):
            # per-row normalization over H, biased variance, eps=1e-5.
            mean = jnp.mean(h, axis=-1, keepdims=True)
            var = jnp.mean(jnp.square(h - mean), axis=-1, keepdims=True)
            h = (h - mean) * lax.rsqrt(var + EPS)
            h = h * gamma + beta
        y = jnp.dot(h, w_out_ref[...],
                    preferred_element_type=jnp.float32) + b_out_ref[...]   # (TB, Wf)

        # ----- relayout (TB, Wf) -> (1, TB*Wf), row-major (lane = b*Wf + t) -----
        # NOTE: kept as slice+concat (guaranteed lowering); ~1-2% of step time.
        if TB > 1:
            y_flat = jnp.concatenate([y[b:b + 1, :] for b in range(TB)], axis=1)
        else:
            y_flat = y

        # --------------------------- CNN block ---------------------------
        # Boundary masks hoisted once per grid step (reused by every conv).
        t_idx = lax.broadcasted_iota(jnp.int32, (1, N), 1) % Wf
        mask_prev1 = t_idx > 0            # x[t-1] exists within this batch row
        mask_next1 = t_idx < (Wf - 1)     # x[t+1] exists within this batch row
        mask_prev32 = jnp.broadcast_to(mask_prev1, (32, N))
        mask_next32 = jnp.broadcast_to(mask_next1, (32, N))

        # Conv1d(1, 32, 3, padding=1) as a K=3 MXU matmul on the tap stack.
        # Rotation by +1 gives x[t-1]; rotation by N-1 (== -1) gives x[t+1].
        yp = jnp.where(mask_prev1, pltpu.roll(y_flat, shift=1, axis=1), 0.0)
        yn = jnp.where(mask_next1, pltpu.roll(y_flat, shift=N - 1, axis=1), 0.0)
        taps0 = jnp.concatenate(
            [yp.astype(jnp.bfloat16), y_flat.astype(jnp.bfloat16),
             yn.astype(jnp.bfloat16)], axis=0)                    # (3, N)
        a = jnp.dot(cin_w_ref[...], taps0,
                    preferred_element_type=jnp.float32) + cin_b_ref[...]  # (32, N)

        def stack_taps(v):
            # (32, N) f32 -> (96, N) bf16: sublane-aligned [prev; cur; next],
            # matching the tap-fused weight layout (row = k*32 + c).
            p = jnp.where(mask_prev32, pltpu.roll(v, shift=1, axis=1), 0.0)
            n = jnp.where(mask_next32, pltpu.roll(v, shift=N - 1, axis=1), 0.0)
            return jnp.concatenate(
                [p.astype(jnp.bfloat16), v.astype(jnp.bfloat16),
                 n.astype(jnp.bfloat16)], axis=0)

        # 3 x ResidualBlock(32), each: conv3 -> ReLU -> conv3 -> +skip -> ReLU.
        for r in range(R):
            h1 = jnp.dot(res_w_ref[2 * r], stack_taps(a),
                         preferred_element_type=jnp.float32) + res_b_ref[2 * r]
            h1 = jnp.maximum(h1, 0.0)
            h2 = jnp.dot(res_w_ref[2 * r + 1], stack_taps(h1),
                         preferred_element_type=jnp.float32) + res_b_ref[2 * r + 1]
            a = jnp.maximum(h2 + a, 0.0)

        # Conv1d(32, 1, 3, padding=1) -> single lane-dense store.
        z = jnp.dot(cout_w_ref[...], stack_taps(a),
                    preferred_element_type=jnp.float32) + cout_b   # (1, N)
        out_ref[...] = z

    return kernel


# ----------------------------------------------------------------------------
# Wrapper
# ----------------------------------------------------------------------------
def interpolation_forward(x, params, *, batch_tile=64):
    B, P = x.shape
    Wf = params["waveform_len"]
    L = params["num_hidden_layers"]
    R = params["num_res_blocks"]

    # --- pick the batch tile TB ---
    TB = max(1, min(batch_tile, B))
    if B >= 16:
        # prefer >= 2 grid steps so v7x megacore can shard the "parallel" axis
        TB = min(TB, -(-B // 2))
    # lane-dense output block needs (TB*Wf) % 128 == 0 (unless it is the full dim)
    q = 128 // math.gcd(Wf, 128)
    TB = ((TB + q - 1) // q) * q
    if TB < B:
        # multiple blocks along batch: keep the sublane block dim 8-aligned
        TB = ((TB + 7) // 8) * 8
    B_pad = ((B + TB - 1) // TB) * TB
    if B_pad != B:
        x = jnp.pad(x, ((0, B_pad - B), (0, 0)))
    nb = B_pad // TB
    N = TB * Wf

    def rep_spec(arr, memory_space=None):
        # Whole-array block, same block every step (weights: revisited, so the
        # pipeline does not re-DMA them; total weight footprint is < 0.2 MiB).
        nd = arr.ndim
        idx = lambda i, _nd=nd: (0,) * _nd
        if memory_space is None:
            return pl.BlockSpec(arr.shape, idx)
        return pl.BlockSpec(arr.shape, idx, memory_space=memory_space)

    inputs = [
        params["scalars"],
        x,
        params["w_in"], params["w_hid"], params["w_out"],
        params["b_hid"], params["b_out"],
        params["cin_w"], params["cin_b"],
        params["res_w"], params["res_b"],
        params["cout_w"],
    ]
    in_specs = [
        rep_spec(params["scalars"], pltpu.MemorySpace.SMEM),
        pl.BlockSpec((TB, P), lambda i: (i, 0)),
        rep_spec(params["w_in"]), rep_spec(params["w_hid"]), rep_spec(params["w_out"]),
        rep_spec(params["b_hid"]), rep_spec(params["b_out"]),
        rep_spec(params["cin_w"]), rep_spec(params["cin_b"]),
        rep_spec(params["res_w"]), rep_spec(params["res_b"]),
        rep_spec(params["cout_w"]),
    ]

    out = pl.pallas_call(
        _make_fused_kernel(L, R, Wf, TB),
        out_shape=jax.ShapeDtypeStruct((1, B_pad * Wf), jnp.float32),
        grid=(nb,),
        in_specs=in_specs,
        # lane-dense output: one (1, TB*Wf) block per step, row-major in HBM
        out_specs=pl.BlockSpec((1, N), lambda i: (0, i)),
        compiler_params=pltpu.CompilerParams(
            dimension_semantics=("parallel",),
            vmem_limit_bytes=48 * 1024 * 1024),
    )(*inputs)
    # free row-major reshape in HBM: lane b*Wf + t  ->  (b, t)
    return out.reshape(B_pad, Wf)[:B]


# ----------------------------------------------------------------------------
# Deterministic parameter initialization (shapes from the module __init__),
# pre-packed / pre-cast into the layouts the kernel expects.
# ----------------------------------------------------------------------------
def init_params(key, par_dim, hidden_dim, hidden_layer, waveform_len,
                num_res_blocks=NUM_RES_BLOCKS):
    keys = list(jax.random.split(key, 256))
    kit = iter(keys)

    def uni(shape, bound):
        return jax.random.uniform(next(kit), shape, jnp.float32, -bound, bound)

    P, H, Wf, L, R = par_dim, hidden_dim, waveform_len, hidden_layer, num_res_blocks

    # Linear layers: PyTorch default U(-1/sqrt(fan_in), 1/sqrt(fan_in)).
    w_in = uni((P, H), 1.0 / math.sqrt(P))
    b_in = uni((1, 1, H), 1.0 / math.sqrt(P))
    hid_w, hid_b = [], []
    for _ in range(L):
        hid_w.append(uni((H, H), 1.0 / math.sqrt(H)))
        hid_b.append(uni((1, 1, H), 1.0 / math.sqrt(H)))
    w_out = uni((H, Wf), 1.0 / math.sqrt(H))
    b_out = uni((1, Wf), 1.0 / math.sqrt(H))

    w_hid = jnp.stack(hid_w, 0) if L > 0 else jnp.zeros((1, H, H), jnp.float32)
    b_hid = jnp.concatenate([b_in] + hid_b, axis=0)          # (L+1, 1, H)

    # Conv1d(cin, cout, 3): PyTorch weight layout (Cout, Cin, 3); fused to
    # (Cout, 3*Cin) so column index = k*Cin + c matches a [prev; cur; next]
    # sublane stack of the input taps.
    def conv_fused(cin, cout):
        bound = 1.0 / math.sqrt(cin * 3)
        w = uni((cout, cin, 3), bound)
        w_fused = jnp.transpose(w, (0, 2, 1)).reshape(cout, 3 * cin)
        b = uni((cout, 1), bound)
        return w_fused, b

    cin_w, cin_b = conv_fused(1, 32)                          # (32, 3), (32, 1)
    res_w_list, res_b_list = [], []
    for _ in range(R):
        for _ in range(2):
            wf_, bf_ = conv_fused(32, 32)
            res_w_list.append(wf_)
            res_b_list.append(bf_)
    res_w = jnp.stack(res_w_list, 0)                          # (2R, 32, 96)
    res_b = jnp.stack(res_b_list, 0)                          # (2R, 32, 1)
    cout_w, cout_b = conv_fused(32, 1)                        # (1, 96), (1, 1)

    # Scalars: InstanceNorm1d(1, affine=True) default gamma=1, beta=0; plus the
    # final conv bias.  These live in SMEM.
    scalars = jnp.concatenate(
        [jnp.array([1.0, 0.0], jnp.float32), cout_b.reshape(-1)]).astype(jnp.float32)

    return {
        "waveform_len": Wf,
        "num_hidden_layers": L,
        "num_res_blocks": R,
        "scalars": scalars,
        # MLP weights kept in f32 (tiny matmuls; closer to the f32 reference)
        "w_in": w_in,
        "w_hid": w_hid,
        "w_out": w_out,
        "b_hid": b_hid,
        "b_out": b_out,
        # conv weights in bf16 (large-N MXU matmuls), biases in f32
        "cin_w": cin_w.astype(jnp.bfloat16),
        "cin_b": cin_b,
        "res_w": res_w.astype(jnp.bfloat16),
        "res_b": res_b,
        "cout_w": cout_w.astype(jnp.bfloat16),
    }


if __name__ == "__main__":
    B, par_dim, hidden_dim, hidden_layer, waveform_len = 4, 8, 32, 2, 128

    key = jax.random.PRNGKey(0)
    kx, kp = jax.random.split(key)
    x = jax.random.normal(kx, (B, par_dim), dtype=jnp.float32)
    params = init_params(kp, par_dim, hidden_dim, hidden_layer, waveform_len)

    out = interpolation_forward(x, params)
    jax.block_until_ready(out)
    assert out.shape == (B, waveform_len), out.shape
    assert out.dtype == jnp.float32
    assert bool(jnp.all(jnp.isfinite(out)))
    print("KERNEL_OK")
</pallas_src>

<mosaic_0001>
module attributes {stable_mosaic.version = 11 : i64} {
  func.func @kernel(%arg0: i32, %arg1: memref<3xf32, #tpu.memory_space<smem>>, %arg2: memref<4x8xf32, #tpu.memory_space<vmem>>, %arg3: memref<8x32xf32, #tpu.memory_space<vmem>>, %arg4: memref<2x32x32xf32, #tpu.memory_space<vmem>>, %arg5: memref<32x128xf32, #tpu.memory_space<vmem>>, %arg6: memref<3x1x32xf32, #tpu.memory_space<vmem>>, %arg7: memref<1x128xf32, #tpu.memory_space<vmem>>, %arg8: memref<32x3xbf16, #tpu.memory_space<vmem>>, %arg9: memref<32x1xf32, #tpu.memory_space<vmem>>, %arg10: memref<6x32x96xbf16, #tpu.memory_space<vmem>>, %arg11: memref<6x32x1xf32, #tpu.memory_space<vmem>>, %arg12: memref<1x96xbf16, #tpu.memory_space<vmem>>, %arg13: memref<1x512xf32, #tpu.memory_space<vmem>>) attributes {dimension_semantics = [#tpu.dimension_semantics<parallel>], iteration_bounds = array<i64: 1>, scalar_prefetch = 0 : i64, scratch_operands = 0 : i64, tpu.core_type = #tpu.core_type<tc>, window_params = [{transform_indices = @transform_0, window_bounds = array<i64: 3>}, {transform_indices = @transform_1, window_bounds = array<i64: 4, 8>}, {pipeline_mode = #tpu.pipeline_mode<synchronous>, transform_indices = @transform_2, window_bounds = array<i64: 8, 32>}, {pipeline_mode = #tpu.pipeline_mode<synchronous>, transform_indices = @transform_3, window_bounds = array<i64: 2, 32, 32>}, {pipeline_mode = #tpu.pipeline_mode<synchronous>, transform_indices = @transform_4, window_bounds = array<i64: 32, 128>}, {pipeline_mode = #tpu.pipeline_mode<synchronous>, transform_indices = @transform_5, window_bounds = array<i64: 3, 1, 32>}, {pipeline_mode = #tpu.pipeline_mode<synchronous>, transform_indices = @transform_6, window_bounds = array<i64: 1, 128>}, {pipeline_mode = #tpu.pipeline_mode<synchronous>, transform_indices = @transform_7, window_bounds = array<i64: 32, 3>}, {pipeline_mode = #tpu.pipeline_mode<synchronous>, transform_indices = @transform_8, window_bounds = array<i64: 32, 1>}, {pipeline_mode = #tpu.pipeline_mode<synchronous>, transform_indices = @transform_9, window_bounds = array<i64: 6, 32, 96>}, {pipeline_mode = #tpu.pipeline_mode<synchronous>, transform_indices = @transform_10, window_bounds = array<i64: 6, 32, 1>}, {pipeline_mode = #tpu.pipeline_mode<synchronous>, transform_indices = @transform_11, window_bounds = array<i64: 1, 96>}, {transform_indices = @transform_12, window_bounds = array<i64: 1, 512>}]} {
    %c0 = arith.constant 0 : index
    %0 = memref.load %arg1[%c0] : memref<3xf32, #tpu.memory_space<smem>>
    %c1 = arith.constant 1 : index
    %1 = memref.load %arg1[%c1] : memref<3xf32, #tpu.memory_space<smem>>
    %c2 = arith.constant 2 : index
    %2 = memref.load %arg1[%c2] : memref<3xf32, #tpu.memory_space<smem>>
    %c0_0 = arith.constant 0 : index
    %c0_1 = arith.constant 0 : index
    %3 = vector.load %arg2[%c0_0, %c0_1] : memref<4x8xf32, #tpu.memory_space<vmem>>, vector<4x8xf32>
    %c0_2 = arith.constant 0 : index
    %c0_3 = arith.constant 0 : index
    %4 = vector.load %arg3[%c0_2, %c0_3] : memref<8x32xf32, #tpu.memory_space<vmem>>, vector<8x32xf32>
    %cst = arith.constant dense<0.000000e+00> : vector<4x32xf32>
    %5 = tpu.matmul %3, %4, %cst {dimension_numbers = #tpu.dot_dimension_numbers<[1], [0], [0], [1], [0, 0, 1, 1], [], []>} : vector<4x8xf32>, vector<8x32xf32>, vector<4x32xf32> -> vector<4x32xf32>
    %c0_4 = arith.constant 0 : index
    %c0_5 = arith.constant 0 : index
    %c0_6 = arith.constant 0 : index
    %6 = vector.load %arg6[%c0_4, %c0_5, %c0_6] : memref<3x1x32xf32, #tpu.memory_space<vmem>>, vector<1x1x32xf32>
    %7 = vector.shape_cast %6 : vector<1x1x32xf32> to vector<1x32xf32>
    %8 = vector.broadcast %7 : vector<1x32xf32> to vector<4x32xf32>
    %9 = arith.addf %5, %8 : vector<4x32xf32>
    %cst_7 = arith.constant 0.000000e+00 : f32
    %10 = vector.broadcast %cst_7 : f32 to vector<4x32xf32>
    %11 = arith.maximumf %9, %10 : vector<4x32xf32>
    %c0_8 = arith.constant 0 : index
    %c0_9 = arith.constant 0 : index
    %c0_10 = arith.constant 0 : index
    %12 = vector.load %arg4[%c0_8, %c0_9, %c0_10] : memref<2x32x32xf32, #tpu.memory_space<vmem>>, vector<1x32x32xf32>
    %13 = vector.shape_cast %12 : vector<1x32x32xf32> to vector<32x32xf32>
    %cst_11 = arith.constant dense<0.000000e+00> : vector<4x32xf32>
    %14 = tpu.matmul %11, %13, %cst_11 {dimension_numbers = #tpu.dot_dimension_numbers<[1], [0], [0], [1], [0, 0, 1, 1], [], []>} : vector<4x32xf32>, vector<32x32xf32>, vector<4x32xf32> -> vector<4x32xf32>
    %c1_12 = arith.constant 1 : index
    %c0_13 = arith.constant 0 : index
    %c0_14 = arith.constant 0 : index
    %15 = vector.load %arg6[%c1_12, %c0_13, %c0_14] : memref<3x1x32xf32, #tpu.memory_space<vmem>>, vector<1x1x32xf32>
    %16 = vector.shape_cast %15 : vector<1x1x32xf32> to vector<1x32xf32>
    %17 = vector.broadcast %16 : vector<1x32xf32> to vector<4x32xf32>
    %18 = arith.addf %14, %17 : vector<4x32xf32>
    %19 = arith.addf %18, %11 : vector<4x32xf32>
    %cst_15 = arith.constant 0.000000e+00 : f32
    %20 = vector.broadcast %cst_15 : f32 to vector<4x32xf32>
    %21 = arith.maximumf %19, %20 : vector<4x32xf32>
    %cst_16 = arith.constant dense<0.000000e+00> : vector<4xf32>
    %22 = vector.multi_reduction <add>, %21, %cst_16 [1] : vector<4x32xf32> to vector<4xf32>
    %23 = vector.shape_cast %22 : vector<4xf32> to vector<4x1xf32>
    %cst_17 = arith.constant 3.200000e+01 : f32
    %24 = vector.broadcast %cst_17 : f32 to vector<4x1xf32>
    %25 = arith.divf %23, %24 : vector<4x1xf32>
    %26 = vector.broadcast %25 : vector<4x1xf32> to vector<4x32xf32>
    %27 = arith.subf %21, %26 : vector<4x32xf32>
    %28 = arith.mulf %27, %27 : vector<4x32xf32>
    %cst_18 = arith.constant dense<0.000000e+00> : vector<4xf32>
    %29 = vector.multi_reduction <add>, %28, %cst_18 [1] : vector<4x32xf32> to vector<4xf32>
    %30 = vector.shape_cast %29 : vector<4xf32> to vector<4x1xf32>
    %cst_19 = arith.constant 3.200000e+01 : f32
    %31 = vector.broadcast %cst_19 : f32 to vector<4x1xf32>
    %32 = arith.divf %30, %31 : vector<4x1xf32>
    %33 = vector.broadcast %25 : vector<4x1xf32> to vector<4x32xf32>
    %34 = arith.subf %21, %33 : vector<4x32xf32>
    %cst_20 = arith.constant 9.99999974E-6 : f32
    %35 = vector.broadcast %cst_20 : f32 to vector<4x1xf32>
    %36 = arith.addf %32, %35 : vector<4x1xf32>
    %37 = math.rsqrt %36 : vector<4x1xf32>
    %38 = vector.broadcast %37 : vector<4x1xf32> to vector<4x32xf32>
    %39 = arith.mulf %34, %38 : vector<4x32xf32>
    %40 = vector.broadcast %0 : f32 to vector<4x32xf32>
    %41 = arith.mulf %39, %40 : vector<4x32xf32>
    %42 = vector.broadcast %1 : f32 to vector<4x32xf32>
    %43 = arith.addf %41, %42 : vector<4x32xf32>
    %c1_21 = arith.constant 1 : index
    %c0_22 = arith.constant 0 : index
    %c0_23 = arith.constant 0 : index
    %44 = vector.load %arg4[%c1_21, %c0_22, %c0_23] : memref<2x32x32xf32, #tpu.memory_space<vmem>>, vector<1x32x32xf32>
    %45 = vector.shape_cast %44 : vector<1x32x32xf32> to vector<32x32xf32>
    %cst_24 = arith.constant dense<0.000000e+00> : vector<4x32xf32>
    %46 = tpu.matmul %43, %45, %cst_24 {dimension_numbers = #tpu.dot_dimension_numbers<[1], [0], [0], [1], [0, 0, 1, 1], [], []>} : vector<4x32xf32>, vector<32x32xf32>, vector<4x32xf32> -> vector<4x32xf32>
    %c2_25 = arith.constant 2 : index
    %c0_26 = arith.constant 0 : index
    %c0_27 = arith.constant 0 : index
    %47 = vector.load %arg6[%c2_25, %c0_26, %c0_27] : memref<3x1x32xf32, #tpu.memory_space<vmem>>, vector<1x1x32xf32>
    %48 = vector.shape_cast %47 : vector<1x1x32xf32> to vector<1x32xf32>
    %49 = vector.broadcast %48 : vector<1x32xf32> to vector<4x32xf32>
    %50 = arith.addf %46, %49 : vector<4x32xf32>
    %51 = arith.addf %50, %43 : vector<4x32xf32>
    %cst_28 = arith.constant 0.000000e+00 : f32
    %52 = vector.broadcast %cst_28 : f32 to vector<4x32xf32>
    %53 = arith.maximumf %51, %52 : vector<4x32xf32>
    %cst_29 = arith.constant dense<0.000000e+00> : vector<4xf32>
    %54 = vector.multi_reduction <add>, %53, %cst_29 [1] : vector<4x32xf32> to vector<4xf32>
    %55 = vector.shape_cast %54 : vector<4xf32> to vector<4x1xf32>
    %cst_30 = arith.constant 3.200000e+01 : f32
    %56 = vector.broadcast %cst_30 : f32 to vector<4x1xf32>
    %57 = arith.divf %55, %56 : vector<4x1xf32>
    %58 = vector.broadcast %57 : vector<4x1xf32> to vector<4x32xf32>
    %59 = arith.subf %53, %58 : vector<4x32xf32>
    %60 = arith.mulf %59, %59 : vector<4x32xf32>
    %cst_31 = arith.constant dense<0.000000e+00> : vector<4xf32>
    %61 = vector.multi_reduction <add>, %60, %cst_31 [1] : vector<4x32xf32> to vector<4xf32>
    %62 = vector.shape_cast %61 : vector<4xf32> to vector<4x1xf32>
    %cst_32 = arith.constant 3.200000e+01 : f32
    %63 = vector.broadcast %cst_32 : f32 to vector<4x1xf32>
    %64 = arith.divf %62, %63 : vector<4x1xf32>
    %65 = vector.broadcast %57 : vector<4x1xf32> to vector<4x32xf32>
    %66 = arith.subf %53, %65 : vector<4x32xf32>
    %cst_33 = arith.constant 9.99999974E-6 : f32
    %67 = vector.broadcast %cst_33 : f32 to vector<4x1xf32>
    %68 = arith.addf %64, %67 : vector<4x1xf32>
    %69 = math.rsqrt %68 : vector<4x1xf32>
    %70 = vector.broadcast %69 : vector<4x1xf32> to vector<4x32xf32>
    %71 = arith.mulf %66, %70 : vector<4x32xf32>
    %72 = vector.broadcast %0 : f32 to vector<4x32xf32>
    %73 = arith.mulf %71, %72 : vector<4x32xf32>
    %74 = vector.broadcast %1 : f32 to vector<4x32xf32>
    %75 = arith.addf %73, %74 : vector<4x32xf32>
    %c0_34 = arith.constant 0 : index
    %c0_35 = arith.constant 0 : index
    %76 = vector.load %arg5[%c0_34, %c0_35] : memref<32x128xf32, #tpu.memory_space<vmem>>, vector<32x128xf32>
    %cst_36 = arith.constant dense<0.000000e+00> : vector<4x128xf32>
    %77 = tpu.matmul %75, %76, %cst_36 {dimension_numbers = #tpu.dot_dimension_numbers<[1], [0], [0], [1], [0, 0, 1, 1], [], []>} : vector<4x32xf32>, vector<32x128xf32>, vector<4x128xf32> -> vector<4x128xf32>
    %c0_37 = arith.constant 0 : index
    %c0_38 = arith.constant 0 : index
    %78 = vector.load %arg7[%c0_37, %c0_38] : memref<1x128xf32, #tpu.memory_space<vmem>>, vector<1x128xf32>
    %79 = vector.broadcast %78 : vector<1x128xf32> to vector<4x128xf32>
    %80 = arith.addf %77, %79 : vector<4x128xf32>
    %81 = vector.extract_strided_slice %80 {offsets = [0, 0], sizes = [1, 128], strides = [1, 1]} : vector<4x128xf32> to vector<1x128xf32>
    %82 = vector.extract_strided_slice %80 {offsets = [1, 0], sizes = [1, 128], strides = [1, 1]} : vector<4x128xf32> to vector<1x128xf32>
    %83 = vector.extract_strided_slice %80 {offsets = [2, 0], sizes = [1, 128], strides = [1, 1]} : vector<4x128xf32> to vector<1x128xf32>
    %84 = vector.extract_strided_slice %80 {offsets = [3, 0], sizes = [1, 128], strides = [1, 1]} : vector<4x128xf32> to vector<1x128xf32>
    %85 = tpu.concatenate %81, %82, %83, %84 in 1 : vector<1x128xf32>, vector<1x128xf32>, vector<1x128xf32>, vector<1x128xf32> -> vector<1x512xf32>
    %86 = tpu.iota {dimensions = array<i32: 1>} : vector<1x512xi32>
    %c128_i32 = arith.constant 128 : i32
    %c0_i32 = arith.constant 0 : i32
    %87 = arith.cmpi eq, %c128_i32, %c0_i32 : i32
    %c1_i32 = arith.constant 1 : i32
    %88 = arith.select %87, %c1_i32, %c128_i32 : i32
    %89 = vector.broadcast %88 : i32 to vector<1x512xi32>
    %90 = arith.remsi %86, %89 : vector<1x512xi32>
    %c0_i32_39 = arith.constant 0 : i32
    %91 = vector.broadcast %c0_i32_39 : i32 to vector<1x512xi32>
    %92 = arith.cmpi ne, %90, %91 : vector<1x512xi32>
    %c0_i32_40 = arith.constant 0 : i32
    %93 = vector.broadcast %c0_i32_40 : i32 to vector<1x512xi32>
    %94 = arith.cmpi slt, %90, %93 : vector<1x512xi32>
    %c0_i32_41 = arith.constant 0 : i32
    %95 = arith.cmpi slt, %88, %c0_i32_41 : i32
    %96 = vector.broadcast %95 : i1 to vector<1x512xi1>
    %97 = vector.broadcast %96 : vector<1x512xi1> to vector<1x512xi1>
    %98 = arith.xori %94, %97 : vector<1x512xi1>
    %99 = arith.andi %98, %92 : vector<1x512xi1>
    %100 = vector.broadcast %88 : i32 to vector<1x512xi32>
    %101 = arith.addi %90, %100 : vector<1x512xi32>
    %102 = arith.select %99, %101, %90 : vector<1x512xi1>, vector<1x512xi32>
    %c0_i32_42 = arith.constant 0 : i32
    %103 = vector.broadcast %c0_i32_42 : i32 to vector<1x512xi32>
    %104 = arith.cmpi sgt, %102, %103 : vector<1x512xi32>
    %c127_i32 = arith.constant 127 : i32
    %105 = vector.broadcast %c127_i32 : i32 to vector<1x512xi32>
    %106 = arith.cmpi slt, %102, %105 : vector<1x512xi32>
    %107 = vector.shape_cast %104 : vector<1x512xi1> to vector<1x512xi1>
    %108 = vector.broadcast %107 : vector<1x512xi1> to vector<32x512xi1>
    %109 = vector.shape_cast %106 : vector<1x512xi1> to vector<1x512xi1>
    %110 = vector.broadcast %109 : vector<1x512xi1> to vector<32x512xi1>
    %c1_i32_43 = arith.constant 1 : i32
    %111 = tpu.dynamic_rotate %85 by %c1_i32_43 dim 1 : vector<1x512xf32>, i32 -> vector<1x512xf32>
    %cst_44 = arith.constant 0.000000e+00 : f32
    %112 = vector.broadcast %cst_44 : f32 to vector<1x512xf32>
    %113 = arith.select %104, %111, %112 : vector<1x512xi1>, vector<1x512xf32>
    %c511_i32 = arith.constant 511 : i32
    %114 = tpu.dynamic_rotate %85 by %c511_i32 dim 1 : vector<1x512xf32>, i32 -> vector<1x512xf32>
    %cst_45 = arith.constant 0.000000e+00 : f32
    %115 = vector.broadcast %cst_45 : f32 to vector<1x512xf32>
    %116 = arith.select %106, %114, %115 : vector<1x512xi1>, vector<1x512xf32>
    %117 = arith.truncf %113 : vector<1x512xf32> to vector<1x512xbf16>
    %118 = arith.truncf %85 : vector<1x512xf32> to vector<1x512xbf16>
    %119 = arith.truncf %116 : vector<1x512xf32> to vector<1x512xbf16>
    %120 = tpu.concatenate %117, %118, %119 in 0 : vector<1x512xbf16>, vector<1x512xbf16>, vector<1x512xbf16> -> vector<3x512xbf16>
    %c0_46 = arith.constant 0 : index
    %c0_47 = arith.constant 0 : index
    %121 = vector.load %arg8[%c0_46, %c0_47] : memref<32x3xbf16, #tpu.memory_space<vmem>>, vector<32x3xbf16>
    %cst_48 = arith.constant dense<0.000000e+00> : vector<32x512xf32>
    %122 = tpu.matmul %121, %120, %cst_48 {dimension_numbers = #tpu.dot_dimension_numbers<[1], [0], [0], [1], [0, 0, 1, 1], [], []>} : vector<32x3xbf16>, vector<3x512xbf16>, vector<32x512xf32> -> vector<32x512xf32>
    %c0_49 = arith.constant 0 : index
    %c0_50 = arith.constant 0 : index
    %123 = vector.load %arg9[%c0_49, %c0_50] : memref<32x1xf32, #tpu.memory_space<vmem>>, vector<32x1xf32>
    %124 = vector.broadcast %123 : vector<32x1xf32> to vector<32x512xf32>
    %125 = arith.addf %122, %124 : vector<32x512xf32>
    %c0_51 = arith.constant 0 : index
    %c0_52 = arith.constant 0 : index
    %c0_53 = arith.constant 0 : index
    %126 = vector.load %arg10[%c0_51, %c0_52, %c0_53] : memref<6x32x96xbf16, #tpu.memory_space<vmem>>, vector<1x32x96xbf16>
    %127 = vector.shape_cast %126 : vector<1x32x96xbf16> to vector<32x96xbf16>
    %c1_i32_54 = arith.constant 1 : i32
    %128 = tpu.dynamic_rotate %125 by %c1_i32_54 dim 1 : vector<32x512xf32>, i32 -> vector<32x512xf32>
    %cst_55 = arith.constant 0.000000e+00 : f32
    %129 = vector.broadcast %cst_55 : f32 to vector<32x512xf32>
    %130 = arith.select %108, %128, %129 : vector<32x512xi1>, vector<32x512xf32>
    %c511_i32_56 = arith.constant 511 : i32
    %131 = tpu.dynamic_rotate %125 by %c511_i32_56 dim 1 : vector<32x512xf32>, i32 -> vector<32x512xf32>
    %cst_57 = arith.constant 0.000000e+00 : f32
    %132 = vector.broadcast %cst_57 : f32 to vector<32x512xf32>
    %133 = arith.select %110, %131, %132 : vector<32x512xi1>, vector<32x512xf32>
    %134 = arith.truncf %130 : vector<32x512xf32> to vector<32x512xbf16>
    %135 = arith.truncf %125 : vector<32x512xf32> to vector<32x512xbf16>
    %136 = arith.truncf %133 : vector<32x512xf32> to vector<32x512xbf16>
    %137 = tpu.concatenate %134, %135, %136 in 0 : vector<32x512xbf16>, vector<32x512xbf16>, vector<32x512xbf16> -> vector<96x512xbf16>
    %cst_58 = arith.constant dense<0.000000e+00> : vector<32x512xf32>
    %138 = tpu.matmul %127, %137, %cst_58 {dimension_numbers = #tpu.dot_dimension_numbers<[1], [0], [0], [1], [0, 0, 1, 1], [], []>} : vector<32x96xbf16>, vector<96x512xbf16>, vector<32x512xf32> -> vector<32x512xf32>
    %c0_59 = arith.constant 0 : index
    %c0_60 = arith.constant 0 : index
    %c0_61 = arith.constant 0 : index
    %139 = vector.load %arg11[%c0_59, %c0_60, %c0_61] : memref<6x32x1xf32, #tpu.memory_space<vmem>>, vector<1x32x1xf32>
    %140 = vector.shape_cast %139 : vector<1x32x1xf32> to vector<32x1xf32>
    %141 = vector.broadcast %140 : vector<32x1xf32> to vector<32x512xf32>
    %142 = arith.addf %138, %141 : vector<32x512xf32>
    %cst_62 = arith.constant 0.000000e+00 : f32
    %143 = vector.broadcast %cst_62 : f32 to vector<32x512xf32>
    %144 = arith.maximumf %142, %143 : vector<32x512xf32>
    %c1_63 = arith.constant 1 : index
    %c0_64 = arith.constant 0 : index
    %c0_65 = arith.constant 0 : index
    %145 = vector.load %arg10[%c1_63, %c0_64, %c0_65] : memref<6x32x96xbf16, #tpu.memory_space<vmem>>, vector<1x32x96xbf16>
    %146 = vector.shape_cast %145 : vector<1x32x96xbf16> to vector<32x96xbf16>
    %c1_i32_66 = arith.constant 1 : i32
    %147 = tpu.dynamic_rotate %144 by %c1_i32_66 dim 1 : vector<32x512xf32>, i32 -> vector<32x512xf32>
    %cst_67 = arith.constant 0.000000e+00 : f32
    %148 = vector.broadcast %cst_67 : f32 to vector<32x512xf32>
    %149 = arith.select %108, %147, %148 : vector<32x512xi1>, vector<32x512xf32>
    %c511_i32_68 = arith.constant 511 : i32
    %150 = tpu.dynamic_rotate %144 by %c511_i32_68 dim 1 : vector<32x512xf32>, i32 -> vector<32x512xf32>
    %cst_69 = arith.constant 0.000000e+00 : f32
    %151 = vector.broadcast %cst_69 : f32 to vector<32x512xf32>
    %152 = arith.select %110, %150, %151 : vector<32x512xi1>, vector<32x512xf32>
    %153 = arith.truncf %149 : vector<32x512xf32> to vector<32x512xbf16>
    %154 = arith.truncf %144 : vector<32x512xf32> to vector<32x512xbf16>
    %155 = arith.truncf %152 : vector<32x512xf32> to vector<32x512xbf16>
    %156 = tpu.concatenate %153, %154, %155 in 0 : vector<32x512xbf16>, vector<32x512xbf16>, vector<32x512xbf16> -> vector<96x512xbf16>
    %cst_70 = arith.constant dense<0.000000e+00> : vector<32x512xf32>
    %157 = tpu.matmul %146, %156, %cst_70 {dimension_numbers = #tpu.dot_dimension_numbers<[1], [0], [0], [1], [0, 0, 1, 1], [], []>} : vector<32x96xbf16>, vector<96x512xbf16>, vector<32x512xf32> -> vector<32x512xf32>
    %c1_71 = arith.constant 1 : index
    %c0_72 = arith.constant 0 : index
    %c0_73 = arith.constant 0 : index
    %158 = vector.load %arg11[%c1_71, %c0_72, %c0_73] : memref<6x32x1xf32, #tpu.memory_space<vmem>>, vector<1x32x1xf32>
    %159 = vector.shape_cast %158 : vector<1x32x1xf32> to vector<32x1xf32>
    %160 = vector.broadcast %159 : vector<32x1xf32> to vector<32x512xf32>
    %161 = arith.addf %157, %160 : vector<32x512xf32>
    %162 = arith.addf %161, %125 : vector<32x512xf32>
    %cst_74 = arith.constant 0.000000e+00 : f32
    %163 = vector.broadcast %cst_74 : f32 to vector<32x512xf32>
    %164 = arith.maximumf %162, %163 : vector<32x512xf32>
    %c2_75 = arith.constant 2 : index
    %c0_76 = arith.constant 0 : index
    %c0_77 = arith.constant 0 : index
    %165 = vector.load %arg10[%c2_75, %c0_76, %c0_77] : memref<6x32x96xbf16, #tpu.memory_space<vmem>>, vector<1x32x96xbf16>
    %166 = vector.shape_cast %165 : vector<1x32x96xbf16> to vector<32x96xbf16>
    %c1_i32_78 = arith.constant 1 : i32
    %167 = tpu.dynamic_rotate %164 by %c1_i32_78 dim 1 : vector<32x512xf32>, i32 -> vector<32x512xf32>
    %cst_79 = arith.constant 0.000000e+00 : f32
    %168 = vector.broadcast %cst_79 : f32 to vector<32x512xf32>
    %169 = arith.select %108, %167, %168 : vector<32x512xi1>, vector<32x512xf32>
    %c511_i32_80 = arith.constant 511 : i32
    %170 = tpu.dynamic_rotate %164 by %c511_i32_80 dim 1 : vector<32x512xf32>, i32 -> vector<32x512xf32>
    %cst_81 = arith.constant 0.000000e+00 : f32
    %171 = vector.broadcast %cst_81 : f32 to vector<32x512xf32>
    %172 = arith.select %110, %170, %171 : vector<32x512xi1>, vector<32x512xf32>
    %173 = arith.truncf %169 : vector<32x512xf32> to vector<32x512xbf16>
    %174 = arith.truncf %164 : vector<32x512xf32> to vector<32x512xbf16>
    %175 = arith.truncf %172 : vector<32x512xf32> to vector<32x512xbf16>
    %176 = tpu.concatenate %173, %174, %175 in 0 : vector<32x512xbf16>, vector<32x512xbf16>, vector<32x512xbf16> -> vector<96x512xbf16>
    %cst_82 = arith.constant dense<0.000000e+00> : vector<32x512xf32>
    %177 = tpu.matmul %166, %176, %cst_82 {dimension_numbers = #tpu.dot_dimension_numbers<[1], [0], [0], [1], [0, 0, 1, 1], [], []>} : vector<32x96xbf16>, vector<96x512xbf16>, vector<32x512xf32> -> vector<32x512xf32>
    %c2_83 = arith.constant 2 : index
    %c0_84 = arith.constant 0 : index
    %c0_85 = arith.constant 0 : index
    %178 = vector.load %arg11[%c2_83, %c0_84, %c0_85] : memref<6x32x1xf32, #tpu.memory_space<vmem>>, vector<1x32x1xf32>
    %179 = vector.shape_cast %178 : vector<1x32x1xf32> to vector<32x1xf32>
    %180 = vector.broadcast %179 : vector<32x1xf32> to vector<32x512xf32>
    %181 = arith.addf %177, %180 : vector<32x512xf32>
    %cst_86 = arith.constant 0.000000e+00 : f32
    %182 = vector.broadcast %cst_86 : f32 to vector<32x512xf32>
    %183 = arith.maximumf %181, %182 : vector<32x512xf32>
    %c3 = arith.constant 3 : index
    %c0_87 = arith.constant 0 : index
    %c0_88 = arith.constant 0 : index
    %184 = vector.load %arg10[%c3, %c0_87, %c0_88] : memref<6x32x96xbf16, #tpu.memory_space<vmem>>, vector<1x32x96xbf16>
    %185 = vector.shape_cast %184 : vector<1x32x96xbf16> to vector<32x96xbf16>
    %c1_i32_89 = arith.constant 1 : i32
    %186 = tpu.dynamic_rotate %183 by %c1_i32_89 dim 1 : vector<32x512xf32>, i32 -> vector<32x512xf32>
    %cst_90 = arith.constant 0.000000e+00 : f32
    %187 = vector.broadcast %cst_90 : f32 to vector<32x512xf32>
    %188 = arith.select %108, %186, %187 : vector<32x512xi1>, vector<32x512xf32>
    %c511_i32_91 = arith.constant 511 : i32
    %189 = tpu.dynamic_rotate %183 by %c511_i32_91 dim 1 : vector<32x512xf32>, i32 -> vector<32x512xf32>
    %cst_92 = arith.constant 0.000000e+00 : f32
    %190 = vector.broadcast %cst_92 : f32 to vector<32x512xf32>
    %191 = arith.select %110, %189, %190 : vector<32x512xi1>, vector<32x512xf32>
    %192 = arith.truncf %188 : vector<32x512xf32> to vector<32x512xbf16>
    %193 = arith.truncf %183 : vector<32x512xf32> to vector<32x512xbf16>
    %194 = arith.truncf %191 : vector<32x512xf32> to vector<32x512xbf16>
    %195 = tpu.concatenate %192, %193, %194 in 0 : vector<32x512xbf16>, vector<32x512xbf16>, vector<32x512xbf16> -> vector<96x512xbf16>
    %cst_93 = arith.constant dense<0.000000e+00> : vector<32x512xf32>
    %196 = tpu.matmul %185, %195, %cst_93 {dimension_numbers = #tpu.dot_dimension_numbers<[1], [0], [0], [1], [0, 0, 1, 1], [], []>} : vector<32x96xbf16>, vector<96x512xbf16>, vector<32x512xf32> -> vector<32x512xf32>
    %c3_94 = arith.constant 3 : index
    %c0_95 = arith.constant 0 : index
    %c0_96 = arith.constant 0 : index
    %197 = vector.load %arg11[%c3_94, %c0_95, %c0_96] : memref<6x32x1xf32, #tpu.memory_space<vmem>>, vector<1x32x1xf32>
    %198 = vector.shape_cast %197 : vector<1x32x1xf32> to vector<32x1xf32>
    %199 = vector.broadcast %198 : vector<32x1xf32> to vector<32x512xf32>
    %200 = arith.addf %196, %199 : vector<32x512xf32>
    %201 = arith.addf %200, %164 : vector<32x512xf32>
    %cst_97 = arith.constant 0.000000e+00 : f32
    %202 = vector.broadcast %cst_97 : f32 to vector<32x512xf32>
    %203 = arith.maximumf %201, %202 : vector<32x512xf32>
    %c4 = arith.constant 4 : index
    %c0_98 = arith.constant 0 : index
    %c0_99 = arith.constant 0 : index
    %204 = vector.load %arg10[%c4, %c0_98, %c0_99] : memref<6x32x96xbf16, #tpu.memory_space<vmem>>, vector<1x32x96xbf16>
    %205 = vector.shape_cast %204 : vector<1x32x96xbf16> to vector<32x96xbf16>
    %c1_i32_100 = arith.constant 1 : i32
    %206 = tpu.dynamic_rotate %203 by %c1_i32_100 dim 1 : vector<32x512xf32>, i32 -> vector<32x512xf32>
    %cst_101 = arith.constant 0.000000e+00 : f32
    %207 = vector.broadcast %cst_101 : f32 to vector<32x512xf32>
    %208 = arith.select %108, %206, %207 : vector<32x512xi1>, vector<32x512xf32>
    %c511_i32_102 = arith.constant 511 : i32
    %209 = tpu.dynamic_rotate %203 by %c511_i32_102 dim 1 : vector<32x512xf32>, i32 -> vector<32x512xf32>
    %cst_103 = arith.constant 0.000000e+00 : f32
    %210 = vector.broadcast %cst_103 : f32 to vector<32x512xf32>
    %211 = arith.select %110, %209, %210 : vector<32x512xi1>, vector<32x512xf32>
    %212 = arith.truncf %208 : vector<32x512xf32> to vector<32x512xbf16>
    %213 = arith.truncf %203 : vector<32x512xf32> to vector<32x512xbf16>
    %214 = arith.truncf %211 : vector<32x512xf32> to vector<32x512xbf16>
    %215 = tpu.concatenate %212, %213, %214 in 0 : vector<32x512xbf16>, vector<32x512xbf16>, vector<32x512xbf16> -> vector<96x512xbf16>
    %cst_104 = arith.constant dense<0.000000e+00> : vector<32x512xf32>
    %216 = tpu.matmul %205, %215, %cst_104 {dimension_numbers = #tpu.dot_dimension_numbers<[1], [0], [0], [1], [0, 0, 1, 1], [], []>} : vector<32x96xbf16>, vector<96x512xbf16>, vector<32x512xf32> -> vector<32x512xf32>
    %c4_105 = arith.constant 4 : index
    %c0_106 = arith.constant 0 : index
    %c0_107 = arith.constant 0 : index
    %217 = vector.load %arg11[%c4_105, %c0_106, %c0_107] : memref<6x32x1xf32, #tpu.memory_space<vmem>>, vector<1x32x1xf32>
    %218 = vector.shape_cast %217 : vector<1x32x1xf32> to vector<32x1xf32>
    %219 = vector.broadcast %218 : vector<32x1xf32> to vector<32x512xf32>
    %220 = arith.addf %216, %219 : vector<32x512xf32>
    %cst_108 = arith.constant 0.000000e+00 : f32
    %221 = vector.broadcast %cst_108 : f32 to vector<32x512xf32>
    %222 = arith.maximumf %220, %221 : vector<32x512xf32>
    %c5 = arith.constant 5 : index
    %c0_109 = arith.constant 0 : index
    %c0_110 = arith.constant 0 : index
    %223 = vector.load %arg10[%c5, %c0_109, %c0_110] : memref<6x32x96xbf16, #tpu.memory_space<vmem>>, vector<1x32x96xbf16>
    %224 = vector.shape_cast %223 : vector<1x32x96xbf16> to vector<32x96xbf16>
    %c1_i32_111 = arith.constant 1 : i32
    %225 = tpu.dynamic_rotate %222 by %c1_i32_111 dim 1 : vector<32x512xf32>, i32 -> vector<32x512xf32>
    %cst_112 = arith.constant 0.000000e+00 : f32
    %226 = vector.broadcast %cst_112 : f32 to vector<32x512xf32>
    %227 = arith.select %108, %225, %226 : vector<32x512xi1>, vector<32x512xf32>
    %c511_i32_113 = arith.constant 511 : i32
    %228 = tpu.dynamic_rotate %222 by %c511_i32_113 dim 1 : vector<32x512xf32>, i32 -> vector<32x512xf32>
    %cst_114 = arith.constant 0.000000e+00 : f32
    %229 = vector.broadcast %cst_114 : f32 to vector<32x512xf32>
    %230 = arith.select %110, %228, %229 : vector<32x512xi1>, vector<32x512xf32>
    %231 = arith.truncf %227 : vector<32x512xf32> to vector<32x512xbf16>
    %232 = arith.truncf %222 : vector<32x512xf32> to vector<32x512xbf16>
    %233 = arith.truncf %230 : vector<32x512xf32> to vector<32x512xbf16>
    %234 = tpu.concatenate %231, %232, %233 in 0 : vector<32x512xbf16>, vector<32x512xbf16>, vector<32x512xbf16> -> vector<96x512xbf16>
    %cst_115 = arith.constant dense<0.000000e+00> : vector<32x512xf32>
    %235 = tpu.matmul %224, %234, %cst_115 {dimension_numbers = #tpu.dot_dimension_numbers<[1], [0], [0], [1], [0, 0, 1, 1], [], []>} : vector<32x96xbf16>, vector<96x512xbf16>, vector<32x512xf32> -> vector<32x512xf32>
    %c5_116 = arith.constant 5 : index
    %c0_117 = arith.constant 0 : index
    %c0_118 = arith.constant 0 : index
    %236 = vector.load %arg11[%c5_116, %c0_117, %c0_118] : memref<6x32x1xf32, #tpu.memory_space<vmem>>, vector<1x32x1xf32>
    %237 = vector.shape_cast %236 : vector<1x32x1xf32> to vector<32x1xf32>
    %238 = vector.broadcast %237 : vector<32x1xf32> to vector<32x512xf32>
    %239 = arith.addf %235, %238 : vector<32x512xf32>
    %240 = arith.addf %239, %203 : vector<32x512xf32>
    %cst_119 = arith.constant 0.000000e+00 : f32
    %241 = vector.broadcast %cst_119 : f32 to vector<32x512xf32>
    %242 = arith.maximumf %240, %241 : vector<32x512xf32>
    %c0_120 = arith.constant 0 : index
    %c0_121 = arith.constant 0 : index
    %243 = vector.load %arg12[%c0_120, %c0_121] : memref<1x96xbf16, #tpu.memory_space<vmem>>, vector<1x96xbf16>
    %c1_i32_122 = arith.constant 1 : i32
    %244 = tpu.dynamic_rotate %242 by %c1_i32_122 dim 1 : vector<32x512xf32>, i32 -> vector<32x512xf32>
    %cst_123 = arith.constant 0.000000e+00 : f32
    %245 = vector.broadcast %cst_123 : f32 to vector<32x512xf32>
    %246 = arith.select %108, %244, %245 : vector<32x512xi1>, vector<32x512xf32>
    %c511_i32_124 = arith.constant 511 : i32
    %247 = tpu.dynamic_rotate %242 by %c511_i32_124 dim 1 : vector<32x512xf32>, i32 -> vector<32x512xf32>
    %cst_125 = arith.constant 0.000000e+00 : f32
    %248 = vector.broadcast %cst_125 : f32 to vector<32x512xf32>
    %249 = arith.select %110, %247, %248 : vector<32x512xi1>, vector<32x512xf32>
    %250 = arith.truncf %246 : vector<32x512xf32> to vector<32x512xbf16>
    %251 = arith.truncf %242 : vector<32x512xf32> to vector<32x512xbf16>
    %252 = arith.truncf %249 : vector<32x512xf32> to vector<32x512xbf16>
    %253 = tpu.concatenate %250, %251, %252 in 0 : vector<32x512xbf16>, vector<32x512xbf16>, vector<32x512xbf16> -> vector<96x512xbf16>
    %cst_126 = arith.constant dense<0.000000e+00> : vector<1x512xf32>
    %254 = tpu.matmul %243, %253, %cst_126 {dimension_numbers = #tpu.dot_dimension_numbers<[1], [0], [0], [1], [0, 0, 1, 1], [], []>} : vector<1x96xbf16>, vector<96x512xbf16>, vector<1x512xf32> -> vector<1x512xf32>
    %255 = vector.broadcast %2 : f32 to vector<1x512xf32>
    %256 = arith.addf %254, %255 : vector<1x512xf32>
    %c0_127 = arith.constant 0 : index
    %c0_128 = arith.constant 0 : index
    %257 = vector.load %arg13[%c0_127, %c0_128] : memref<1x512xf32, #tpu.memory_space<vmem>>, vector<1x512xf32>
    tpu.vector_store %arg13[%c0_127, %c0_128], %256 {strides = array<i32>} : memref<1x512xf32, #tpu.memory_space<vmem>>, vector<1x512xf32>,
    return
  }
  func.func @transform_0(%arg0: i32) -> i32 {
    %c0_i32 = arith.constant 0 : i32
    %c0_i32_0 = arith.constant 0 : i32
    return %c0_i32 : i32
  }
  func.func @transform_1(%arg0: i32) -> (i32, i32) {
    %c0_i32 = arith.constant 0 : i32
    %c0_i32_0 = arith.constant 0 : i32
    return %arg0, %c0_i32 : i32, i32
  }
  func.func @transform_2(%arg0: i32) -> (i32, i32) {
    %c0_i32 = arith.constant 0 : i32
    %c0_i32_0 = arith.constant 0 : i32
    %c0_i32_1 = arith.constant 0 : i32
    return %c0_i32, %c0_i32_0 : i32, i32
  }
  func.func @transform_3(%arg0: i32) -> (i32, i32, i32) {
    %c0_i32 = arith.constant 0 : i32
    %c0_i32_0 = arith.constant 0 : i32
    %c0_i32_1 = arith.constant 0 : i32
    %c0_i32_2 = arith.constant 0 : i32
    return %c0_i32, %c0_i32_0, %c0_i32_1 : i32, i32, i32
  }
  func.func @transform_4(%arg0: i32) -> (i32, i32) {
    %c0_i32 = arith.constant 0 : i32
    %c0_i32_0 = arith.constant 0 : i32
    %c0_i32_1 = arith.constant 0 : i32
    return %c0_i32, %c0_i32_0 : i32, i32
  }
  func.func @transform_5(%arg0: i32) -> (i32, i32, i32) {
    %c0_i32 = arith.constant 0 : i32
    %c0_i32_0 = arith.constant 0 : i32
    %c0_i32_1 = arith.constant 0 : i32
    %c0_i32_2 = arith.constant 0 : i32
    return %c0_i32, %c0_i32_0, %c0_i32_1 : i32, i32, i32
  }
  func.func @transform_6(%arg0: i32) -> (i32, i32) {
    %c0_i32 = arith.constant 0 : i32
    %c0_i32_0 = arith.constant 0 : i32
    %c0_i32_1 = arith.constant 0 : i32
    return %c0_i32, %c0_i32_0 : i32, i32
  }
  func.func @transform_7(%arg0: i32) -> (i32, i32) {
    %c0_i32 = arith.constant 0 : i32
    %c0_i32_0 = arith.constant 0 : i32
    %c0_i32_1 = arith.constant 0 : i32
    return %c0_i32, %c0_i32_0 : i32, i32
  }
  func.func @transform_8(%arg0: i32) -> (i32, i32) {
    %c0_i32 = arith.constant 0 : i32
    %c0_i32_0 = arith.constant 0 : i32
    %c0_i32_1 = arith.constant 0 : i32
    return %c0_i32, %c0_i32_0 : i32, i32
  }
  func.func @transform_9(%arg0: i32) -> (i32, i32, i32) {
    %c0_i32 = arith.constant 0 : i32
    %c0_i32_0 = arith.constant 0 : i32
    %c0_i32_1 = arith.constant 0 : i32
    %c0_i32_2 = arith.constant 0 : i32
    return %c0_i32, %c0_i32_0, %c0_i32_1 : i32, i32, i32
  }
  func.func @transform_10(%arg0: i32) -> (i32, i32, i32) {
    %c0_i32 = arith.constant 0 : i32
    %c0_i32_0 = arith.constant 0 : i32
    %c0_i32_1 = arith.constant 0 : i32
    %c0_i32_2 = arith.constant 0 : i32
    return %c0_i32, %c0_i32_0, %c0_i32_1 : i32, i32, i32
  }
  func.func @transform_11(%arg0: i32) -> (i32, i32) {
    %c0_i32 = arith.constant 0 : i32
    %c0_i32_0 = arith.constant 0 : i32
    %c0_i32_1 = arith.constant 0 : i32
    return %c0_i32, %c0_i32_0 : i32, i32
  }
  func.func @transform_12(%arg0: i32) -> (i32, i32) {
    %c0_i32 = arith.constant 0 : i32
    %c0_i32_0 = arith.constant 0 : i32
    return %c0_i32, %arg0 : i32, i32
  }
}

</mosaic_0001>

<bundles_post_ra>
// kernel: tpu_custom_call.1
= control target key start
LH: loop header
LB: loop body
LE: loop exit
PB: predicated region body
PF: predicated region fallthrough
CT: control target
= control target key end

     0   :  { %17 = vsyncpa [#allocation4], 0  ;;  %s5837_s0 = inlined_call_operand.vmem [shape: f32[3], index: 0, kind: input, shape index: {}]   ;;  %s5838_s1 = inlined_call_operand.vmem [shape: f32[4,8], index: 1, kind: input, shape index: {}]   ;;  %s5839_s2 = inlined_call_operand.vmem [shape: f32[8,32], index: 2, kind: input, shape index: {}]   ;;  %s5840_s3 = inlined_call_operand.vmem [shape: f32[2,32,32], index: 3, kind: input, shape index: {}]   ;;  %s5841_s4 = inlined_call_operand.vmem [shape: f32[32,128], index: 4, kind: input, shape index: {}]   ;;  %s5842_s5 = inlined_call_operand.vmem [shape: f32[3,1,32], index: 5, kind: input, shape index: {}]   ;;  %s5843_s6 = inlined_call_operand.vmem [shape: f32[1,128], index: 6, kind: input, shape index: {}]   ;;  %s5844_s7 = inlined_call_operand.vmem [shape: bf16[32,3], index: 7, kind: input, shape index: {}]   ;;  %s5845_s8 = inlined_call_operand.vmem [shape: f32[32,1], index: 8, kind: input, shape index: {}]   ;;  %s5846_s9 = inlined_call_operand.vmem [shape: bf16[6,32,96], index: 9, kind: input, shape index: {}]   ;;  %s5847_s10 = inlined_call_operand.vmem [shape: f32[6,32,1], index: 10, kind: input, shape index: {}]   ;;  %s5848_s11 = inlined_call_operand.vmem [shape: bf16[1,96], index: 11, kind: input, shape index: {}]   ;;  %s5849_s12 = inlined_call_operand.hbm [shape: f32[1,512], index: 12, kind: output, shape index: {}]  }
   0x1   :  { %18 = vsyncpa [#allocation3], 0  ;;  %s25_s23 = sshll.u32 %s5837_s0, 4  ;;  %s26_s23 = int_to_ptr.vmem [resolvable:$true] %s25_s23 }
   0x2   :  { %s4147_s24 = scalar_lea.vmem %s26_s23, 16  ;;  %p4152_p1 = scmp.lt.s32.totalorder %s26_s23, %s26_s23 }
   0x3   :  { %p4148_p0 = scmp.ne.s32.totalorder %s26_s23, %s4147_s24  ;;  %p4153_p2 = scmp.lt.s32.totalorder %s4147_s24, %s4147_s24 }
   0x5   :  { %p4154_p3 = por %p4153_p2, %p4152_p1 }
   0x7   :  { %p4155_p4 = pnand %p4154_p3, %p4148_p0 }
   0x9   :  { %4158 = shalt.err (!%p4155_p4)
}
   0xa   :  { %s4185_s25 = smov [#allocation2]  }
   0xb   :  { %28 = dma.vmem_to_smem %s26_s23, 16, %s4185_s25, [#allocation4]  }
   0xc   :  { %4181 = dma.done.wait [#allocation4], 16  }
   0xd   :  { %4182 = vsyncadd [#allocation4], 4294967280 }
   0xe   :  { %54 = sfence }
   0xf   :  { %v60_v0 = vld [vmem:[%s5839_s2] sm:$0xff]  ;;  %vm68_vm0 = vcmask 64512   ;;  %v4186_v2 = vmov 0.0   ;;  %vm4187_vm1 = vmmov 0   ;;  %v144_v4 = vld [vmem:[%s5840_s3 + $0x8] sm:$0xff]  ;;  %v4188_v5 = vmov 0.0|0.0  }
  0x10   :  { %v59_v1 = vld [vmem:[%s5838_s1] sm:$0xf]  ;;  %3481 = vmatprep.subr.mxu0 %v4186_v2  ;;  %3483 = vmatprep.mubr.msk.f32.mxu0 %vm4187_vm1, %v4186_v2  ;;  %v145_v7 = vld [vmem:[%s5840_s3 + $0x10] sm:$0xff]  ;;  %v146_v8 = vld [vmem:[%s5840_s3 + $0x18] sm:$0xff]  ;;  %vm155_vm2 = vcmask 261120   ;;  %vm231_vm3 = vcmask 257024  }
  0x11   :  { %v143_v3 = vld [vmem:[%s5840_s3] sm:$0xff]  ;;  %3482 = vmatpush3.msra.mxu0 %v60_v0  ;;  %3519 = vmatprep.subr.bf16.mxu1 %v4188_v5  ;;  %v3523_v9 = vpack.c.bf16 %v146_v8, %v145_v7  ;;  %v3036_v28 = vld [vmem:[%s5840_s3 + $0x28] sm:$0xff]  ;;  %v3037_v30 = vld [vmem:[%s5840_s3 + $0x30] sm:$0xff]  ;;  %s4311_s29 = sld [smem:[#allocation2]]  ;;  %s4313_s0 = sld [smem:[#allocation2 + $0x1]]  ;;  %vm591_vm11 = vcmask 1040384  }
  0x12   :  { %v3520_v6 = vpack.c.bf16 %v144_v4, %v143_v3  ;;  %3484 = vmatmul.mubr.msk.f32.vlgmr.msra.gmra.mrb[0].mxu0 %vm68_vm0, %v59_v1  ;;  %3494 = vmatprep.mubr.msk.f32.mxu1 %vm4187_vm1, %v4186_v2  ;;  %v3030_v10 = vld [vmem:[%s5842_s5] ss:$0 sm:$0xff]  ;;  %v3033_v15 = vld [vmem:[%s5842_s5 + $0x1] ss:$0 sm:$0xff]  ;;  %v3038_v31 = vld [vmem:[%s5840_s3 + $0x38] sm:$0xff]  ;;  %vm656_vm14 = vcmask 1041408  }
  0x13   :  { %3525 = vmatprep.subr.bf16.mxu0 %v4188_v5  ;;  %3505 = vmatprep.mubr.msk.f32.mxu0 %vm4187_vm1, %v4186_v2  ;;  %v3035_v27 = vld [vmem:[%s5840_s3 + $0x20] sm:$0xff]  ;;  %v3529_v32 = vpack.c.bf16 %v3038_v31, %v3037_v30  ;;  %v354_v55 = vld [vmem:[%s5841_s4 + $0x8] sm:$0xff]  ;;  %v355_v57 = vld [vmem:[%s5841_s4 + $0x10] sm:$0xff]  ;;  %vm592_vm15 = vsmask.f32 256 }
  0x14   :  { %3521 = vmatpush3.bf16.msra.mxu1 %v3520_v6  ;;  %v3526_v29 = vpack.c.bf16 %v3036_v28, %v3035_v27  ;;  %v3040_v42 = vld [vmem:[%s5842_s5 + $0x2] ss:$0 sm:$0xff]  ;;  %v356_v58 = vld [vmem:[%s5841_s4 + $0x18] sm:$0xff]  ;;  %v3042_v3 = vld [vmem:[%s5843_s6] ss:$0 sm:$0xff]  ;;  %s4190_s6 = smov 1  }
  0x15   :  { %3522 = vmatprep.subr.bf16.mxu1 %v4188_v5  ;;  %v353_v54 = vld [vmem:[%s5841_s4] sm:$0xff]  ;;  %v3535_v59 = vpack.c.bf16 %v356_v58, %v355_v57  ;;  %s4189_s4 = smov 127   ;;  %vm4433_vm0 = vmand %vm591_vm11, %vm592_vm15 }
  0x16   :  { %3527 = vmatpush3.bf16.msra.mxu0 %v3526_v29  ;;  %v3532_v56 = vpack.c.bf16 %v354_v55, %v353_v54 }
  0x17   :  { %3528 = vmatprep.subr.bf16.mxu0 %v4188_v5  ;;  %v246_v37 = vstv %s4311_s29  ;;  %v248_v39 = vstv %s4313_s0 }
  0x18   :  { %3524 = vmatpush3.bf16.msra.mxu1 %v3523_v9 }
  0x19   :  { %3531 = vmatprep.subr.bf16.mxu1 %v4188_v5 }
  0x1a   :  { %3530 = vmatpush3.bf16.msra.mxu0 %v3529_v32 }
  0xe5   :  { %v138_v11 = vpop.f32.mrb[0].mxu0 }
  0xe6   :  { %v139_v12 = vadd.f32 %v3030_v10, %v138_v11  ;;  %v3485_v13 = vpop.f32.mrb[1].mxu0 }
  0xe7   :  { %v616_v13 = vld [vmem:[%s5845_s8 + $0x8] sm:$0xff] }
  0xe8   :  { %v142_v14 = vmax.f32 %v139_v12, 0.0  ;;  %v4191_v12 = vmov 0  }
  0xe9   :  { %3567 = vset.pattern.permute.xlu0 %v4191_v12  ;;  %3568 = vset.pattern.permute.xlu1 %v4191_v12 }
  0xea   :  { %3495 = vmatmul.mubr.msk.f32.vlgmr.msra.gmra.mrb[0].mxu1 %vm155_vm2, %v142_v14 }
  0xeb   :  { %3516 = vmatprep.mubr.msk.f32.mxu1 %vm4187_vm1, %v4186_v2  ;;  %3533 = vmatpush3.bf16.msra.mxu1 %v3532_v56  ;;  %vm649_vm1 = vcmask 23552  }
  0xec   :  { %3534 = vmatprep.subr.bf16.mxu1 %v4188_v5 }
  0xef   :  { %3536 = vmatpush3.bf16.msra.mxu1 %v3535_v59 }
 0x1bd   :  { %v225_v16 = vpop.f32.mrb[0].mxu1 }
 0x1be   :  { %v226_v17 = vadd.f32 %v3033_v15, %v225_v16  ;;  %v3496_v18 = vpop.f32.mrb[1].mxu1  ;;  %v617_v15 = vld [vmem:[%s5845_s8 + $0x10] sm:$0xff]  ;;  %v618_v16 = vld [vmem:[%s5845_s8 + $0x18] sm:$0xff] }
 0x1c0   :  { %v229_v19 = vadd.f32 %v226_v17, %v142_v14  ;;  %v615_v14 = vld [vmem:[%s5845_s8] sm:$0xff]  ;;  %v444_v17 = vlaneseq }
 0x1c2   :  { %v230_v20 = vmax.f32 %v229_v19, 0.0  ;;  %v4373_v18 = vand.u32 127, %v444_v17 }
 0x1c4   :  { %v232_v21 = vsel %vm231_vm3, %v230_v20, 0.0  ;;  %v447_v19 = vadd.s32 256, %v4373_v18  ;;  %vm501_vm4 = vcmp.lt.s32.totalorder %v4373_v18, 127  ;;  %vm529_vm5 = vcmp.lt.s32.totalorder %v4373_v18, 1 }
 0x1c5   :  { %233 = vadd.xlane.f32.xlu0 %v232_v21  ;;  %v448_v21 = vadd.s32 384, %v4373_v18  ;;  %vm497_vm10 = vcmp.gt.s32.totalorder %v4373_v18, 0 }
 0x252   :  { %v234_v22 = vpop.xlane.xlu0 %233 }
 0x253   :  { %v236_v23 = vmul.f32 0.03125, %v234_v22  ;;  %v467_v22 = vand.u32 127, %v447_v19 }
 0x255   :  { %v237_v24 = vsub.f32 %v230_v20, %v236_v23  ;;  %v446_v20 = vadd.s32 128, %v4373_v18  ;;  %vm4380_vm6 = vcmp.lt.s32.totalorder %v467_v22, 127  ;;  %vm4399_vm12 = vcmp.gt.s32.totalorder %v467_v22, 0  ;;  %v2740_v18 = vld [vmem:[%s5848_s11] sm:$0x1]  ;;  %s4194_s11 = smov [#allocation5]  }
 0x256   :  { %s3019_s8 = sshll.u32 %s4194_s11, 4  ;;  %s3020_s8 = int_to_ptr.vmem [resolvable:$true] %s3019_s8 }
 0x257   :  { %v238_v25 = vmul.f32 %v237_v24, %v237_v24  ;;  %v460_v23 = vand.u32 127, %v446_v20  ;;  %s4159_s28 = scalar_lea.vmem %s3020_s8, 64  ;;  %p4164_p6 = scmp.lt.s32.totalorder %s3020_s8, %s3020_s8 }
 0x258   :  { %p4160_p5 = scmp.ne.s32.totalorder %s3020_s8, %s4159_s28  ;;  %p4165_p7 = scmp.lt.s32.totalorder %s4159_s28, %s4159_s28 }
 0x259   :  { %v239_v26 = vsel %vm231_vm3, %v238_v25, 0.0  ;;  %vm4384_vm7 = vcmp.lt.s32.totalorder %v460_v23, 127  ;;  %vm4392_vm9 = vcmp.gt.s32.totalorder %v460_v23, 0 }
 0x25a   :  { %240 = vadd.xlane.f32.xlu0 %v239_v26  ;;  %p4166_p8 = por %p4165_p7, %p4164_p6 }
 0x25c   :  { %p4167_p9 = pnand %p4166_p8, %p4160_p5 }
 0x2e7   :  { %v241_v33 = vpop.xlane.xlu0 %240 }
 0x2e8   :  { %v242_v34 = vmul.f32 0.03125, %v241_v33 }
 0x2ea   :  { %v243_v35 = vadd.f32 1e-05, %v242_v34 }
 0x2ec   :  { %4143 = vrsqrt.f32 %v243_v35 }
 0x2f6   :  { %v4144_v36 = vpop.eup %4143 }
 0x2f7   :  { %v245_v38 = vmul.f32 %v4144_v36, %v237_v24  ;;  %v474_v24 = vand.u32 127, %v448_v21 }
 0x2f9   :  { %v247_v40 = vmul.f32 %v246_v37, %v245_v38  ;;  %vm4388_vm8 = vcmp.lt.s32.totalorder %v474_v24, 127  ;;  %vm4415_vm13 = vcmp.gt.s32.totalorder %v474_v24, 0 }
 0x2fb   :  { %v249_v41 = vadd.f32 %v248_v39, %v247_v40 }
 0x2fd   :  { %3506 = vmatmul.mubr.msk.f32.vlgmr.msra.gmra.mrb[2].mxu0 %vm155_vm2, %v249_v41 }
 0x2fe   :  { %699 = vmatprep.mubr.bf16.mxu0 %v4191_v12 }
 0x3d0   :  { %v332_v43 = vpop.f32.mrb[2].mxu0 }
 0x3d1   :  { %v333_v44 = vadd.f32 %v3040_v42, %v332_v43  ;;  %v3507_v45 = vpop.f32.mrb[3].mxu0 }
 0x3d3   :  { %v336_v46 = vadd.f32 %v333_v44, %v249_v41 }
 0x3d5   :  { %v337_v47 = vmax.f32 %v336_v46, 0.0  ;;  %v4192_v46 = vmov 65535  }
 0x3d7   :  { %v338_v48 = vsel %vm231_vm3, %v337_v47, 0.0 }
 0x3d8   :  { %339 = vadd.xlane.f32.xlu1 %v338_v48 }
 0x465   :  { %v340_v49 = vpop.xlane.xlu1 %339 }
 0x466   :  { %v341_v50 = vmul.f32 0.03125, %v340_v49 }
 0x468   :  { %v342_v51 = vsub.f32 %v337_v47, %v341_v50  ;;  %v657_v47 = vsel %vm591_vm11, 4294967295, %v4192_v46 }
 0x469   :  { %v658_v59 = vsel %vm656_vm14, %v657_v47, 0 }
 0x46a   :  { %v343_v52 = vmul.f32 %v342_v51, %v342_v51 }
 0x46c   :  { %v344_v53 = vsel %vm231_vm3, %v343_v52, 0.0  ;;  %vm4561_vm3 = vmpackc.low %vm497_vm10, %vm497_vm10 }
 0x46d   :  { %345 = vadd.xlane.f32.xlu1 %v344_v53 }
 0x4fa   :  { %v346_v60 = vpop.xlane.xlu1 %345 }
 0x4fb   :  { %v347_v61 = vmul.f32 0.03125, %v346_v60 }
 0x4fd   :  { %v348_v62 = vadd.f32 1e-05, %v347_v61 }
 0x4ff   :  { %4145 = vrsqrt.f32 %v348_v62 }
 0x509   :  { %v4146_v63 = vpop.eup %4145 }
 0x50a   :  { %v350_v0 = vmul.f32 %v4146_v63, %v342_v51 }
 0x50c   :  { %v351_v1 = vmul.f32 %v350_v0, %v246_v37 }
 0x50e   :  { %v352_v2 = vadd.f32 %v351_v1, %v248_v39 }
 0x510   :  { %3517 = vmatmul.mubr.msk.f32.vlgmr.msra.gmra.mrb[2].mxu1 %vm155_vm2, %v352_v2  ;;  %vm4550_vm2 = vmpackc.low %vm4392_vm9, %vm4392_vm9 }
 0x511   :  { %752 = vmatprep.mubr.bf16.mxu1 %v4191_v12 }
 0x5e3   :  { %v433_v4 = vpop.f32.mrb[2].mxu1 }
 0x5e4   :  { %v4340_v5 = vadd.f32 %v3042_v3, %v433_v4  ;;  %v3518_v6 = vpop.f32.mrb[3].mxu1 }
 0x5e6   :  { %v440_v7 = vrot.slane %v4340_v5, 2  ;;  %v4344_v8 = vrot.slane %v4340_v5, 3  ;;  %v4347_v9 = vrot.slane %v4340_v5, 1  ;;  %v559_v39 = vpack.c.bf16 %v4340_v5, %v4340_v5 }
 0x5e8   :  { %v3552_v10 = vpack.i.bf16 %v4344_v8, %v440_v7  ;;  %v3547_v11 = vpack.i.bf16 %v4347_v9, %v4340_v5  ;;  %v561_v35 = vpack.c.bf16 %v440_v7, %v440_v7  ;;  %v560_v38 = vpack.c.bf16 %v4347_v9, %v4347_v9 }
 0x5e9   :  { %v562_v48 = vpack.c.bf16 %v4344_v8, %v4344_v8  ;;  %v568_v60 = vshll.u32 %v559_v39, 16  ;;  %v4129_v39 = vld [vmem:[%s5844_s7] sm:$0xff]  }
 0x5ea   :  { %3553 = vrot.lane.b32.xlu1 %v3552_v10, %s4189_s4  ;;  %3548 = vrot.lane.b32.xlu0 %v3547_v11, %s4189_s4  ;;  %v574_v49 = vshll.u32 %v561_v35, 16  ;;  %v571_v58 = vshll.u32 %v560_v38, 16 }
 0x5eb   :  { %v577_v1 = vshll.u32 %v562_v48, 16 }
 0x5ee   :  { %3558 = vrot.lane.b32.xlu1 %v3547_v11, %s4190_s6  ;;  %621 = vperm.xlu0 %3567, %v615_v14  }
 0x5f2   :  { %3563 = vrot.lane.b32.xlu1 %v3552_v10, %s4190_s6  ;;  %636 = vperm.xlu0 %3567, %v618_v16  }
 0x5f6   :  { %626 = vperm.xlu1 %3568, %v616_v13  }
 0x5fa   :  { %631 = vperm.xlu1 %3568, %v617_v15  }
 0x65c   :  { %v3554_v26 = vpop.permute.xlu1 %3553  ;;  %v3549_v29 = vpop.permute.xlu0 %3548 }
 0x65d   :  { %v3556_v31 = vunpack.i.h.bf16 %v3554_v26  ;;  %v3555_v32 = vunpack.i.l.bf16 %v3554_v26  ;;  %v3551_v33 = vunpack.i.h.bf16 %v3549_v29  ;;  %v3550_v34 = vunpack.i.l.bf16 %v3549_v29 }
 0x65f   :  { %v548_v36 = vsel %vm501_vm4, %v3551_v33, %v3555_v32  ;;  %v547_v40 = vsel %vm501_vm4, %v3555_v32, %v3556_v31  ;;  %v549_v42 = vsel %vm501_vm4, %v3550_v34, %v3551_v33  ;;  %v550_v43 = vsel %vm501_vm4, %v3556_v31, %v3550_v34 }
 0x660   :  { %v552_v41 = vsel %vm4384_vm7, %v548_v36, 0.0  ;;  %v3559_v44 = vpop.permute.xlu1 %3558  ;;  %v553_v52 = vsel %vm4380_vm6, %v547_v40, 0.0  ;;  %v551_v54 = vsel %vm501_vm4, %v549_v42, 0.0  ;;  %v554_v55 = vsel %vm4388_vm8, %v550_v43, 0.0  ;;  %v4130_v40 = vld [vmem:[%s5844_s7 + $0x8] sm:$0xff]  }
 0x661   :  { %v3561_v50 = vunpack.i.h.bf16 %v3559_v44  ;;  %v3560_v51 = vunpack.i.l.bf16 %v3559_v44  ;;  %v564_v53 = vpack.c.bf16 %v552_v41, %v552_v41  ;;  %v565_v2 = vpack.c.bf16 %v553_v52, %v553_v52 }
 0x662   :  { %v563_v3 = vpack.c.bf16 %v551_v54, %v551_v54  ;;  %v566_v4 = vpack.c.bf16 %v554_v55, %v554_v55 }
 0x663   :  { %v532_v56 = vsel %vm529_vm5, %v3560_v51, %v3561_v50  ;;  %v588_v9 = vrot.slane %v564_v53, 7  ;;  %v589_v21 = vrot.slane %v565_v2, 7 }
 0x664   :  { %v3564_v57 = vpop.permute.xlu1 %3563  ;;  %v535_v61 = vsel %vm4392_vm9, %v532_v56, 0.0  ;;  %v587_v22 = vrot.slane %v563_v3, 7  ;;  %v590_v24 = vrot.slane %v566_v4, 7  ;;  %vm4574_vm9 = vmpackc.low %vm4415_vm13, %vm4415_vm13 }
 0x665   :  { %v3566_v62 = vunpack.i.h.bf16 %v3564_v57  ;;  %v3565_v63 = vunpack.i.l.bf16 %v3564_v57  ;;  %v556_v5 = vpack.c.bf16 %v535_v61, %v535_v61 }
 0x667   :  { %v530_v6 = vsel %vm529_vm5, %v3565_v63, %v3566_v62  ;;  %v531_v7 = vsel %vm529_vm5, %v3561_v50, %v3565_v63  ;;  %v533_v8 = vsel %vm529_vm5, %v3566_v62, %v3560_v51  ;;  %v595_v14 = vsel %vm4433_vm0, %v556_v5, %v571_v58 }
 0x668   :  { %v534_v10 = vsel %vm497_vm10, %v533_v8, 0.0  ;;  %v536_v11 = vsel %vm4399_vm12, %v531_v7, 0.0  ;;  %v537_v13 = vsel %vm4415_vm13, %v530_v6, 0.0  ;;  %v604_v20 = vsel %vm591_vm11, %v595_v14, %v588_v9  ;;  %vm4587_vm10 = vmpackc.low %vm4399_vm12, %vm4399_vm12 }
 0x669   :  { %v555_v15 = vpack.c.bf16 %v534_v10, %v534_v10  ;;  %v557_v16 = vpack.c.bf16 %v536_v11, %v536_v11  ;;  %v558_v19 = vpack.c.bf16 %v537_v13, %v537_v13  ;;  %v661_v23 = vand.u32 %v658_v59, %v604_v20  ;;  %vm4665_vm12 = vmpackc.low %vm4388_vm8, %vm4388_vm8 }
 0x66a   :  { %vm4681_vm8 = vmpackc.low %vm4380_vm6, %vm4380_vm6  ;;  %vm963_vm6 = vcmask 785408  }
 0x66b   :  { %v594_v26 = vsel %vm4433_vm0, %v555_v15, %v568_v60  ;;  %v597_v29 = vsel %vm4433_vm0, %v558_v19, %v577_v1  ;;  %v596_v31 = vsel %vm4433_vm0, %v557_v16, %v574_v49  ;;  %667 = vmatprep.subr.bf16.mxu0 %v661_v23 }
 0x66c   :  { %v601_v32 = vsel %vm591_vm11, %v594_v26, %v587_v22  ;;  %v610_v33 = vsel %vm591_vm11, %v597_v29, %v590_v24  ;;  %v607_v34 = vsel %vm591_vm11, %v596_v31, %v589_v21  ;;  %v929_v26 = vld [vmem:[%s5847_s10] sm:$0xff]  ;;  %v930_v29 = vld [vmem:[%s5847_s10 + $0x8] sm:$0xff]  ;;  %v931_v31 = vld [vmem:[%s5847_s10 + $0x10] sm:$0xff] }
 0x66d   :  { %v659_v35 = vand.u32 %v658_v59, %v601_v32  ;;  %v665_v36 = vand.u32 %v658_v59, %v610_v33  ;;  %v663_v38 = vand.u32 %v658_v59, %v607_v34  ;;  %v622_v42 = vpop.permute.xlu0 %621  ;;  %v932_v32 = vld [vmem:[%s5847_s10 + $0x18] sm:$0xff]  ;;  %vm4652_vm11 = vmpackc.low %vm4384_vm7, %vm4384_vm7 }
 0x66e   :  { %vm4674_vm7 = vmpackc.low %vm501_vm4, %vm501_vm4 }
 0x66f   :  { %668 = vmatpush1.bf16.msra.mxu0 %v659_v35  ;;  %720 = vmatprep.subr.bf16.mxu1 %v665_v36 }
 0x670   :  { %721 = vmatpush1.bf16.msra.mxu1 %v663_v38 }
 0x671   :  { %v637_v63 = vpop.permute.xlu0 %636 }
 0x672   :  { %3046 = vmatmul.mubr.msk.bf16.vlgmr.msra.gmra.mrb[4].mxu0 %vm649_vm1, %v4129_v39 }
 0x673   :  { %3048 = vmatmul.mubr.msk.bf16.vlgmr.msra.gmra.mrb[4].mxu1 %vm649_vm1, %v4129_v39  ;;  %709 = vmatprep.mubr.bf16.mxu0 %v4191_v12 }
 0x674   :  { %762 = vmatprep.mubr.bf16.mxu1 %v4191_v12 }
 0x675   :  { %v627_v41 = vpop.permute.xlu1 %626 }
 0x679   :  { %v632_v61 = vpop.permute.xlu1 %631 }
 0x67a   :  { %3047 = vmatmul.mubr.msk.bf16.gmra.mrb[8].mxu0 %vm649_vm1, %v4130_v40 }
 0x67b   :  { %3049 = vmatmul.mubr.msk.bf16.gmra.mrb[8].mxu1 %vm649_vm1, %v4130_v40  ;;  %1002 = vmatprep.mubr.bf16.mxu0 %v4191_v12 }
 0x67c   :  { %1055 = vmatprep.mubr.bf16.mxu1 %v4191_v12 }
 0x745   :  { %v701_v43 = vpop.f32.mrb[4].mxu0 }
 0x746   :  { %v703_v44 = vpop.f32.mrb[5].mxu0  ;;  %v754_v46 = vpop.f32.mrb[4].mxu1  ;;  %v4471_v49 = vadd.f32 %v701_v43, %v622_v42 }
 0x747   :  { %v705_v47 = vpop.f32.mrb[6].mxu0  ;;  %v756_v48 = vpop.f32.mrb[5].mxu1  ;;  %v4475_v53 = vadd.f32 %v703_v44, %v622_v42  ;;  %v4479_v56 = vadd.f32 %v754_v46, %v622_v42 }
 0x748   :  { %v4473_v50 = vadd.f32 %v705_v47, %v627_v41  ;;  %v707_v51 = vpop.f32.mrb[7].mxu0  ;;  %v758_v52 = vpop.f32.mrb[6].mxu1  ;;  %v4490_v62 = vadd.f32 %v756_v48, %v622_v42 }
 0x749   :  { %v4477_v54 = vadd.f32 %v707_v51, %v627_v41  ;;  %v760_v55 = vpop.f32.mrb[7].mxu1  ;;  %v4481_v57 = vadd.f32 %v758_v52, %v627_v41 }
 0x74a   :  { %v3569_v58 = vpack.i.bf16 %v4473_v50, %v4471_v49  ;;  %v4485_v59 = vadd.f32 %v760_v55, %v627_v41 }
 0x74b   :  { %v3579_v60 = vpack.i.bf16 %v4477_v54, %v4475_v53  ;;  %v3574_v3 = vpack.i.bf16 %v4481_v57, %v4479_v56 }
 0x74c   :  { %3570 = vrot.lane.b32.xlu1 %v3569_v58, %s4190_s6  ;;  %v3584_v6 = vpack.i.bf16 %v4485_v59, %v4490_v62 }
 0x74d   :  { %v711_v0 = vpop.f32.mrb[8].mxu0  ;;  %3580 = vrot.lane.b32.xlu0 %v3579_v60, %s4190_s6 }
 0x74e   :  { %v713_v1 = vpop.f32.mrb[9].mxu0  ;;  %v764_v2 = vpop.f32.mrb[8].mxu1  ;;  %v4497_v7 = vadd.f32 %v711_v0, %v632_v61 }
 0x74f   :  { %v715_v4 = vpop.f32.mrb[10].mxu0  ;;  %v766_v5 = vpop.f32.mrb[9].mxu1  ;;  %v4502_v11 = vadd.f32 %v713_v1, %v632_v61  ;;  %v4515_v21 = vadd.f32 %v764_v2, %v632_v61 }
 0x750   :  { %v4499_v8 = vadd.f32 %v715_v4, %v637_v63  ;;  %v717_v9 = vpop.f32.mrb[11].mxu0  ;;  %v768_v10 = vpop.f32.mrb[10].mxu1  ;;  %3575 = vrot.lane.b32.xlu1 %v3574_v3, %s4190_s6  ;;  %v4518_v22 = vadd.f32 %v766_v5, %v632_v61 }
 0x751   :  { %v4504_v13 = vadd.f32 %v717_v9, %v637_v63  ;;  %v770_v14 = vpop.f32.mrb[11].mxu1  ;;  %3585 = vrot.lane.b32.xlu0 %v3584_v6, %s4190_s6  ;;  %v4507_v15 = vadd.f32 %v768_v10, %v637_v63 }
 0x752   :  { %v3589_v16 = vpack.i.bf16 %v4499_v8, %v4497_v7  ;;  %v4511_v19 = vadd.f32 %v770_v14, %v637_v63 }
 0x753   :  { %v3604_v20 = vpack.i.bf16 %v4504_v13, %v4502_v11  ;;  %v3594_v23 = vpack.i.bf16 %v4507_v15, %v4515_v21 }
 0x754   :  { %3590 = vrot.lane.b32.xlu1 %v3589_v16, %s4190_s6  ;;  %v3609_v24 = vpack.i.bf16 %v4511_v19, %v4518_v22 }
 0x755   :  { %3605 = vrot.lane.b32.xlu0 %v3604_v20, %s4190_s6 }
 0x758   :  { %3595 = vrot.lane.b32.xlu1 %v3594_v23, %s4190_s6 }
 0x759   :  { %3610 = vrot.lane.b32.xlu0 %v3609_v24, %s4190_s6 }
 0x75c   :  { %3600 = vrot.lane.b32.xlu1 %v3569_v58, %s4189_s4 }
 0x75d   :  { %3615 = vrot.lane.b32.xlu0 %v3579_v60, %s4189_s4 }
 0x760   :  { %3620 = vrot.lane.b32.xlu1 %v3574_v3, %s4189_s4 }
 0x761   :  { %3625 = vrot.lane.b32.xlu0 %v3584_v6, %s4189_s4 }
 0x764   :  { %3630 = vrot.lane.b32.xlu1 %v3589_v16, %s4189_s4 }
 0x765   :  { %3640 = vrot.lane.b32.xlu0 %v3604_v20, %s4189_s4 }
 0x768   :  { %3635 = vrot.lane.b32.xlu1 %v3594_v23, %s4189_s4 }
 0x769   :  { %3645 = vrot.lane.b32.xlu0 %v3609_v24, %s4189_s4 }
 0x76c   :  { %935 = vperm.xlu1 %3568, %v929_v26  }
 0x76d   :  { %940 = vperm.xlu0 %3567, %v930_v29  }
 0x770   :  { %945 = vperm.xlu1 %3568, %v931_v31  }
 0x771   :  { %950 = vperm.xlu0 %3567, %v932_v32  }
 0x7be   :  { %v3571_v33 = vpop.permute.xlu1 %3570 }
 0x7bf   :  { %v3573_v34 = vunpack.i.h.bf16 %v3571_v33  ;;  %v3572_v35 = vunpack.i.l.bf16 %v3571_v33  ;;  %v3581_v36 = vpop.permute.xlu0 %3580 }
 0x7c0   :  { %v3583_v38 = vunpack.i.h.bf16 %v3581_v36  ;;  %v3582_v39 = vunpack.i.l.bf16 %v3581_v36 }
 0x7c2   :  { %v817_v41 = vsel %vm529_vm5, %v3572_v35, %v3582_v39  ;;  %v818_v42 = vsel %vm529_vm5, %v3573_v34, %v3583_v38  ;;  %v3576_v43 = vpop.permute.xlu1 %3575 }
 0x7c3   :  { %v3578_v44 = vunpack.i.h.bf16 %v3576_v43  ;;  %v3577_v46 = vunpack.i.l.bf16 %v3576_v43  ;;  %v3586_v47 = vpop.permute.xlu0 %3585  ;;  %v3053_v48 = vpack.c.bf16 %v818_v42, %v817_v41 }
 0x7c4   :  { %v3588_v51 = vunpack.i.h.bf16 %v3586_v47  ;;  %v3587_v52 = vunpack.i.l.bf16 %v3586_v47 }
 0x7c5   :  { %v814_v55 = vsel %vm529_vm5, %v3583_v38, %v3578_v44  ;;  %v813_v58 = vsel %vm529_vm5, %v3582_v39, %v3577_v46  ;;  %3054 = vmatprep.subr.msk.bf16.mxu0 %vm4550_vm2, %v3053_v48  ;;  %v914_v48 = vpack.c.bf16 %v4477_v54, %v4475_v53 }
 0x7c6   :  { %v809_v61 = vsel %vm529_vm5, %v3577_v46, %v3587_v52  ;;  %v810_v63 = vsel %vm529_vm5, %v3578_v44, %v3588_v51  ;;  %v821_v0 = vsel %vm529_vm5, %v3587_v52, %v3572_v35  ;;  %v3591_v1 = vpop.permute.xlu1 %3590  ;;  %v822_v2 = vsel %vm529_vm5, %v3588_v51, %v3573_v34 }
 0x7c7   :  { %v3593_v3 = vunpack.i.h.bf16 %v3591_v1  ;;  %v3592_v4 = vunpack.i.l.bf16 %v3591_v1  ;;  %v3606_v5 = vpop.permute.xlu0 %3605  ;;  %v3079_v6 = vpack.c.bf16 %v810_v63, %v809_v61  ;;  %v3082_v9 = vpack.c.bf16 %v814_v55, %v813_v58 }
 0x7c8   :  { %v3056_v10 = vpack.c.bf16 %v822_v2, %v821_v0  ;;  %v3608_v14 = vunpack.i.h.bf16 %v3606_v5  ;;  %v3607_v16 = vunpack.i.l.bf16 %v3606_v5  ;;  %v916_v51 = vpack.c.bf16 %v4485_v59, %v4490_v62 }
 0x7c9   :  { %3080 = vmatprep.subr.msk.bf16.mxu1 %vm4574_vm9, %v3079_v6  ;;  %v913_v55 = vpack.c.bf16 %v4473_v50, %v4471_v49  ;;  %v918_v6 = vpack.c.bf16 %v4504_v13, %v4502_v11 }
 0x7ca   :  { %v819_v37 = vsel %vm529_vm5, %v3592_v4, %v3607_v16  ;;  %v820_v20 = vsel %vm529_vm5, %v3593_v3, %v3608_v14  ;;  %3057 = vmatpush1.bf16.msk.msra.mxu0 %vm4561_vm3, %v3056_v10  ;;  %v3596_v23 = vpop.permute.xlu1 %3595  ;;  %3083 = vmatpush1.bf16.msk.msra.mxu1 %vm4587_vm10, %v3082_v9  ;;  %v915_v9 = vpack.c.bf16 %v4481_v57, %v4479_v56 }
 0x7cb   :  { %v3598_v24 = vunpack.i.h.bf16 %v3596_v23  ;;  %v3597_v26 = vunpack.i.l.bf16 %v3596_v23  ;;  %v3611_v29 = vpop.permute.xlu0 %3610  ;;  %v3059_v31 = vpack.c.bf16 %v820_v20, %v819_v37  ;;  %v917_v10 = vpack.c.bf16 %v4499_v8, %v4497_v7 }
 0x7cc   :  { %v3613_v32 = vunpack.i.h.bf16 %v3611_v29  ;;  %v3612_v33 = vunpack.i.l.bf16 %v3611_v29  ;;  %v920_v20 = vpack.c.bf16 %v4511_v19, %v4518_v22  ;;  %v919_v23 = vpack.c.bf16 %v4507_v15, %v4515_v21 }
 0x7cd   :  { %v816_v34 = vsel %vm529_vm5, %v3608_v14, %v3598_v24  ;;  %v815_v35 = vsel %vm529_vm5, %v3607_v16, %v3597_v26  ;;  %3060 = vmatprep.subr.msk.bf16.mxu0 %vm4550_vm2, %v3059_v31 }
 0x7ce   :  { %v811_v36 = vsel %vm529_vm5, %v3597_v26, %v3612_v33  ;;  %v812_v38 = vsel %vm529_vm5, %v3598_v24, %v3613_v32  ;;  %v823_v39 = vsel %vm529_vm5, %v3612_v33, %v3592_v4  ;;  %v3601_v41 = vpop.permute.xlu1 %3600  ;;  %v824_v42 = vsel %vm529_vm5, %v3613_v32, %v3593_v3 }
 0x7cf   :  { %v3616_v43 = vpop.permute.xlu0 %3615  ;;  %v3085_v44 = vpack.c.bf16 %v812_v38, %v811_v36  ;;  %v3088_v46 = vpack.c.bf16 %v816_v34, %v815_v35  ;;  %v3062_v47 = vpack.c.bf16 %v824_v42, %v823_v39  ;;  %v3602_v58 = vunpack.i.l.bf16 %v3601_v41 }
 0x7d0   :  { %v3617_v61 = vunpack.i.l.bf16 %v3616_v43  ;;  %v3603_v2 = vunpack.i.h.bf16 %v3601_v41  ;;  %v3618_v3 = vunpack.i.h.bf16 %v3616_v43  ;;  %v4193_v32 = vmov 1966171168  }
 0x7d1   :  { %3086 = vmatprep.subr.msk.bf16.mxu1 %vm4574_vm9, %v3085_v44  ;;  %3063 = vmatpush1.bf16.msk.msra.mxu0 %vm4561_vm3, %v3062_v47 }
 0x7d2   :  { %v3621_v52 = vpop.permute.xlu1 %3620  ;;  %3089 = vmatpush1.bf16.msk.msra.mxu1 %vm4587_vm10, %v3088_v46  ;;  %974 = vmatprep.subr.bf16.mxu0 %v914_v48  ;;  %v881_v24 = vsel %vm501_vm4, %v3602_v58, %v3617_v61  ;;  %v882_v33 = vsel %vm501_vm4, %v3603_v2, %v3618_v3 }
 0x7d3   :  { %v3623_v63 = vunpack.i.h.bf16 %v3621_v52  ;;  %v3622_v0 = vunpack.i.l.bf16 %v3621_v52  ;;  %v3626_v1 = vpop.permute.xlu0 %3625  ;;  %1027 = vmatprep.subr.bf16.mxu1 %v916_v51  ;;  %v3068_v52 = vpack.c.bf16 %v882_v33, %v881_v24 }
 0x7d4   :  { %v3628_v4 = vunpack.i.h.bf16 %v3626_v1  ;;  %v3627_v5 = vunpack.i.l.bf16 %v3626_v1 }
 0x7d5   :  { %v878_v14 = vsel %vm501_vm4, %v3618_v3, %v3623_v63  ;;  %v877_v16 = vsel %vm501_vm4, %v3617_v61, %v3622_v0  ;;  %975 = vmatpush1.bf16.msra.mxu0 %v913_v55 }
 0x7d6   :  { %v3631_v37 = vpop.permute.xlu1 %3630  ;;  %v885_v26 = vsel %vm501_vm4, %v3627_v5, %v3602_v58  ;;  %v886_v29 = vsel %vm501_vm4, %v3628_v4, %v3603_v2  ;;  %976 = vmatprep.subr.bf16.mxu0 %v918_v6  ;;  %1028 = vmatpush1.bf16.msra.mxu1 %v915_v9  ;;  %v873_v34 = vsel %vm501_vm4, %v3622_v0, %v3627_v5 }
 0x7d7   :  { %v3641_v31 = vpop.permute.xlu0 %3640  ;;  %v874_v35 = vsel %vm501_vm4, %v3623_v63, %v3628_v4  ;;  %v3633_v36 = vunpack.i.h.bf16 %v3631_v37  ;;  %1029 = vmatprep.subr.bf16.mxu1 %v920_v20  ;;  %v3632_v38 = vunpack.i.l.bf16 %v3631_v37  ;;  %v3065_v42 = vpack.c.bf16 %v878_v14, %v877_v16  ;;  %v4131_v16 = vld [vmem:[%s5846_s9] sm:$0xff]   ;;  %v4132_v37 = vld [vmem:[%s5846_s9 + $0x8] sm:$0xff]  }
 0x7d8   :  { %v3643_v39 = vunpack.i.h.bf16 %v3641_v31  ;;  %v3642_v41 = vunpack.i.l.bf16 %v3641_v31  ;;  %v3091_v44 = vpack.c.bf16 %v886_v29, %v885_v26  ;;  %v3094_v55 = vpack.c.bf16 %v874_v35, %v873_v34 }
 0x7d9   :  { %977 = vmatpush1.bf16.msra.mxu0 %v917_v10 }
 0x7da   :  { %v3636_v43 = vpop.permute.xlu1 %3635  ;;  %3066 = vmatprep.subr.msk.bf16.mxu0 %vm4652_vm11, %v3065_v42  ;;  %1030 = vmatpush1.bf16.msra.mxu1 %v919_v23  ;;  %v883_v63 = vsel %vm501_vm4, %v3632_v38, %v3642_v41  ;;  %v884_v0 = vsel %vm501_vm4, %v3633_v36, %v3643_v39 }
 0x7db   :  { %v3638_v46 = vunpack.i.h.bf16 %v3636_v43  ;;  %v3637_v47 = vunpack.i.l.bf16 %v3636_v43  ;;  %v3646_v48 = vpop.permute.xlu0 %3645  ;;  %3092 = vmatprep.subr.msk.bf16.mxu1 %vm4665_vm12, %v3091_v44  ;;  %v3074_v14 = vpack.c.bf16 %v884_v0, %v883_v63 }
 0x7dc   :  { %v3648_v58 = vunpack.i.h.bf16 %v3646_v48  ;;  %v3647_v61 = vunpack.i.l.bf16 %v3646_v48 }
 0x7dd   :  { %v880_v25 = vsel %vm501_vm4, %v3643_v39, %v3638_v46  ;;  %v879_v1 = vsel %vm501_vm4, %v3642_v41, %v3637_v47  ;;  %3069 = vmatpush1.bf16.msk.msra.mxu0 %vm4674_vm7, %v3068_v52 }
 0x7de   :  { %v875_v2 = vsel %vm501_vm4, %v3637_v47, %v3647_v61  ;;  %v876_v3 = vsel %vm501_vm4, %v3638_v46, %v3648_v58  ;;  %v887_v4 = vsel %vm501_vm4, %v3647_v61, %v3632_v38  ;;  %v888_v5 = vsel %vm501_vm4, %v3648_v58, %v3633_v36  ;;  %3095 = vmatpush1.bf16.msk.msra.mxu1 %vm4681_vm8, %v3094_v55 }
 0x7df   :  { %v3100_v6 = vpack.c.bf16 %v876_v3, %v875_v2  ;;  %v3071_v9 = vpack.c.bf16 %v880_v25, %v879_v1  ;;  %v3097_v10 = vpack.c.bf16 %v888_v5, %v887_v4 }
 0x7e1   :  { %3072 = vmatprep.subr.msk.bf16.mxu0 %vm4652_vm11, %v3071_v9  ;;  %3098 = vmatprep.subr.msk.bf16.mxu1 %vm4665_vm12, %v3097_v10 }
 0x7e2   :  { %3075 = vmatpush1.bf16.msk.msra.mxu0 %vm4674_vm7, %v3074_v14  ;;  %3101 = vmatpush1.bf16.msk.msra.mxu1 %vm4681_vm8, %v3100_v6 }
 0x7e5   :  { %3076 = vmatmul.mubr.msk.bf16.vlgmr.msra.gmra.mrb[12].mxu0 %vm963_vm6, %v4131_v16  ;;  %3102 = vmatmul.mubr.msk.bf16.vlgmr.msra.gmra.mrb[12].mxu1 %vm963_vm6, %v4131_v16 }
 0x7e6   :  { %1012 = vmatprep.mubr.bf16.mxu0 %v4191_v12  ;;  %1065 = vmatprep.mubr.bf16.mxu1 %v4191_v12 }
 0x7eb   :  { %v936_v20 = vpop.permute.xlu1 %935 }
 0x7ec   :  { %v941_v23 = vpop.permute.xlu0 %940 }
 0x7ed   :  { %3077 = vmatmul.mubr.msk.bf16.gmra.mrb[16].mxu0 %vm963_vm6, %v4132_v37  ;;  %3103 = vmatmul.mubr.msk.bf16.gmra.mrb[16].mxu1 %vm963_vm6, %v4132_v37 }
 0x7ee   :  { %1322 = vmatprep.mubr.bf16.mxu0 %v4191_v12  ;;  %1375 = vmatprep.mubr.bf16.mxu1 %v4191_v12 }
 0x7ef   :  { %v946_v25 = vpop.permute.xlu1 %945 }
 0x7f0   :  { %v951_v4 = vpop.permute.xlu0 %950 }
 0x8b8   :  { %v1004_v24 = vpop.f32.mrb[12].mxu0  ;;  %v1057_v31 = vpop.f32.mrb[12].mxu1 }
 0x8b9   :  { %v1005_v26 = vadd.f32 %v1004_v24, %v936_v20  ;;  %v1006_v29 = vpop.f32.mrb[13].mxu0  ;;  %v1058_v34 = vadd.f32 %v1057_v31, %v936_v20  ;;  %v1059_v36 = vpop.f32.mrb[13].mxu1 }
 0x8ba   :  { %v1007_v33 = vadd.f32 %v1006_v29, %v936_v20  ;;  %v1008_v35 = vpop.f32.mrb[14].mxu0  ;;  %v1060_v39 = vadd.f32 %v1059_v36, %v936_v20  ;;  %v1061_v42 = vpop.f32.mrb[14].mxu1 }
 0x8bb   :  { %v1009_v38 = vadd.f32 %v1008_v35, %v941_v23  ;;  %v1010_v41 = vpop.f32.mrb[15].mxu0  ;;  %v1062_v44 = vadd.f32 %v1061_v42, %v941_v23  ;;  %v1063_v46 = vpop.f32.mrb[15].mxu1  ;;  %v1076_v47 = vmax.f32 %v1005_v26, 0.0  ;;  %v1078_v58 = vmax.f32 %v1058_v34, 0.0 }
 0x8bc   :  { %v1011_v43 = vadd.f32 %v1010_v41, %v941_v23  ;;  %v1077_v48 = vmax.f32 %v1007_v33, 0.0  ;;  %v1064_v55 = vadd.f32 %v1063_v46, %v941_v23  ;;  %v1079_v61 = vmax.f32 %v1060_v39, 0.0 }
 0x8bd   :  { %v1080_v52 = vmax.f32 %v1009_v38, 0.0  ;;  %v1082_v0 = vmax.f32 %v1062_v44, 0.0 }
 0x8be   :  { %v1081_v63 = vmax.f32 %v1011_v43, 0.0  ;;  %v1083_v2 = vmax.f32 %v1064_v55, 0.0 }
 0x8bf   :  { %v4729_v1 = vpack.c.bf16 %v1080_v52, %v1076_v47  ;;  %v3649_v3 = vpack.i.bf16 %v1080_v52, %v1076_v47  ;;  %v4731_v5 = vpack.c.bf16 %v1082_v0, %v1078_v58  ;;  %v3654_v10 = vpack.i.bf16 %v1082_v0, %v1078_v58 }
 0x8c0   :  { %v1014_v6 = vpop.f32.mrb[16].mxu0  ;;  %v3659_v9 = vpack.i.bf16 %v1081_v63, %v1077_v48  ;;  %v1067_v37 = vpop.f32.mrb[16].mxu1  ;;  %v3664_v20 = vpack.i.bf16 %v1083_v2, %v1079_v61  ;;  %v4735_v31 = vpack.c.bf16 %v1081_v63, %v1077_v48  ;;  %v4737_v33 = vpack.c.bf16 %v1083_v2, %v1079_v61 }
 0x8c1   :  { %v1015_v14 = vadd.f32 %v1014_v6, %v946_v25  ;;  %v1016_v16 = vpop.f32.mrb[17].mxu0  ;;  %3650 = vrot.lane.b32.xlu1 %v3649_v3, %s4190_s6  ;;  %v1068_v24 = vadd.f32 %v1067_v37, %v946_v25  ;;  %v1069_v29 = vpop.f32.mrb[17].mxu1  ;;  %v3108_v37 = vld [vmem:[%s5847_s10 + $0x20] sm:$0xff] }
 0x8c2   :  { %v1017_v23 = vadd.f32 %v1016_v16, %v946_v25  ;;  %v1018_v26 = vpop.f32.mrb[18].mxu0  ;;  %3660 = vrot.lane.b32.xlu0 %v3659_v9, %s4190_s6  ;;  %v1070_v35 = vadd.f32 %v1069_v29, %v946_v25  ;;  %v1071_v38 = vpop.f32.mrb[18].mxu1 }
 0x8c3   :  { %v1019_v34 = vadd.f32 %v1018_v26, %v951_v4  ;;  %v1020_v36 = vpop.f32.mrb[19].mxu0  ;;  %v1072_v41 = vadd.f32 %v1071_v38, %v951_v4  ;;  %v1073_v42 = vpop.f32.mrb[19].mxu1  ;;  %v1084_v43 = vmax.f32 %v1015_v14, 0.0  ;;  %v1086_v52 = vmax.f32 %v1068_v24, 0.0 }
 0x8c4   :  { %v1021_v39 = vadd.f32 %v1020_v36, %v951_v4  ;;  %v1085_v44 = vmax.f32 %v1017_v23, 0.0  ;;  %v1074_v47 = vadd.f32 %v1073_v42, %v951_v4  ;;  %v1087_v55 = vmax.f32 %v1070_v35, 0.0 }
 0x8c5   :  { %v1088_v46 = vmax.f32 %v1019_v34, 0.0  ;;  %3655 = vrot.lane.b32.xlu1 %v3654_v10, %s4190_s6  ;;  %v1090_v48 = vmax.f32 %v1072_v41, 0.0 }
 0x8c6   :  { %v1089_v58 = vmax.f32 %v1021_v39, 0.0  ;;  %3665 = vrot.lane.b32.xlu0 %v3664_v20, %s4190_s6  ;;  %v1091_v63 = vmax.f32 %v1074_v47, 0.0 }
 0x8c7   :  { %v4741_v61 = vpack.c.bf16 %v1088_v46, %v1084_v43  ;;  %v3669_v0 = vpack.i.bf16 %v1088_v46, %v1084_v43  ;;  %v4743_v25 = vpack.c.bf16 %v1090_v48, %v1086_v52  ;;  %v3674_v6 = vpack.i.bf16 %v1090_v48, %v1086_v52 }
 0x8c8   :  { %v3684_v2 = vpack.i.bf16 %v1089_v58, %v1085_v44  ;;  %v3689_v14 = vpack.i.bf16 %v1091_v63, %v1087_v55  ;;  %v4746_v4 = vpack.c.bf16 %v1089_v58, %v1085_v44  ;;  %v4749_v16 = vpack.c.bf16 %v1091_v63, %v1087_v55 }
 0x8c9   :  { %3670 = vrot.lane.b32.xlu1 %v3669_v0, %s4190_s6 }
 0x8ca   :  { %3685 = vrot.lane.b32.xlu0 %v3684_v2, %s4190_s6 }
 0x8cd   :  { %3675 = vrot.lane.b32.xlu1 %v3674_v6, %s4190_s6 }
 0x8ce   :  { %3690 = vrot.lane.b32.xlu0 %v3689_v14, %s4190_s6 }
 0x8d1   :  { %3680 = vrot.lane.b32.xlu1 %v3649_v3, %s4189_s4  ;;  %v3109_v3 = vld [vmem:[%s5847_s10 + $0x28] sm:$0xff] }
 0x8d2   :  { %3695 = vrot.lane.b32.xlu0 %v3659_v9, %s4189_s4  ;;  %v3110_v9 = vld [vmem:[%s5847_s10 + $0x30] sm:$0xff] }
 0x8d5   :  { %3700 = vrot.lane.b32.xlu1 %v3654_v10, %s4189_s4  ;;  %v3111_v10 = vld [vmem:[%s5847_s10 + $0x38] sm:$0xff] }
 0x8d6   :  { %3705 = vrot.lane.b32.xlu0 %v3664_v20, %s4189_s4 }
 0x8d9   :  { %3710 = vrot.lane.b32.xlu1 %v3669_v0, %s4189_s4 }
 0x8da   :  { %3720 = vrot.lane.b32.xlu0 %v3684_v2, %s4189_s4 }
 0x8dd   :  { %3715 = vrot.lane.b32.xlu1 %v3674_v6, %s4189_s4 }
 0x8de   :  { %3725 = vrot.lane.b32.xlu0 %v3689_v14, %s4189_s4 }
 0x8e1   :  { %1256 = vperm.xlu1 %3568, %v3108_v37  }
 0x8e2   :  { %1261 = vperm.xlu0 %3567, %v3109_v3  }
 0x8e5   :  { %1266 = vperm.xlu1 %3568, %v3110_v9  }
 0x8e6   :  { %1271 = vperm.xlu0 %3567, %v3111_v10  }
 0x933   :  { %v3651_v20 = vpop.permute.xlu1 %3650 }
 0x934   :  { %v3653_v23 = vunpack.i.h.bf16 %v3651_v20  ;;  %v3652_v24 = vunpack.i.l.bf16 %v3651_v20  ;;  %v3661_v26 = vpop.permute.xlu0 %3660 }
 0x935   :  { %v3663_v29 = vunpack.i.h.bf16 %v3661_v26  ;;  %v3662_v34 = vunpack.i.l.bf16 %v3661_v26 }
 0x937   :  { %v1137_v35 = vsel %vm529_vm5, %v3652_v24, %v3662_v34  ;;  %v1138_v36 = vsel %vm529_vm5, %v3653_v23, %v3663_v29  ;;  %v3656_v38 = vpop.permute.xlu1 %3655 }
 0x938   :  { %v3658_v39 = vunpack.i.h.bf16 %v3656_v38  ;;  %v3657_v41 = vunpack.i.l.bf16 %v3656_v38  ;;  %v3666_v42 = vpop.permute.xlu0 %3665  ;;  %v3115_v43 = vpack.c.bf16 %v1138_v36, %v1137_v35 }
 0x939   :  { %v3668_v44 = vunpack.i.h.bf16 %v3666_v42  ;;  %v3667_v46 = vunpack.i.l.bf16 %v3666_v42 }
 0x93a   :  { %v1134_v47 = vsel %vm529_vm5, %v3663_v29, %v3658_v39  ;;  %v1133_v52 = vsel %vm529_vm5, %v3662_v34, %v3657_v41  ;;  %3116 = vmatprep.subr.msk.bf16.mxu0 %vm4550_vm2, %v3115_v43 }
 0x93b   :  { %v1129_v55 = vsel %vm529_vm5, %v3657_v41, %v3667_v46  ;;  %v1130_v58 = vsel %vm529_vm5, %v3658_v39, %v3668_v44  ;;  %v1141_v48 = vsel %vm529_vm5, %v3667_v46, %v3652_v24  ;;  %v3671_v63 = vpop.permute.xlu1 %3670  ;;  %v1142_v0 = vsel %vm529_vm5, %v3668_v44, %v3653_v23 }
 0x93c   :  { %v3673_v2 = vunpack.i.h.bf16 %v3671_v63  ;;  %v3672_v6 = vunpack.i.l.bf16 %v3671_v63  ;;  %v3686_v14 = vpop.permute.xlu0 %3685  ;;  %v3141_v37 = vpack.c.bf16 %v1130_v58, %v1129_v55  ;;  %v3144_v3 = vpack.c.bf16 %v1134_v47, %v1133_v52 }
 0x93d   :  { %v3118_v9 = vpack.c.bf16 %v1142_v0, %v1141_v48  ;;  %v3688_v10 = vunpack.i.h.bf16 %v3686_v14  ;;  %v3687_v20 = vunpack.i.l.bf16 %v3686_v14 }
 0x93e   :  { %3142 = vmatprep.subr.msk.bf16.mxu1 %vm4574_vm9, %v3141_v37 }
 0x93f   :  { %v1139_v26 = vsel %vm529_vm5, %v3672_v6, %v3687_v20  ;;  %v1140_v24 = vsel %vm529_vm5, %v3673_v2, %v3688_v10  ;;  %3119 = vmatpush1.bf16.msk.msra.mxu0 %vm4561_vm3, %v3118_v9  ;;  %v3676_v23 = vpop.permute.xlu1 %3675  ;;  %3145 = vmatpush1.bf16.msk.msra.mxu1 %vm4587_vm10, %v3144_v3 }
 0x940   :  { %v3678_v29 = vunpack.i.h.bf16 %v3676_v23  ;;  %v3677_v34 = vunpack.i.l.bf16 %v3676_v23  ;;  %v3691_v35 = vpop.permute.xlu0 %3690  ;;  %v3121_v36 = vpack.c.bf16 %v1140_v24, %v1139_v26 }
 0x941   :  { %v3693_v38 = vunpack.i.h.bf16 %v3691_v35  ;;  %v3692_v39 = vunpack.i.l.bf16 %v3691_v35 }
 0x942   :  { %v1136_v41 = vsel %vm529_vm5, %v3688_v10, %v3678_v29  ;;  %v1135_v42 = vsel %vm529_vm5, %v3687_v20, %v3677_v34  ;;  %3122 = vmatprep.subr.msk.bf16.mxu0 %vm4550_vm2, %v3121_v36 }
 0x943   :  { %v1131_v43 = vsel %vm529_vm5, %v3677_v34, %v3692_v39  ;;  %v1132_v44 = vsel %vm529_vm5, %v3678_v29, %v3693_v38  ;;  %v1143_v46 = vsel %vm529_vm5, %v3692_v39, %v3672_v6  ;;  %v3681_v47 = vpop.permute.xlu1 %3680  ;;  %v1144_v52 = vsel %vm529_vm5, %v3693_v38, %v3673_v2 }
 0x944   :  { %v3696_v55 = vpop.permute.xlu0 %3695  ;;  %v3147_v58 = vpack.c.bf16 %v1132_v44, %v1131_v43  ;;  %v3150_v48 = vpack.c.bf16 %v1136_v41, %v1135_v42  ;;  %v3124_v63 = vpack.c.bf16 %v1144_v52, %v1143_v46  ;;  %v3682_v14 = vunpack.i.l.bf16 %v3681_v47 }
 0x945   :  { %v3697_v6 = vunpack.i.l.bf16 %v3696_v55  ;;  %v3683_v9 = vunpack.i.h.bf16 %v3681_v47  ;;  %v3698_v10 = vunpack.i.h.bf16 %v3696_v55 }
 0x946   :  { %3148 = vmatprep.subr.msk.bf16.mxu1 %vm4574_vm9, %v3147_v58  ;;  %3125 = vmatpush1.bf16.msk.msra.mxu0 %vm4561_vm3, %v3124_v63 }
 0x947   :  { %v3701_v0 = vpop.permute.xlu1 %3700  ;;  %3151 = vmatpush1.bf16.msk.msra.mxu1 %vm4587_vm10, %v3150_v48  ;;  %1294 = vmatprep.subr.bf16.mxu0 %v4735_v31  ;;  %v1201_v34 = vsel %vm501_vm4, %v3682_v14, %v3697_v6  ;;  %v1202_v36 = vsel %vm501_vm4, %v3683_v9, %v3698_v10 }
 0x948   :  { %v3703_v37 = vunpack.i.h.bf16 %v3701_v0  ;;  %v3702_v3 = vunpack.i.l.bf16 %v3701_v0  ;;  %v3706_v2 = vpop.permute.xlu0 %3705  ;;  %1347 = vmatprep.subr.bf16.mxu1 %v4737_v33  ;;  %v3130_v55 = vpack.c.bf16 %v1202_v36, %v1201_v34 }
 0x949   :  { %v3708_v20 = vunpack.i.h.bf16 %v3706_v2  ;;  %v3707_v26 = vunpack.i.l.bf16 %v3706_v2 }
 0x94a   :  { %v1198_v24 = vsel %vm501_vm4, %v3698_v10, %v3703_v37  ;;  %v1197_v23 = vsel %vm501_vm4, %v3697_v6, %v3702_v3  ;;  %1295 = vmatpush1.bf16.msra.mxu0 %v4729_v1 }
 0x94b   :  { %v3711_v29 = vpop.permute.xlu1 %3710  ;;  %v1205_v31 = vsel %vm501_vm4, %v3707_v26, %v3682_v14  ;;  %v1206_v33 = vsel %vm501_vm4, %v3708_v20, %v3683_v9  ;;  %1296 = vmatprep.subr.bf16.mxu0 %v4746_v4  ;;  %1348 = vmatpush1.bf16.msra.mxu1 %v4731_v5  ;;  %v1193_v1 = vsel %vm501_vm4, %v3702_v3, %v3707_v26  ;;  %v4133_v26 = vld [vmem:[%s5846_s9 + $0x10] sm:$0xff]  }
 0x94c   :  { %v3721_v35 = vpop.permute.xlu0 %3720  ;;  %v1194_v38 = vsel %vm501_vm4, %v3703_v37, %v3708_v20  ;;  %v3713_v39 = vunpack.i.h.bf16 %v3711_v29  ;;  %1349 = vmatprep.subr.bf16.mxu1 %v4749_v16  ;;  %v3712_v41 = vunpack.i.l.bf16 %v3711_v29  ;;  %v3127_v44 = vpack.c.bf16 %v1198_v24, %v1197_v23  ;;  %v4134_v24 = vld [vmem:[%s5846_s9 + $0x18] sm:$0xff]  }
 0x94d   :  { %v3723_v42 = vunpack.i.h.bf16 %v3721_v35  ;;  %v3722_v43 = vunpack.i.l.bf16 %v3721_v35  ;;  %v3153_v4 = vpack.c.bf16 %v1206_v33, %v1205_v31  ;;  %v3156_v58 = vpack.c.bf16 %v1194_v38, %v1193_v1 }
 0x94e   :  { %1297 = vmatpush1.bf16.msra.mxu0 %v4741_v61 }
 0x94f   :  { %v3716_v5 = vpop.permute.xlu1 %3715  ;;  %3128 = vmatprep.subr.msk.bf16.mxu0 %vm4652_vm11, %v3127_v44  ;;  %1350 = vmatpush1.bf16.msra.mxu1 %v4743_v25  ;;  %v1203_v61 = vsel %vm501_vm4, %v3712_v41, %v3722_v43  ;;  %v1204_v63 = vsel %vm501_vm4, %v3713_v39, %v3723_v42 }
 0x950   :  { %v3718_v46 = vunpack.i.h.bf16 %v3716_v5  ;;  %v3717_v47 = vunpack.i.l.bf16 %v3716_v5  ;;  %v3726_v52 = vpop.permute.xlu0 %3725  ;;  %3154 = vmatprep.subr.msk.bf16.mxu1 %vm4665_vm12, %v3153_v4  ;;  %v3136_v20 = vpack.c.bf16 %v1204_v63, %v1203_v61 }
 0x951   :  { %v3728_v48 = vunpack.i.h.bf16 %v3726_v52  ;;  %v3727_v16 = vunpack.i.l.bf16 %v3726_v52 }
 0x952   :  { %v1200_v0 = vsel %vm501_vm4, %v3723_v42, %v3718_v46  ;;  %v1199_v25 = vsel %vm501_vm4, %v3722_v43, %v3717_v47  ;;  %3131 = vmatpush1.bf16.msk.msra.mxu0 %vm4674_vm7, %v3130_v55 }
 0x953   :  { %v1195_v14 = vsel %vm501_vm4, %v3717_v47, %v3727_v16  ;;  %v1196_v6 = vsel %vm501_vm4, %v3718_v46, %v3728_v48  ;;  %v1207_v37 = vsel %vm501_vm4, %v3727_v16, %v3712_v41  ;;  %v1208_v3 = vsel %vm501_vm4, %v3728_v48, %v3713_v39  ;;  %3157 = vmatpush1.bf16.msk.msra.mxu1 %vm4681_vm8, %v3156_v58 }
 0x954   :  { %v3162_v2 = vpack.c.bf16 %v1196_v6, %v1195_v14  ;;  %v3133_v9 = vpack.c.bf16 %v1200_v0, %v1199_v25  ;;  %v3159_v10 = vpack.c.bf16 %v1208_v3, %v1207_v37 }
 0x956   :  { %3134 = vmatprep.subr.msk.bf16.mxu0 %vm4652_vm11, %v3133_v9  ;;  %3160 = vmatprep.subr.msk.bf16.mxu1 %vm4665_vm12, %v3159_v10 }
 0x957   :  { %3137 = vmatpush1.bf16.msk.msra.mxu0 %vm4674_vm7, %v3136_v20  ;;  %3163 = vmatpush1.bf16.msk.msra.mxu1 %vm4681_vm8, %v3162_v2 }
 0x95a   :  { %3138 = vmatmul.mubr.msk.bf16.vlgmr.msra.gmra.mrb[20].mxu0 %vm963_vm6, %v4133_v26  ;;  %3164 = vmatmul.mubr.msk.bf16.vlgmr.msra.gmra.mrb[20].mxu1 %vm963_vm6, %v4133_v26 }
 0x95b   :  { %1332 = vmatprep.mubr.bf16.mxu0 %v4191_v12  ;;  %1385 = vmatprep.mubr.bf16.mxu1 %v4191_v12 }
 0x960   :  { %v1257_v23 = vpop.permute.xlu1 %1256 }
 0x961   :  { %v1262_v29 = vpop.permute.xlu0 %1261 }
 0x962   :  { %3139 = vmatmul.mubr.msk.bf16.gmra.mrb[24].mxu0 %vm963_vm6, %v4134_v24  ;;  %3165 = vmatmul.mubr.msk.bf16.gmra.mrb[24].mxu1 %vm963_vm6, %v4134_v24 }
 0x963   :  { %1658 = vmatprep.mubr.bf16.mxu0 %v4191_v12  ;;  %1711 = vmatprep.mubr.bf16.mxu1 %v4191_v12 }
 0x964   :  { %v1267_v63 = vpop.permute.xlu1 %1266 }
 0x965   :  { %v1272_v14 = vpop.permute.xlu0 %1271 }
 0xa2d   :  { %v1324_v34 = vpop.f32.mrb[20].mxu0  ;;  %v1377_v35 = vpop.f32.mrb[20].mxu1 }
 0xa2e   :  { %v1325_v31 = vadd.f32 %v1324_v34, %v1257_v23  ;;  %v1326_v33 = vpop.f32.mrb[21].mxu0  ;;  %v1378_v1 = vadd.f32 %v1377_v35, %v1257_v23  ;;  %v1379_v39 = vpop.f32.mrb[21].mxu1 }
 0xa2f   :  { %v1327_v36 = vadd.f32 %v1326_v33, %v1257_v23  ;;  %v1328_v38 = vpop.f32.mrb[22].mxu0  ;;  %v1380_v43 = vadd.f32 %v1379_v39, %v1257_v23  ;;  %v1381_v5 = vpop.f32.mrb[22].mxu1 }
 0xa30   :  { %v1396_v41 = vadd.f32 %v1325_v31, %v4471_v49  ;;  %v1329_v42 = vadd.f32 %v1328_v38, %v1262_v29  ;;  %v1330_v44 = vpop.f32.mrb[23].mxu0  ;;  %v1382_v47 = vadd.f32 %v1381_v5, %v1262_v29  ;;  %v1383_v52 = vpop.f32.mrb[23].mxu1  ;;  %v1398_v48 = vadd.f32 %v1378_v1, %v4479_v56 }
 0xa31   :  { %v1397_v4 = vadd.f32 %v1327_v36, %v4475_v53  ;;  %v1331_v46 = vadd.f32 %v1330_v44, %v1262_v29  ;;  %v1384_v58 = vadd.f32 %v1383_v52, %v1262_v29  ;;  %v1399_v25 = vadd.f32 %v1380_v43, %v4490_v62 }
 0xa32   :  { %v1400_v55 = vadd.f32 %v1329_v42, %v4473_v50  ;;  %v1402_v61 = vadd.f32 %v1382_v47, %v4481_v57  ;;  %v4897_v49 = vmax.f32 %v1396_v41, 0.0  ;;  %v4911_v9 = vmax.f32 %v1398_v48, 0.0 }
 0xa33   :  { %v1401_v16 = vadd.f32 %v1331_v46, %v4477_v54  ;;  %v1403_v53 = vadd.f32 %v1384_v58, %v4485_v59  ;;  %v4903_v6 = vmax.f32 %v1397_v4, 0.0  ;;  %v4917_v24 = vmax.f32 %v1399_v25, 0.0  ;;  %v3172_v25 = vld [vmem:[%s5847_s10 + $0x50] sm:$0xff] }
 0xa34   :  { %v4899_v0 = vmax.f32 %v1400_v55, 0.0  ;;  %v4907_v56 = vmax.f32 %v1402_v61, 0.0  ;;  %v3170_v61 = vld [vmem:[%s5847_s10 + $0x40] sm:$0xff] }
 0xa35   :  { %v4905_v50 = vmax.f32 %v1401_v16, 0.0  ;;  %v1334_v37 = vpop.f32.mrb[24].mxu0  ;;  %v1387_v57 = vpop.f32.mrb[24].mxu1  ;;  %v4913_v10 = vmax.f32 %v1403_v53, 0.0  ;;  %v3173_v53 = vld [vmem:[%s5847_s10 + $0x58] sm:$0xff] }
 0xa36   :  { %v1335_v54 = vadd.f32 %v1334_v37, %v1267_v63  ;;  %v1336_v3 = vpop.f32.mrb[25].mxu0  ;;  %v3729_v2 = vpack.i.bf16 %v4899_v0, %v4897_v49  ;;  %v1389_v20 = vpop.f32.mrb[25].mxu1  ;;  %v1388_v29 = vadd.f32 %v1387_v57, %v1267_v63 }
 0xa37   :  { %v1337_v62 = vadd.f32 %v1336_v3, %v1267_v63  ;;  %v1338_v59 = vpop.f32.mrb[26].mxu0  ;;  %v3739_v26 = vpack.i.bf16 %v4905_v50, %v4903_v6  ;;  %v1391_v33 = vpop.f32.mrb[26].mxu1  ;;  %v1390_v36 = vadd.f32 %v1389_v20, %v1267_v63  ;;  %v3744_v5 = vpack.i.bf16 %v4913_v10, %v4917_v24  ;;  %v3171_v63 = vld [vmem:[%s5847_s10 + $0x48] sm:$0xff] }
 0xa38   :  { %v1404_v23 = vadd.f32 %v1335_v54, %v4497_v7  ;;  %v1339_v34 = vadd.f32 %v1338_v59, %v1272_v14  ;;  %v1340_v31 = vpop.f32.mrb[27].mxu0  ;;  %3730 = vrot.lane.b32.xlu1 %v3729_v2, %s4190_s6  ;;  %v1392_v38 = vadd.f32 %v1391_v33, %v1272_v14  ;;  %v1393_v39 = vpop.f32.mrb[27].mxu1  ;;  %v3734_v7 = vpack.i.bf16 %v4907_v56, %v4911_v9 }
 0xa39   :  { %v1405_v35 = vadd.f32 %v1337_v62, %v4502_v11  ;;  %v1341_v1 = vadd.f32 %v1340_v31, %v1272_v14  ;;  %3740 = vrot.lane.b32.xlu0 %v3739_v26, %s4190_s6  ;;  %v1394_v42 = vadd.f32 %v1393_v39, %v1272_v14  ;;  %v1406_v4 = vadd.f32 %v1388_v29, %v4515_v21 }
 0xa3a   :  { %v1408_v41 = vadd.f32 %v1339_v34, %v4499_v8  ;;  %v1410_v44 = vadd.f32 %v1392_v38, %v4507_v15  ;;  %v4930_v11 = vmax.f32 %v1404_v23, 0.0  ;;  %v1407_v52 = vadd.f32 %v1390_v36, %v4518_v22 }
 0xa3b   :  { %v1409_v43 = vadd.f32 %v1341_v1, %v4504_v13  ;;  %v1411_v47 = vadd.f32 %v1394_v42, %v4511_v19  ;;  %v4937_v8 = vmax.f32 %v1405_v35, 0.0  ;;  %v4951_v58 = vmax.f32 %v1406_v4, 0.0 }
 0xa3c   :  { %v4933_v46 = vmax.f32 %v1408_v41, 0.0  ;;  %3735 = vrot.lane.b32.xlu1 %v3734_v7, %s4190_s6  ;;  %v4943_v15 = vmax.f32 %v1410_v44, 0.0  ;;  %v4954_v48 = vmax.f32 %v1407_v52, 0.0 }
 0xa3d   :  { %v4940_v13 = vmax.f32 %v1409_v43, 0.0  ;;  %3745 = vrot.lane.b32.xlu0 %v3744_v5, %s4190_s6  ;;  %v4947_v21 = vmax.f32 %v1411_v47, 0.0 }
 0xa3e   :  { %v3749_v55 = vpack.i.bf16 %v4933_v46, %v4930_v11  ;;  %v3754_v22 = vpack.i.bf16 %v4943_v15, %v4951_v58 }
 0xa3f   :  { %v3764_v19 = vpack.i.bf16 %v4940_v13, %v4937_v8  ;;  %v3769_v16 = vpack.i.bf16 %v4947_v21, %v4954_v48 }
 0xa40   :  { %3750 = vrot.lane.b32.xlu1 %v3749_v55, %s4190_s6 }
 0xa41   :  { %3765 = vrot.lane.b32.xlu0 %v3764_v19, %s4190_s6 }
 0xa44   :  { %3755 = vrot.lane.b32.xlu1 %v3754_v22, %s4190_s6 }
 0xa45   :  { %3770 = vrot.lane.b32.xlu0 %v3769_v16, %s4190_s6 }
 0xa48   :  { %3760 = vrot.lane.b32.xlu1 %v3729_v2, %s4189_s4 }
 0xa49   :  { %3775 = vrot.lane.b32.xlu0 %v3739_v26, %s4189_s4 }
 0xa4c   :  { %3780 = vrot.lane.b32.xlu1 %v3734_v7, %s4189_s4 }
 0xa4d   :  { %3785 = vrot.lane.b32.xlu0 %v3744_v5, %s4189_s4 }
 0xa50   :  { %3790 = vrot.lane.b32.xlu1 %v3749_v55, %s4189_s4 }
 0xa51   :  { %3800 = vrot.lane.b32.xlu0 %v3764_v19, %s4189_s4 }
 0xa54   :  { %3795 = vrot.lane.b32.xlu1 %v3754_v22, %s4189_s4 }
 0xa55   :  { %3805 = vrot.lane.b32.xlu0 %v3769_v16, %s4189_s4 }
 0xa58   :  { %1592 = vperm.xlu1 %3568, %v3170_v61  }
 0xa59   :  { %1597 = vperm.xlu0 %3567, %v3171_v63  }
 0xa5c   :  { %1602 = vperm.xlu1 %3568, %v3172_v25  }
 0xa5d   :  { %1607 = vperm.xlu0 %3567, %v3173_v53  }
 0xaaa   :  { %v3731_v14 = vpop.permute.xlu1 %3730 }
 0xaab   :  { %v3733_v37 = vunpack.i.h.bf16 %v3731_v14  ;;  %v3732_v54 = vunpack.i.l.bf16 %v3731_v14  ;;  %v3741_v3 = vpop.permute.xlu0 %3740 }
 0xaac   :  { %v3743_v57 = vunpack.i.h.bf16 %v3741_v3  ;;  %v3742_v2 = vunpack.i.l.bf16 %v3741_v3 }
 0xaae   :  { %v1473_v62 = vsel %vm529_vm5, %v3732_v54, %v3742_v2  ;;  %v1474_v59 = vsel %vm529_vm5, %v3733_v37, %v3743_v57  ;;  %v3736_v20 = vpop.permute.xlu1 %3735 }
 0xaaf   :  { %v3177_v26 = vpack.c.bf16 %v1474_v59, %v1473_v62  ;;  %v3738_v23 = vunpack.i.h.bf16 %v3736_v20  ;;  %v3737_v29 = vunpack.i.l.bf16 %v3736_v20  ;;  %v3746_v34 = vpop.permute.xlu0 %3745 }
 0xab0   :  { %v3748_v31 = vunpack.i.h.bf16 %v3746_v34  ;;  %v3747_v33 = vunpack.i.l.bf16 %v3746_v34 }
 0xab1   :  { %v1470_v35 = vsel %vm529_vm5, %v3743_v57, %v3738_v23  ;;  %v1469_v36 = vsel %vm529_vm5, %v3742_v2, %v3737_v29  ;;  %3178 = vmatprep.subr.msk.bf16.mxu0 %vm4550_vm2, %v3177_v26 }
 0xab2   :  { %v1465_v1 = vsel %vm529_vm5, %v3737_v29, %v3747_v33  ;;  %v1466_v38 = vsel %vm529_vm5, %v3738_v23, %v3748_v31  ;;  %v1477_v39 = vsel %vm529_vm5, %v3747_v33, %v3732_v54  ;;  %v3751_v41 = vpop.permute.xlu1 %3750  ;;  %v1478_v42 = vsel %vm529_vm5, %v3748_v31, %v3733_v37 }
 0xab3   :  { %v3203_v7 = vpack.c.bf16 %v1466_v38, %v1465_v1  ;;  %v3753_v43 = vunpack.i.h.bf16 %v3751_v41  ;;  %v3752_v44 = vunpack.i.l.bf16 %v3751_v41  ;;  %v3766_v5 = vpop.permute.xlu0 %3765  ;;  %v3206_v4 = vpack.c.bf16 %v1470_v35, %v1469_v36 }
 0xab4   :  { %v3180_v47 = vpack.c.bf16 %v1478_v42, %v1477_v39  ;;  %v3768_v52 = vunpack.i.h.bf16 %v3766_v5  ;;  %v3767_v55 = vunpack.i.l.bf16 %v3766_v5  ;;  %v1570_v31 = vpack.c.bf16 %v4905_v50, %v4903_v6 }
 0xab5   :  { %3204 = vmatprep.subr.msk.bf16.mxu1 %vm4574_vm9, %v3203_v7  ;;  %v1572_v33 = vpack.c.bf16 %v4913_v10, %v4917_v24  ;;  %v1569_v5 = vpack.c.bf16 %v4899_v0, %v4897_v49 }
 0xab6   :  { %v1475_v19 = vsel %vm529_vm5, %v3752_v44, %v3767_v55  ;;  %v1476_v22 = vsel %vm529_vm5, %v3753_v43, %v3768_v52  ;;  %3181 = vmatpush1.bf16.msk.msra.mxu0 %vm4561_vm3, %v3180_v47  ;;  %v3756_v16 = vpop.permute.xlu1 %3755  ;;  %3207 = vmatpush1.bf16.msk.msra.mxu1 %vm4587_vm10, %v3206_v4 }
 0xab7   :  { %v3183_v61 = vpack.c.bf16 %v1476_v22, %v1475_v19  ;;  %v3758_v63 = vunpack.i.h.bf16 %v3756_v16  ;;  %v3757_v25 = vunpack.i.l.bf16 %v3756_v16  ;;  %v3771_v53 = vpop.permute.xlu0 %3770  ;;  %v1576_v22 = vpack.c.bf16 %v4947_v21, %v4954_v48 }
 0xab8   :  { %v3773_v14 = vunpack.i.h.bf16 %v3771_v53  ;;  %v3772_v37 = vunpack.i.l.bf16 %v3771_v53  ;;  %v1573_v16 = vpack.c.bf16 %v4933_v46, %v4930_v11 }
 0xab9   :  { %v1472_v54 = vsel %vm529_vm5, %v3768_v52, %v3758_v63  ;;  %v1471_v3 = vsel %vm529_vm5, %v3767_v55, %v3757_v25  ;;  %3184 = vmatprep.subr.msk.bf16.mxu0 %vm4550_vm2, %v3183_v61  ;;  %v1574_v52 = vpack.c.bf16 %v4940_v13, %v4937_v8  ;;  %v1571_v55 = vpack.c.bf16 %v4907_v56, %v4911_v9 }
 0xaba   :  { %v1467_v57 = vsel %vm529_vm5, %v3757_v25, %v3772_v37  ;;  %v1468_v2 = vsel %vm529_vm5, %v3758_v63, %v3773_v14  ;;  %v1479_v62 = vsel %vm529_vm5, %v3772_v37, %v3752_v44  ;;  %v3761_v59 = vpop.permute.xlu1 %3760  ;;  %v1480_v20 = vsel %vm529_vm5, %v3773_v14, %v3753_v43 }
 0xabb   :  { %v3209_v26 = vpack.c.bf16 %v1468_v2, %v1467_v57  ;;  %v3776_v23 = vpop.permute.xlu0 %3775  ;;  %v3212_v29 = vpack.c.bf16 %v1472_v54, %v1471_v3  ;;  %v3186_v34 = vpack.c.bf16 %v1480_v20, %v1479_v62  ;;  %v3762_v35 = vunpack.i.l.bf16 %v3761_v59 }
 0xabc   :  { %v3778_v1 = vunpack.i.h.bf16 %v3776_v23  ;;  %v3777_v38 = vunpack.i.l.bf16 %v3776_v23  ;;  %v3763_v7 = vunpack.i.h.bf16 %v3761_v59  ;;  %v1575_v61 = vpack.c.bf16 %v4943_v15, %v4951_v58 }
 0xabd   :  { %3210 = vmatprep.subr.msk.bf16.mxu1 %vm4574_vm9, %v3209_v26  ;;  %3187 = vmatpush1.bf16.msk.msra.mxu0 %vm4561_vm3, %v3186_v34 }
 0xabe   :  { %v3781_v36 = vpop.permute.xlu1 %3780  ;;  %3213 = vmatpush1.bf16.msk.msra.mxu1 %vm4587_vm10, %v3212_v29  ;;  %1630 = vmatprep.subr.bf16.mxu0 %v1570_v31  ;;  %v1537_v63 = vsel %vm501_vm4, %v3762_v35, %v3777_v38  ;;  %v1538_v37 = vsel %vm501_vm4, %v3763_v7, %v3778_v1 }
 0xabf   :  { %v3783_v39 = vunpack.i.h.bf16 %v3781_v36  ;;  %v3782_v41 = vunpack.i.l.bf16 %v3781_v36  ;;  %v3786_v42 = vpop.permute.xlu0 %3785  ;;  %1683 = vmatprep.subr.bf16.mxu1 %v1572_v33  ;;  %v3192_v33 = vpack.c.bf16 %v1538_v37, %v1537_v63 }
 0xac0   :  { %v3788_v43 = vunpack.i.h.bf16 %v3786_v42  ;;  %v3787_v44 = vunpack.i.l.bf16 %v3786_v42 }
 0xac1   :  { %v1534_v4 = vsel %vm501_vm4, %v3778_v1, %v3783_v39  ;;  %v1533_v47 = vsel %vm501_vm4, %v3777_v38, %v3782_v41  ;;  %1631 = vmatpush1.bf16.msra.mxu0 %v1569_v5 }
 0xac2   :  { %v3791_v19 = vpop.permute.xlu1 %3790  ;;  %v1541_v25 = vsel %vm501_vm4, %v3787_v44, %v3762_v35  ;;  %v1542_v53 = vsel %vm501_vm4, %v3788_v43, %v3763_v7  ;;  %1632 = vmatprep.subr.bf16.mxu0 %v1574_v52  ;;  %1684 = vmatpush1.bf16.msra.mxu1 %v1571_v55  ;;  %v3189_v54 = vpack.c.bf16 %v1534_v4, %v1533_v47 }
 0xac3   :  { %v3801_v14 = vpop.permute.xlu0 %3800  ;;  %v1529_v3 = vsel %vm501_vm4, %v3782_v41, %v3787_v44  ;;  %v1530_v57 = vsel %vm501_vm4, %v3783_v39, %v3788_v43  ;;  %1685 = vmatprep.subr.bf16.mxu1 %v1576_v22  ;;  %v3793_v2 = vunpack.i.h.bf16 %v3791_v19  ;;  %v3792_v62 = vunpack.i.l.bf16 %v3791_v19  ;;  %v4135_v19 = vld [vmem:[%s5846_s9 + $0x20] sm:$0xff]   ;;  %v4136_v22 = vld [vmem:[%s5846_s9 + $0x28] sm:$0xff]  }
 0xac4   :  { %v3803_v59 = vunpack.i.h.bf16 %v3801_v14  ;;  %v3802_v20 = vunpack.i.l.bf16 %v3801_v14  ;;  %v3215_v26 = vpack.c.bf16 %v1542_v53, %v1541_v25  ;;  %v3218_v35 = vpack.c.bf16 %v1530_v57, %v1529_v3 }
 0xac5   :  { %1633 = vmatpush1.bf16.msra.mxu0 %v1573_v16 }
 0xac6   :  { %v3796_v23 = vpop.permute.xlu1 %3795  ;;  %3190 = vmatprep.subr.msk.bf16.mxu0 %vm4652_vm11, %v3189_v54  ;;  %1686 = vmatpush1.bf16.msra.mxu1 %v1575_v61  ;;  %v1539_v38 = vsel %vm501_vm4, %v3792_v62, %v3802_v20  ;;  %v1540_v39 = vsel %vm501_vm4, %v3793_v2, %v3803_v59 }
 0xac7   :  { %v3798_v29 = vunpack.i.h.bf16 %v3796_v23  ;;  %v3797_v34 = vunpack.i.l.bf16 %v3796_v23  ;;  %v3806_v31 = vpop.permute.xlu0 %3805  ;;  %3216 = vmatprep.subr.msk.bf16.mxu1 %vm4665_vm12, %v3215_v26  ;;  %v3198_v52 = vpack.c.bf16 %v1540_v39, %v1539_v38 }
 0xac8   :  { %v3808_v36 = vunpack.i.h.bf16 %v3806_v31  ;;  %v3807_v1 = vunpack.i.l.bf16 %v3806_v31 }
 0xac9   :  { %v1536_v41 = vsel %vm501_vm4, %v3803_v59, %v3798_v29  ;;  %v1535_v42 = vsel %vm501_vm4, %v3802_v20, %v3797_v34  ;;  %3193 = vmatpush1.bf16.msk.msra.mxu0 %vm4674_vm7, %v3192_v33 }
 0xaca   :  { %v3195_v7 = vpack.c.bf16 %v1536_v41, %v1535_v42  ;;  %v1531_v43 = vsel %vm501_vm4, %v3797_v34, %v3807_v1  ;;  %v1532_v44 = vsel %vm501_vm4, %v3798_v29, %v3808_v36  ;;  %v1543_v5 = vsel %vm501_vm4, %v3807_v1, %v3792_v62  ;;  %3219 = vmatpush1.bf16.msk.msra.mxu1 %vm4681_vm8, %v3218_v35 }
 0xacb   :  { %v1544_v4 = vsel %vm501_vm4, %v3808_v36, %v3793_v2  ;;  %v3224_v47 = vpack.c.bf16 %v1532_v44, %v1531_v43 }
 0xacc   :  { %v3221_v55 = vpack.c.bf16 %v1544_v4, %v1543_v5  ;;  %3196 = vmatprep.subr.msk.bf16.mxu0 %vm4652_vm11, %v3195_v7 }
 0xacd   :  { %3199 = vmatpush1.bf16.msk.msra.mxu0 %vm4674_vm7, %v3198_v52 }
 0xace   :  { %3222 = vmatprep.subr.msk.bf16.mxu1 %vm4665_vm12, %v3221_v55 }
 0xacf   :  { %3225 = vmatpush1.bf16.msk.msra.mxu1 %vm4681_vm8, %v3224_v47 }
 0xad0   :  { %3200 = vmatmul.mubr.msk.bf16.vlgmr.msra.gmra.mrb[28].mxu0 %vm963_vm6, %v4135_v19 }
 0xad1   :  { %1668 = vmatprep.mubr.bf16.mxu0 %v4191_v12 }
 0xad2   :  { %3226 = vmatmul.mubr.msk.bf16.vlgmr.msra.gmra.mrb[28].mxu1 %vm963_vm6, %v4135_v19 }
 0xad3   :  { %1721 = vmatprep.mubr.bf16.mxu1 %v4191_v12 }
 0xad7   :  { %v1593_v16 = vpop.permute.xlu1 %1592 }
 0xad8   :  { %3201 = vmatmul.mubr.msk.bf16.gmra.mrb[32].mxu0 %vm963_vm6, %v4136_v22  ;;  %v1598_v61 = vpop.permute.xlu0 %1597 }
 0xad9   :  { %1978 = vmatprep.mubr.bf16.mxu0 %v4191_v12 }
 0xada   :  { %3227 = vmatmul.mubr.msk.bf16.gmra.mrb[32].mxu1 %vm963_vm6, %v4136_v22 }
 0xadb   :  { %2031 = vmatprep.mubr.bf16.mxu1 %v4191_v12  ;;  %v1603_v41 = vpop.permute.xlu1 %1602 }
 0xadc   :  { %v1608_v44 = vpop.permute.xlu0 %1607 }
 0xba3   :  { %v1660_v63 = vpop.f32.mrb[28].mxu0 }
 0xba4   :  { %v1661_v25 = vadd.f32 %v1660_v63, %v1593_v16  ;;  %v1662_v53 = vpop.f32.mrb[29].mxu0 }
 0xba5   :  { %v1713_v14 = vpop.f32.mrb[28].mxu1  ;;  %v1663_v37 = vadd.f32 %v1662_v53, %v1593_v16  ;;  %v1664_v3 = vpop.f32.mrb[30].mxu0 }
 0xba6   :  { %v1714_v54 = vadd.f32 %v1713_v14, %v1593_v16  ;;  %v1715_v57 = vpop.f32.mrb[29].mxu1  ;;  %v1665_v2 = vadd.f32 %v1664_v3, %v1598_v61  ;;  %v1666_v59 = vpop.f32.mrb[31].mxu0  ;;  %v1732_v34 = vmax.f32 %v1661_v25, 0.0 }
 0xba7   :  { %v1716_v62 = vadd.f32 %v1715_v57, %v1593_v16  ;;  %v1717_v20 = vpop.f32.mrb[30].mxu1  ;;  %v1667_v26 = vadd.f32 %v1666_v59, %v1598_v61  ;;  %v1733_v31 = vmax.f32 %v1663_v37, 0.0 }
 0xba8   :  { %v1718_v23 = vadd.f32 %v1717_v20, %v1598_v61  ;;  %v1719_v29 = vpop.f32.mrb[31].mxu1  ;;  %v1736_v33 = vmax.f32 %v1665_v2, 0.0  ;;  %v1734_v36 = vmax.f32 %v1714_v54, 0.0 }
 0xba9   :  { %v1720_v35 = vadd.f32 %v1719_v29, %v1598_v61  ;;  %v1735_v1 = vmax.f32 %v1716_v62, 0.0  ;;  %v1737_v38 = vmax.f32 %v1667_v26, 0.0 }
 0xbaa   :  { %v1738_v39 = vmax.f32 %v1718_v23, 0.0  ;;  %v5109_v42 = vpack.c.bf16 %v1736_v33, %v1732_v34  ;;  %v3809_v43 = vpack.i.bf16 %v1736_v33, %v1732_v34 }
 0xbab   :  { %v1739_v7 = vmax.f32 %v1720_v35, 0.0  ;;  %v1670_v4 = vpop.f32.mrb[32].mxu0  ;;  %v3819_v47 = vpack.i.bf16 %v1737_v38, %v1733_v31  ;;  %v5115_v14 = vpack.c.bf16 %v1737_v38, %v1733_v31 }
 0xbac   :  { %v5111_v5 = vpack.c.bf16 %v1738_v39, %v1734_v36  ;;  %v3814_v52 = vpack.i.bf16 %v1738_v39, %v1734_v36  ;;  %v1671_v55 = vadd.f32 %v1670_v4, %v1603_v41  ;;  %v1672_v19 = vpop.f32.mrb[33].mxu0  ;;  %3810 = vrot.lane.b32.xlu1 %v3809_v43, %s4190_s6 }
 0xbad   :  { %v1723_v22 = vpop.f32.mrb[32].mxu1  ;;  %v3824_v16 = vpack.i.bf16 %v1739_v7, %v1735_v1  ;;  %v1673_v61 = vadd.f32 %v1672_v19, %v1603_v41  ;;  %v1674_v25 = vpop.f32.mrb[34].mxu0  ;;  %3820 = vrot.lane.b32.xlu0 %v3819_v47, %s4190_s6  ;;  %v5117_v37 = vpack.c.bf16 %v1739_v7, %v1735_v1 }
 0xbae   :  { %v1724_v63 = vadd.f32 %v1723_v22, %v1603_v41  ;;  %v1725_v53 = vpop.f32.mrb[33].mxu1  ;;  %v1675_v54 = vadd.f32 %v1674_v25, %v1608_v44  ;;  %v1676_v57 = vpop.f32.mrb[35].mxu0  ;;  %v1740_v26 = vmax.f32 %v1671_v55, 0.0  ;;  %v3232_v22 = vld [vmem:[%s5847_s10 + $0x60] sm:$0xff] }
 0xbaf   :  { %v1726_v3 = vadd.f32 %v1725_v53, %v1603_v41  ;;  %v1727_v2 = vpop.f32.mrb[34].mxu1  ;;  %v1677_v62 = vadd.f32 %v1676_v57, %v1608_v44  ;;  %v1741_v23 = vmax.f32 %v1673_v61, 0.0 }
 0xbb0   :  { %v1728_v59 = vadd.f32 %v1727_v2, %v1608_v44  ;;  %v1729_v20 = vpop.f32.mrb[35].mxu1  ;;  %v1744_v29 = vmax.f32 %v1675_v54, 0.0  ;;  %3815 = vrot.lane.b32.xlu1 %v3814_v52, %s4190_s6  ;;  %v1742_v33 = vmax.f32 %v1724_v63, 0.0 }
 0xbb1   :  { %v1730_v34 = vadd.f32 %v1729_v20, %v1608_v44  ;;  %v1743_v35 = vmax.f32 %v1726_v3, 0.0  ;;  %v1745_v36 = vmax.f32 %v1677_v62, 0.0  ;;  %3825 = vrot.lane.b32.xlu0 %v3824_v16, %s4190_s6 }
 0xbb2   :  { %v1746_v31 = vmax.f32 %v1728_v59, 0.0  ;;  %v5121_v1 = vpack.c.bf16 %v1744_v29, %v1740_v26  ;;  %v3829_v39 = vpack.i.bf16 %v1744_v29, %v1740_v26 }
 0xbb3   :  { %v1747_v38 = vmax.f32 %v1730_v34, 0.0  ;;  %v3844_v7 = vpack.i.bf16 %v1745_v36, %v1741_v23  ;;  %v5126_v44 = vpack.c.bf16 %v1745_v36, %v1741_v23 }
 0xbb4   :  { %v5123_v41 = vpack.c.bf16 %v1746_v31, %v1742_v33  ;;  %v3834_v4 = vpack.i.bf16 %v1746_v31, %v1742_v33  ;;  %3830 = vrot.lane.b32.xlu1 %v3829_v39, %s4190_s6 }
 0xbb5   :  { %v3849_v55 = vpack.i.bf16 %v1747_v38, %v1743_v35  ;;  %3845 = vrot.lane.b32.xlu0 %v3844_v7, %s4190_s6  ;;  %v5129_v19 = vpack.c.bf16 %v1747_v38, %v1743_v35 }
 0xbb8   :  { %3835 = vrot.lane.b32.xlu1 %v3834_v4, %s4190_s6 }
 0xbb9   :  { %3850 = vrot.lane.b32.xlu0 %v3849_v55, %s4190_s6 }
 0xbbc   :  { %3840 = vrot.lane.b32.xlu1 %v3809_v43, %s4189_s4  ;;  %v3233_v43 = vld [vmem:[%s5847_s10 + $0x68] sm:$0xff] }
 0xbbd   :  { %3855 = vrot.lane.b32.xlu0 %v3819_v47, %s4189_s4  ;;  %v3234_v47 = vld [vmem:[%s5847_s10 + $0x70] sm:$0xff] }
 0xbc0   :  { %3860 = vrot.lane.b32.xlu1 %v3814_v52, %s4189_s4  ;;  %v3235_v52 = vld [vmem:[%s5847_s10 + $0x78] sm:$0xff] }
 0xbc1   :  { %3865 = vrot.lane.b32.xlu0 %v3824_v16, %s4189_s4 }
 0xbc4   :  { %3870 = vrot.lane.b32.xlu1 %v3829_v39, %s4189_s4 }
 0xbc5   :  { %3880 = vrot.lane.b32.xlu0 %v3844_v7, %s4189_s4 }
 0xbc8   :  { %3875 = vrot.lane.b32.xlu1 %v3834_v4, %s4189_s4 }
 0xbc9   :  { %3885 = vrot.lane.b32.xlu0 %v3849_v55, %s4189_s4 }
 0xbcc   :  { %1912 = vperm.xlu1 %3568, %v3232_v22  }
 0xbcd   :  { %1917 = vperm.xlu0 %3567, %v3233_v43  }
 0xbd0   :  { %1922 = vperm.xlu1 %3568, %v3234_v47  }
 0xbd1   :  { %1927 = vperm.xlu0 %3567, %v3235_v52  }
 0xc1e   :  { %v3811_v16 = vpop.permute.xlu1 %3810 }
 0xc1f   :  { %v3813_v61 = vunpack.i.h.bf16 %v3811_v16  ;;  %v3812_v63 = vunpack.i.l.bf16 %v3811_v16  ;;  %v3821_v25 = vpop.permute.xlu0 %3820 }
 0xc20   :  { %v3823_v53 = vunpack.i.h.bf16 %v3821_v25  ;;  %v3822_v54 = vunpack.i.l.bf16 %v3821_v25 }
 0xc22   :  { %v1793_v3 = vsel %vm529_vm5, %v3812_v63, %v3822_v54  ;;  %v1794_v57 = vsel %vm529_vm5, %v3813_v61, %v3823_v53  ;;  %v3816_v2 = vpop.permute.xlu1 %3815 }
 0xc23   :  { %v3239_v62 = vpack.c.bf16 %v1794_v57, %v1793_v3  ;;  %v3818_v59 = vunpack.i.h.bf16 %v3816_v2  ;;  %v3817_v20 = vunpack.i.l.bf16 %v3816_v2  ;;  %v3826_v26 = vpop.permute.xlu0 %3825 }
 0xc24   :  { %v3828_v23 = vunpack.i.h.bf16 %v3826_v26  ;;  %v3827_v29 = vunpack.i.l.bf16 %v3826_v26 }
 0xc25   :  { %v1790_v34 = vsel %vm529_vm5, %v3823_v53, %v3818_v59  ;;  %v1789_v33 = vsel %vm529_vm5, %v3822_v54, %v3817_v20  ;;  %3240 = vmatprep.subr.msk.bf16.mxu0 %vm4550_vm2, %v3239_v62 }
 0xc26   :  { %v1785_v35 = vsel %vm529_vm5, %v3817_v20, %v3827_v29  ;;  %v1786_v36 = vsel %vm529_vm5, %v3818_v59, %v3828_v23  ;;  %v1797_v31 = vsel %vm529_vm5, %v3827_v29, %v3812_v63  ;;  %v3831_v38 = vpop.permute.xlu1 %3830  ;;  %v1798_v39 = vsel %vm529_vm5, %v3828_v23, %v3813_v61 }
 0xc27   :  { %v3265_v7 = vpack.c.bf16 %v1786_v36, %v1785_v35  ;;  %v3833_v4 = vunpack.i.h.bf16 %v3831_v38  ;;  %v3832_v55 = vunpack.i.l.bf16 %v3831_v38  ;;  %v3846_v22 = vpop.permute.xlu0 %3845  ;;  %v3268_v43 = vpack.c.bf16 %v1790_v34, %v1789_v33 }
 0xc28   :  { %v3242_v47 = vpack.c.bf16 %v1798_v39, %v1797_v31  ;;  %v3848_v52 = vunpack.i.h.bf16 %v3846_v22  ;;  %v3847_v16 = vunpack.i.l.bf16 %v3846_v22 }
 0xc29   :  { %3266 = vmatprep.subr.msk.bf16.mxu1 %vm4574_vm9, %v3265_v7 }
 0xc2a   :  { %v1795_v25 = vsel %vm529_vm5, %v3832_v55, %v3847_v16  ;;  %v1796_v63 = vsel %vm529_vm5, %v3833_v4, %v3848_v52  ;;  %3243 = vmatpush1.bf16.msk.msra.mxu0 %vm4561_vm3, %v3242_v47  ;;  %v3836_v61 = vpop.permute.xlu1 %3835  ;;  %3269 = vmatpush1.bf16.msk.msra.mxu1 %vm4587_vm10, %v3268_v43 }
 0xc2b   :  { %v3245_v53 = vpack.c.bf16 %v1796_v63, %v1795_v25  ;;  %v3838_v54 = vunpack.i.h.bf16 %v3836_v61  ;;  %v3837_v3 = vunpack.i.l.bf16 %v3836_v61  ;;  %v3851_v57 = vpop.permute.xlu0 %3850 }
 0xc2c   :  { %v3853_v2 = vunpack.i.h.bf16 %v3851_v57  ;;  %v3852_v62 = vunpack.i.l.bf16 %v3851_v57 }
 0xc2d   :  { %v1792_v59 = vsel %vm529_vm5, %v3848_v52, %v3838_v54  ;;  %v1791_v20 = vsel %vm529_vm5, %v3847_v16, %v3837_v3  ;;  %3246 = vmatprep.subr.msk.bf16.mxu0 %vm4550_vm2, %v3245_v53 }
 0xc2e   :  { %v1787_v26 = vsel %vm529_vm5, %v3837_v3, %v3852_v62  ;;  %v1788_v23 = vsel %vm529_vm5, %v3838_v54, %v3853_v2  ;;  %v1799_v29 = vsel %vm529_vm5, %v3852_v62, %v3832_v55  ;;  %v3841_v34 = vpop.permute.xlu1 %3840  ;;  %v1800_v33 = vsel %vm529_vm5, %v3853_v2, %v3833_v4 }
 0xc2f   :  { %v3271_v35 = vpack.c.bf16 %v1788_v23, %v1787_v26  ;;  %v3856_v36 = vpop.permute.xlu0 %3855  ;;  %v3274_v31 = vpack.c.bf16 %v1792_v59, %v1791_v20  ;;  %v3248_v38 = vpack.c.bf16 %v1800_v33, %v1799_v29  ;;  %v3842_v39 = vunpack.i.l.bf16 %v3841_v34 }
 0xc30   :  { %v3858_v55 = vunpack.i.h.bf16 %v3856_v36  ;;  %v3857_v22 = vunpack.i.l.bf16 %v3856_v36  ;;  %v3843_v52 = vunpack.i.h.bf16 %v3841_v34 }
 0xc31   :  { %3272 = vmatprep.subr.msk.bf16.mxu1 %vm4574_vm9, %v3271_v35  ;;  %3249 = vmatpush1.bf16.msk.msra.mxu0 %vm4561_vm3, %v3248_v38 }
 0xc32   :  { %v3861_v7 = vpop.permute.xlu1 %3860  ;;  %3275 = vmatpush1.bf16.msk.msra.mxu1 %vm4587_vm10, %v3274_v31  ;;  %1950 = vmatprep.subr.bf16.mxu0 %v5115_v14  ;;  %v1857_v54 = vsel %vm501_vm4, %v3842_v39, %v3857_v22  ;;  %v1858_v57 = vsel %vm501_vm4, %v3843_v52, %v3858_v55 }
 0xc33   :  { %v3863_v43 = vunpack.i.h.bf16 %v3861_v7  ;;  %v3862_v47 = vunpack.i.l.bf16 %v3861_v7  ;;  %v3866_v4 = vpop.permute.xlu0 %3865  ;;  %2003 = vmatprep.subr.bf16.mxu1 %v5117_v37  ;;  %v3254_v35 = vpack.c.bf16 %v1858_v57, %v1857_v54 }
 0xc34   :  { %v3868_v16 = vunpack.i.h.bf16 %v3866_v4  ;;  %v3867_v25 = vunpack.i.l.bf16 %v3866_v4 }
 0xc35   :  { %v1854_v63 = vsel %vm501_vm4, %v3858_v55, %v3863_v43  ;;  %v1853_v61 = vsel %vm501_vm4, %v3857_v22, %v3862_v47  ;;  %1951 = vmatpush1.bf16.msra.mxu0 %v5109_v42 }
 0xc36   :  { %v3871_v53 = vpop.permute.xlu1 %3870  ;;  %v1861_v14 = vsel %vm501_vm4, %v3867_v25, %v3842_v39  ;;  %v1862_v37 = vsel %vm501_vm4, %v3868_v16, %v3843_v52  ;;  %1952 = vmatprep.subr.bf16.mxu0 %v5126_v44  ;;  %2004 = vmatpush1.bf16.msra.mxu1 %v5111_v5  ;;  %v3251_v2 = vpack.c.bf16 %v1854_v63, %v1853_v61  ;;  %v4138_v63 = vld [vmem:[%s5846_s9 + $0x38] sm:$0xff]  }
 0xc37   :  { %v3881_v3 = vpop.permute.xlu0 %3880  ;;  %v1849_v42 = vsel %vm501_vm4, %v3862_v47, %v3867_v25  ;;  %v1850_v62 = vsel %vm501_vm4, %v3863_v43, %v3868_v16  ;;  %2005 = vmatprep.subr.bf16.mxu1 %v5129_v19  ;;  %v3873_v59 = vunpack.i.h.bf16 %v3871_v53  ;;  %v3872_v20 = vunpack.i.l.bf16 %v3871_v53  ;;  %v4137_v25 = vld [vmem:[%s5846_s9 + $0x30] sm:$0xff]  }
 0xc38   :  { %v3883_v26 = vunpack.i.h.bf16 %v3881_v3  ;;  %v3882_v23 = vunpack.i.l.bf16 %v3881_v3  ;;  %v3277_v44 = vpack.c.bf16 %v1862_v37, %v1861_v14  ;;  %v3280_v36 = vpack.c.bf16 %v1850_v62, %v1849_v42 }
 0xc39   :  { %1953 = vmatpush1.bf16.msra.mxu0 %v5121_v1 }
 0xc3a   :  { %v3876_v5 = vpop.permute.xlu1 %3875  ;;  %3252 = vmatprep.subr.msk.bf16.mxu0 %vm4652_vm11, %v3251_v2  ;;  %2006 = vmatpush1.bf16.msra.mxu1 %v5123_v41  ;;  %v1859_v38 = vsel %vm501_vm4, %v3872_v20, %v3882_v23  ;;  %v1860_v1 = vsel %vm501_vm4, %v3873_v59, %v3883_v26 }
 0xc3b   :  { %v3878_v29 = vunpack.i.h.bf16 %v3876_v5  ;;  %v3877_v34 = vunpack.i.l.bf16 %v3876_v5  ;;  %v3886_v33 = vpop.permute.xlu0 %3885  ;;  %3278 = vmatprep.subr.msk.bf16.mxu1 %vm4665_vm12, %v3277_v44  ;;  %v3260_v52 = vpack.c.bf16 %v1860_v1, %v1859_v38 }
 0xc3c   :  { %v3888_v31 = vunpack.i.h.bf16 %v3886_v33  ;;  %v3887_v19 = vunpack.i.l.bf16 %v3886_v33 }
 0xc3d   :  { %v1856_v39 = vsel %vm501_vm4, %v3883_v26, %v3878_v29  ;;  %v1855_v41 = vsel %vm501_vm4, %v3882_v23, %v3877_v34  ;;  %3255 = vmatpush1.bf16.msk.msra.mxu0 %vm4674_vm7, %v3254_v35 }
 0xc3e   :  { %v3257_v7 = vpack.c.bf16 %v1856_v39, %v1855_v41  ;;  %v1851_v55 = vsel %vm501_vm4, %v3877_v34, %v3887_v19  ;;  %v1852_v22 = vsel %vm501_vm4, %v3878_v29, %v3888_v31  ;;  %v1863_v43 = vsel %vm501_vm4, %v3887_v19, %v3872_v20  ;;  %3281 = vmatpush1.bf16.msk.msra.mxu1 %vm4681_vm8, %v3280_v36 }
 0xc3f   :  { %v1864_v47 = vsel %vm501_vm4, %v3888_v31, %v3873_v59  ;;  %v3286_v4 = vpack.c.bf16 %v1852_v22, %v1851_v55 }
 0xc40   :  { %v3283_v16 = vpack.c.bf16 %v1864_v47, %v1863_v43  ;;  %3258 = vmatprep.subr.msk.bf16.mxu0 %vm4652_vm11, %v3257_v7 }
 0xc41   :  { %3261 = vmatpush1.bf16.msk.msra.mxu0 %vm4674_vm7, %v3260_v52 }
 0xc42   :  { %3284 = vmatprep.subr.msk.bf16.mxu1 %vm4665_vm12, %v3283_v16 }
 0xc43   :  { %3287 = vmatpush1.bf16.msk.msra.mxu1 %vm4681_vm8, %v3286_v4 }
 0xc44   :  { %3262 = vmatmul.mubr.msk.bf16.vlgmr.msra.gmra.mrb[36].mxu0 %vm963_vm6, %v4137_v25 }
 0xc45   :  { %1988 = vmatprep.mubr.bf16.mxu0 %v4191_v12 }
 0xc46   :  { %3288 = vmatmul.mubr.msk.bf16.vlgmr.msra.gmra.mrb[36].mxu1 %vm963_vm6, %v4137_v25 }
 0xc47   :  { %2041 = vmatprep.mubr.bf16.mxu1 %v4191_v12 }
 0xc4b   :  { %v1913_v61 = vpop.permute.xlu1 %1912 }
 0xc4c   :  { %3263 = vmatmul.mubr.msk.bf16.gmra.mrb[40].mxu0 %vm963_vm6, %v4138_v63  ;;  %v1918_v53 = vpop.permute.xlu0 %1917 }
 0xc4d   :  { %2314 = vmatprep.mubr.bf16.mxu0 %v4191_v12 }
 0xc4e   :  { %3289 = vmatmul.mubr.msk.bf16.gmra.mrb[40].mxu1 %vm963_vm6, %v4138_v63 }
 0xc4f   :  { %2367 = vmatprep.mubr.bf16.mxu1 %v4191_v12  ;;  %v1923_v1 = vpop.permute.xlu1 %1922 }
 0xc50   :  { %v1928_v7 = vpop.permute.xlu0 %1927 }
 0xd17   :  { %v1980_v54 = vpop.f32.mrb[36].mxu0 }
 0xd18   :  { %v1981_v14 = vadd.f32 %v1980_v54, %v1913_v61  ;;  %v1982_v37 = vpop.f32.mrb[37].mxu0 }
 0xd19   :  { %v2033_v3 = vpop.f32.mrb[36].mxu1  ;;  %v1983_v57 = vadd.f32 %v1982_v37, %v1913_v61  ;;  %v1984_v42 = vpop.f32.mrb[38].mxu0 }
 0xd1a   :  { %v2034_v2 = vadd.f32 %v2033_v3, %v1913_v61  ;;  %v2035_v62 = vpop.f32.mrb[37].mxu1  ;;  %v2052_v59 = vadd.f32 %v1981_v14, %v4897_v49  ;;  %v1985_v20 = vadd.f32 %v1984_v42, %v1918_v53  ;;  %v1986_v23 = vpop.f32.mrb[39].mxu0 }
 0xd1b   :  { %v2036_v26 = vadd.f32 %v2035_v62, %v1913_v61  ;;  %v2037_v44 = vpop.f32.mrb[38].mxu1  ;;  %v2053_v5 = vadd.f32 %v1983_v57, %v4903_v6  ;;  %v1987_v29 = vadd.f32 %v1986_v23, %v1918_v53 }
 0xd1c   :  { %v2038_v34 = vadd.f32 %v2037_v44, %v1918_v53  ;;  %v2039_v33 = vpop.f32.mrb[39].mxu1  ;;  %v2056_v35 = vadd.f32 %v1985_v20, %v4899_v0  ;;  %v2054_v31 = vadd.f32 %v2034_v2, %v4911_v9  ;;  %v5277_v49 = vmax.f32 %v2052_v59, 0.0 }
 0xd1d   :  { %v2040_v36 = vadd.f32 %v2039_v33, %v1918_v53  ;;  %v2057_v19 = vadd.f32 %v1987_v29, %v4905_v50  ;;  %v2055_v41 = vadd.f32 %v2036_v26, %v4917_v24  ;;  %v5283_v55 = vmax.f32 %v2053_v5, 0.0 }
 0xd1e   :  { %v2058_v38 = vadd.f32 %v2038_v34, %v4907_v56  ;;  %v5279_v39 = vmax.f32 %v2056_v35, 0.0  ;;  %v5291_v4 = vmax.f32 %v2054_v31, 0.0 }
 0xd1f   :  { %v2059_v6 = vadd.f32 %v2040_v36, %v4913_v10  ;;  %v5285_v0 = vmax.f32 %v2057_v19, 0.0  ;;  %v1990_v22 = vpop.f32.mrb[40].mxu0  ;;  %v5297_v63 = vmax.f32 %v2055_v41, 0.0  ;;  %v3296_v41 = vld [vmem:[%s5847_s10 + $0x90] sm:$0xff] }
 0xd20   :  { %v5287_v9 = vmax.f32 %v2058_v38, 0.0  ;;  %v1991_v50 = vadd.f32 %v1990_v22, %v1923_v1  ;;  %v1992_v43 = vpop.f32.mrb[41].mxu0  ;;  %v3889_v47 = vpack.i.bf16 %v5279_v39, %v5277_v49  ;;  %v3294_v38 = vld [vmem:[%s5847_s10 + $0x80] sm:$0xff] }
 0xd21   :  { %v2043_v56 = vpop.f32.mrb[40].mxu1  ;;  %v5293_v52 = vmax.f32 %v2059_v6, 0.0  ;;  %v1993_v24 = vadd.f32 %v1992_v43, %v1923_v1  ;;  %v1994_v10 = vpop.f32.mrb[42].mxu0  ;;  %v3899_v25 = vpack.i.bf16 %v5285_v0, %v5283_v55  ;;  %v3297_v6 = vld [vmem:[%s5847_s10 + $0x98] sm:$0xff] }
 0xd22   :  { %v2045_v16 = vpop.f32.mrb[41].mxu1  ;;  %v2060_v61 = vadd.f32 %v1991_v50, %v4930_v11  ;;  %v2044_v53 = vadd.f32 %v2043_v56, %v1923_v1  ;;  %v1995_v54 = vadd.f32 %v1994_v10, %v1928_v7  ;;  %v1996_v14 = vpop.f32.mrb[43].mxu0  ;;  %3890 = vrot.lane.b32.xlu1 %v3889_v47, %s4190_s6  ;;  %v3894_v11 = vpack.i.bf16 %v5287_v9, %v5291_v4 }
 0xd23   :  { %v2047_v37 = vpop.f32.mrb[42].mxu1  ;;  %v2061_v3 = vadd.f32 %v1993_v24, %v4937_v8  ;;  %v2046_v57 = vadd.f32 %v2045_v16, %v1923_v1  ;;  %v1997_v2 = vadd.f32 %v1996_v14, %v1928_v7  ;;  %3900 = vrot.lane.b32.xlu0 %v3899_v25, %s4190_s6  ;;  %v3904_v44 = vpack.i.bf16 %v5293_v52, %v5297_v63  ;;  %v3295_v1 = vld [vmem:[%s5847_s10 + $0x88] sm:$0xff] }
 0xd24   :  { %v2048_v42 = vadd.f32 %v2047_v37, %v1928_v7  ;;  %v2049_v62 = vpop.f32.mrb[43].mxu1  ;;  %v2064_v59 = vadd.f32 %v1995_v54, %v4933_v46  ;;  %v5310_v8 = vmax.f32 %v2060_v61, 0.0  ;;  %v2062_v5 = vadd.f32 %v2044_v53, %v4951_v58 }
 0xd25   :  { %v2050_v20 = vadd.f32 %v2049_v62, %v1928_v7  ;;  %v2065_v26 = vadd.f32 %v1997_v2, %v4940_v13  ;;  %v5317_v46 = vmax.f32 %v2061_v3, 0.0  ;;  %v2063_v33 = vadd.f32 %v2046_v57, %v4954_v48 }
 0xd26   :  { %v2066_v23 = vadd.f32 %v2048_v42, %v4943_v15  ;;  %v5313_v29 = vmax.f32 %v2064_v59, 0.0  ;;  %3895 = vrot.lane.b32.xlu1 %v3894_v11, %s4190_s6  ;;  %v5331_v36 = vmax.f32 %v2062_v5, 0.0 }
 0xd27   :  { %v2067_v34 = vadd.f32 %v2050_v20, %v4947_v21  ;;  %v5320_v13 = vmax.f32 %v2065_v26, 0.0  ;;  %3905 = vrot.lane.b32.xlu0 %v3904_v44, %s4190_s6  ;;  %v5334_v31 = vmax.f32 %v2063_v33, 0.0 }
 0xd28   :  { %v5323_v15 = vmax.f32 %v2066_v23, 0.0  ;;  %v3909_v35 = vpack.i.bf16 %v5313_v29, %v5310_v8 }
 0xd29   :  { %v5327_v58 = vmax.f32 %v2067_v34, 0.0  ;;  %v3924_v21 = vpack.i.bf16 %v5320_v13, %v5317_v46 }
 0xd2a   :  { %3910 = vrot.lane.b32.xlu1 %v3909_v35, %s4190_s6  ;;  %v3914_v48 = vpack.i.bf16 %v5323_v15, %v5331_v36 }
 0xd2b   :  { %3925 = vrot.lane.b32.xlu0 %v3924_v21, %s4190_s6  ;;  %v3929_v19 = vpack.i.bf16 %v5327_v58, %v5334_v31 }
 0xd2e   :  { %3915 = vrot.lane.b32.xlu1 %v3914_v48, %s4190_s6 }
 0xd2f   :  { %3930 = vrot.lane.b32.xlu0 %v3929_v19, %s4190_s6 }
 0xd32   :  { %3920 = vrot.lane.b32.xlu1 %v3889_v47, %s4189_s4 }
 0xd33   :  { %3935 = vrot.lane.b32.xlu0 %v3899_v25, %s4189_s4 }
 0xd36   :  { %3940 = vrot.lane.b32.xlu1 %v3894_v11, %s4189_s4 }
 0xd37   :  { %3945 = vrot.lane.b32.xlu0 %v3904_v44, %s4189_s4 }
 0xd3a   :  { %3950 = vrot.lane.b32.xlu1 %v3909_v35, %s4189_s4 }
 0xd3b   :  { %3960 = vrot.lane.b32.xlu0 %v3924_v21, %s4189_s4 }
 0xd3e   :  { %3955 = vrot.lane.b32.xlu1 %v3914_v48, %s4189_s4 }
 0xd3f   :  { %3965 = vrot.lane.b32.xlu0 %v3929_v19, %s4189_s4 }
 0xd42   :  { %2248 = vperm.xlu1 %3568, %v3294_v38  }
 0xd43   :  { %2253 = vperm.xlu0 %3567, %v3295_v1  }
 0xd46   :  { %2258 = vperm.xlu1 %3568, %v3296_v41  }
 0xd47   :  { %2263 = vperm.xlu0 %3567, %v3297_v6  }
 0xd94   :  { %v3891_v7 = vpop.permute.xlu1 %3890 }
 0xd95   :  { %v3893_v22 = vunpack.i.h.bf16 %v3891_v7  ;;  %v3892_v50 = vunpack.i.l.bf16 %v3891_v7  ;;  %v3901_v43 = vpop.permute.xlu0 %3900 }
 0xd96   :  { %v3903_v56 = vunpack.i.h.bf16 %v3901_v43  ;;  %v3902_v47 = vunpack.i.l.bf16 %v3901_v43 }
 0xd98   :  { %v2129_v24 = vsel %vm529_vm5, %v3892_v50, %v3902_v47  ;;  %v2130_v10 = vsel %vm529_vm5, %v3893_v22, %v3903_v56  ;;  %v3896_v16 = vpop.permute.xlu1 %3895 }
 0xd99   :  { %v3301_v25 = vpack.c.bf16 %v2130_v10, %v2129_v24  ;;  %v3898_v61 = vunpack.i.h.bf16 %v3896_v16  ;;  %v3897_v53 = vunpack.i.l.bf16 %v3896_v16  ;;  %v3906_v54 = vpop.permute.xlu0 %3905 }
 0xd9a   :  { %v3908_v14 = vunpack.i.h.bf16 %v3906_v54  ;;  %v3907_v37 = vunpack.i.l.bf16 %v3906_v54 }
 0xd9b   :  { %v2126_v3 = vsel %vm529_vm5, %v3903_v56, %v3898_v61  ;;  %v2125_v57 = vsel %vm529_vm5, %v3902_v47, %v3897_v53  ;;  %3302 = vmatprep.subr.msk.bf16.mxu0 %vm4550_vm2, %v3301_v25 }
 0xd9c   :  { %v2121_v2 = vsel %vm529_vm5, %v3897_v53, %v3907_v37  ;;  %v2122_v42 = vsel %vm529_vm5, %v3898_v61, %v3908_v14  ;;  %v2133_v62 = vsel %vm529_vm5, %v3907_v37, %v3892_v50  ;;  %v3911_v59 = vpop.permute.xlu1 %3910  ;;  %v2134_v20 = vsel %vm529_vm5, %v3908_v14, %v3893_v22 }
 0xd9d   :  { %v3327_v11 = vpack.c.bf16 %v2122_v42, %v2121_v2  ;;  %v3913_v26 = vunpack.i.h.bf16 %v3911_v59  ;;  %v3912_v23 = vunpack.i.l.bf16 %v3911_v59  ;;  %v3926_v44 = vpop.permute.xlu0 %3925  ;;  %v3330_v5 = vpack.c.bf16 %v2126_v3, %v2125_v57 }
 0xd9e   :  { %v3304_v34 = vpack.c.bf16 %v2134_v20, %v2133_v62  ;;  %v3928_v33 = vunpack.i.h.bf16 %v3926_v44  ;;  %v3927_v35 = vunpack.i.l.bf16 %v3926_v44  ;;  %v2226_v14 = vpack.c.bf16 %v5285_v0, %v5283_v55 }
 0xd9f   :  { %3328 = vmatprep.subr.msk.bf16.mxu1 %vm4574_vm9, %v3327_v11  ;;  %v2228_v37 = vpack.c.bf16 %v5293_v52, %v5297_v63  ;;  %v2225_v44 = vpack.c.bf16 %v5279_v39, %v5277_v49 }
 0xda0   :  { %v2131_v21 = vsel %vm529_vm5, %v3912_v23, %v3927_v35  ;;  %v2132_v48 = vsel %vm529_vm5, %v3913_v26, %v3928_v33  ;;  %3305 = vmatpush1.bf16.msk.msra.mxu0 %vm4561_vm3, %v3304_v34  ;;  %v3916_v19 = vpop.permute.xlu1 %3915  ;;  %3331 = vmatpush1.bf16.msk.msra.mxu1 %vm4587_vm10, %v3330_v5 }
 0xda1   :  { %v3307_v38 = vpack.c.bf16 %v2132_v48, %v2131_v21  ;;  %v3918_v1 = vunpack.i.h.bf16 %v3916_v19  ;;  %v3917_v41 = vunpack.i.l.bf16 %v3916_v19  ;;  %v3931_v6 = vpop.permute.xlu0 %3930  ;;  %v2232_v48 = vpack.c.bf16 %v5327_v58, %v5334_v31 }
 0xda2   :  { %v3933_v7 = vunpack.i.h.bf16 %v3931_v6  ;;  %v3932_v22 = vunpack.i.l.bf16 %v3931_v6  ;;  %v2229_v19 = vpack.c.bf16 %v5313_v29, %v5310_v8 }
 0xda3   :  { %v2128_v50 = vsel %vm529_vm5, %v3928_v33, %v3918_v1  ;;  %v2127_v43 = vsel %vm529_vm5, %v3927_v35, %v3917_v41  ;;  %3308 = vmatprep.subr.msk.bf16.mxu0 %vm4550_vm2, %v3307_v38  ;;  %v2230_v33 = vpack.c.bf16 %v5320_v13, %v5317_v46  ;;  %v2227_v35 = vpack.c.bf16 %v5287_v9, %v5291_v4 }
 0xda4   :  { %v2123_v56 = vsel %vm529_vm5, %v3917_v41, %v3932_v22  ;;  %v2124_v47 = vsel %vm529_vm5, %v3918_v1, %v3933_v7  ;;  %v2135_v24 = vsel %vm529_vm5, %v3932_v22, %v3912_v23  ;;  %v3921_v10 = vpop.permute.xlu1 %3920  ;;  %v2136_v16 = vsel %vm529_vm5, %v3933_v7, %v3913_v26 }
 0xda5   :  { %v3333_v25 = vpack.c.bf16 %v2124_v47, %v2123_v56  ;;  %v3936_v61 = vpop.permute.xlu0 %3935  ;;  %v3336_v53 = vpack.c.bf16 %v2128_v50, %v2127_v43  ;;  %v3310_v54 = vpack.c.bf16 %v2136_v16, %v2135_v24  ;;  %v3922_v3 = vunpack.i.l.bf16 %v3921_v10 }
 0xda6   :  { %v3938_v2 = vunpack.i.h.bf16 %v3936_v61  ;;  %v3937_v42 = vunpack.i.l.bf16 %v3936_v61  ;;  %v3923_v11 = vunpack.i.h.bf16 %v3921_v10  ;;  %v2231_v38 = vpack.c.bf16 %v5323_v15, %v5331_v36 }
 0xda7   :  { %3334 = vmatprep.subr.msk.bf16.mxu1 %vm4574_vm9, %v3333_v25  ;;  %3311 = vmatpush1.bf16.msk.msra.mxu0 %vm4561_vm3, %v3310_v54 }
 0xda8   :  { %v3941_v57 = vpop.permute.xlu1 %3940  ;;  %3337 = vmatpush1.bf16.msk.msra.mxu1 %vm4587_vm10, %v3336_v53  ;;  %2286 = vmatprep.subr.bf16.mxu0 %v2226_v14  ;;  %v2193_v1 = vsel %vm501_vm4, %v3922_v3, %v3937_v42  ;;  %v2194_v22 = vsel %vm501_vm4, %v3923_v11, %v3938_v2 }
 0xda9   :  { %v3943_v62 = vunpack.i.h.bf16 %v3941_v57  ;;  %v3942_v59 = vunpack.i.l.bf16 %v3941_v57  ;;  %v3946_v20 = vpop.permute.xlu0 %3945  ;;  %2339 = vmatprep.subr.bf16.mxu1 %v2228_v37  ;;  %v3316_v37 = vpack.c.bf16 %v2194_v22, %v2193_v1 }
 0xdaa   :  { %v3948_v26 = vunpack.i.h.bf16 %v3946_v20  ;;  %v3947_v23 = vunpack.i.l.bf16 %v3946_v20 }
 0xdab   :  { %v2190_v5 = vsel %vm501_vm4, %v3938_v2, %v3943_v62  ;;  %v2189_v34 = vsel %vm501_vm4, %v3937_v42, %v3942_v59  ;;  %2287 = vmatpush1.bf16.msra.mxu0 %v2225_v44 }
 0xdac   :  { %v3951_v21 = vpop.permute.xlu1 %3950  ;;  %v2197_v41 = vsel %vm501_vm4, %v3947_v23, %v3922_v3  ;;  %v2198_v6 = vsel %vm501_vm4, %v3948_v26, %v3923_v11  ;;  %2288 = vmatprep.subr.bf16.mxu0 %v2230_v33  ;;  %2340 = vmatpush1.bf16.msra.mxu1 %v2227_v35  ;;  %v3313_v50 = vpack.c.bf16 %v2190_v5, %v2189_v34 }
 0xdad   :  { %v3961_v7 = vpop.permute.xlu0 %3960  ;;  %v2185_v43 = vsel %vm501_vm4, %v3942_v59, %v3947_v23  ;;  %v2186_v56 = vsel %vm501_vm4, %v3943_v62, %v3948_v26  ;;  %2341 = vmatprep.subr.bf16.mxu1 %v2232_v48  ;;  %v3953_v47 = vunpack.i.h.bf16 %v3951_v21  ;;  %v3952_v24 = vunpack.i.l.bf16 %v3951_v21  ;;  %v4139_v21 = vld [vmem:[%s5846_s9 + $0x40] sm:$0xff]   ;;  %v4140_v48 = vld [vmem:[%s5846_s9 + $0x48] sm:$0xff]  }
 0xdae   :  { %v3963_v10 = vunpack.i.h.bf16 %v3961_v7  ;;  %v3962_v16 = vunpack.i.l.bf16 %v3961_v7  ;;  %v3339_v25 = vpack.c.bf16 %v2198_v6, %v2197_v41  ;;  %v3342_v3 = vpack.c.bf16 %v2186_v56, %v2185_v43 }
 0xdaf   :  { %2289 = vmatpush1.bf16.msra.mxu0 %v2229_v19 }
 0xdb0   :  { %v3956_v61 = vpop.permute.xlu1 %3955  ;;  %3314 = vmatprep.subr.msk.bf16.mxu0 %vm4652_vm11, %v3313_v50  ;;  %2342 = vmatpush1.bf16.msra.mxu1 %v2231_v38  ;;  %v2195_v42 = vsel %vm501_vm4, %v3952_v24, %v3962_v16  ;;  %v2196_v62 = vsel %vm501_vm4, %v3953_v47, %v3963_v10 }
 0xdb1   :  { %v3958_v53 = vunpack.i.h.bf16 %v3956_v61  ;;  %v3957_v54 = vunpack.i.l.bf16 %v3956_v61  ;;  %v3966_v14 = vpop.permute.xlu0 %3965  ;;  %3340 = vmatprep.subr.msk.bf16.mxu1 %vm4665_vm12, %v3339_v25  ;;  %v3322_v33 = vpack.c.bf16 %v2196_v62, %v2195_v42 }
 0xdb2   :  { %v3968_v57 = vunpack.i.h.bf16 %v3966_v14  ;;  %v3967_v2 = vunpack.i.l.bf16 %v3966_v14 }
 0xdb3   :  { %v2192_v59 = vsel %vm501_vm4, %v3963_v10, %v3958_v53  ;;  %v2191_v20 = vsel %vm501_vm4, %v3962_v16, %v3957_v54  ;;  %3317 = vmatpush1.bf16.msk.msra.mxu0 %vm4674_vm7, %v3316_v37 }
 0xdb4   :  { %v3319_v11 = vpack.c.bf16 %v2192_v59, %v2191_v20  ;;  %v2187_v26 = vsel %vm501_vm4, %v3957_v54, %v3967_v2  ;;  %v2188_v23 = vsel %vm501_vm4, %v3958_v53, %v3968_v57  ;;  %v2199_v44 = vsel %vm501_vm4, %v3967_v2, %v3952_v24  ;;  %3343 = vmatpush1.bf16.msk.msra.mxu1 %vm4681_vm8, %v3342_v3 }
 0xdb5   :  { %v2200_v5 = vsel %vm501_vm4, %v3968_v57, %v3953_v47  ;;  %v3348_v34 = vpack.c.bf16 %v2188_v23, %v2187_v26 }
 0xdb6   :  { %v3345_v35 = vpack.c.bf16 %v2200_v5, %v2199_v44  ;;  %3320 = vmatprep.subr.msk.bf16.mxu0 %vm4652_vm11, %v3319_v11 }
 0xdb7   :  { %3323 = vmatpush1.bf16.msk.msra.mxu0 %vm4674_vm7, %v3322_v33 }
 0xdb8   :  { %3346 = vmatprep.subr.msk.bf16.mxu1 %vm4665_vm12, %v3345_v35 }
 0xdb9   :  { %3349 = vmatpush1.bf16.msk.msra.mxu1 %vm4681_vm8, %v3348_v34 }
 0xdba   :  { %3324 = vmatmul.mubr.msk.bf16.vlgmr.msra.gmra.mrb[44].mxu0 %vm963_vm6, %v4139_v21 }
 0xdbb   :  { %2324 = vmatprep.mubr.bf16.mxu0 %v4191_v12 }
 0xdbc   :  { %3350 = vmatmul.mubr.msk.bf16.vlgmr.msra.gmra.mrb[44].mxu1 %vm963_vm6, %v4139_v21 }
 0xdbd   :  { %2377 = vmatprep.mubr.bf16.mxu1 %v4191_v12 }
 0xdc1   :  { %v2249_v19 = vpop.permute.xlu1 %2248 }
 0xdc2   :  { %3325 = vmatmul.mubr.msk.bf16.gmra.mrb[48].mxu0 %vm963_vm6, %v4140_v48  ;;  %v2254_v38 = vpop.permute.xlu0 %2253 }
 0xdc3   :  { %2634 = vmatprep.mubr.bf16.mxu0 %v4191_v12 }
 0xdc4   :  { %3351 = vmatmul.mubr.msk.bf16.gmra.mrb[48].mxu1 %vm963_vm6, %v4140_v48 }
 0xdc5   :  { %2687 = vmatprep.mubr.bf16.mxu1 %v4191_v12  ;;  %v2259_v59 = vpop.permute.xlu1 %2258 }
 0xdc6   :  { %v2264_v23 = vpop.permute.xlu0 %2263 }
 0xe8d   :  { %v2316_v1 = vpop.f32.mrb[44].mxu0 }
 0xe8e   :  { %v2317_v41 = vadd.f32 %v2316_v1, %v2249_v19  ;;  %v2318_v6 = vpop.f32.mrb[45].mxu0 }
 0xe8f   :  { %v2369_v7 = vpop.f32.mrb[44].mxu1  ;;  %v2319_v22 = vadd.f32 %v2318_v6, %v2249_v19  ;;  %v2320_v43 = vpop.f32.mrb[46].mxu0 }
 0xe90   :  { %v2370_v50 = vadd.f32 %v2369_v7, %v2249_v19  ;;  %v2371_v56 = vpop.f32.mrb[45].mxu1  ;;  %v2321_v47 = vadd.f32 %v2320_v43, %v2254_v38  ;;  %v2322_v10 = vpop.f32.mrb[47].mxu0  ;;  %v2388_v54 = vmax.f32 %v2317_v41, 0.0 }
 0xe91   :  { %v2372_v24 = vadd.f32 %v2371_v56, %v2249_v19  ;;  %v2373_v16 = vpop.f32.mrb[46].mxu1  ;;  %v2323_v25 = vadd.f32 %v2322_v10, %v2254_v38  ;;  %v2389_v14 = vmax.f32 %v2319_v22, 0.0 }
 0xe92   :  { %v2374_v61 = vadd.f32 %v2373_v16, %v2254_v38  ;;  %v2375_v53 = vpop.f32.mrb[47].mxu1  ;;  %v2392_v37 = vmax.f32 %v2321_v47, 0.0  ;;  %v2390_v57 = vmax.f32 %v2370_v50, 0.0 }
 0xe93   :  { %v2376_v3 = vadd.f32 %v2375_v53, %v2254_v38  ;;  %v2391_v2 = vmax.f32 %v2372_v24, 0.0  ;;  %v2393_v42 = vmax.f32 %v2323_v25, 0.0 }
 0xe94   :  { %v2394_v62 = vmax.f32 %v2374_v61, 0.0  ;;  %v3999_v20 = vpack.i.bf16 %v2392_v37, %v2388_v54  ;;  %v5489_v11 = vpack.c.bf16 %v2392_v37, %v2388_v54 }
 0xe95   :  { %v2395_v26 = vmax.f32 %v2376_v3, 0.0  ;;  %v4014_v44 = vpack.i.bf16 %v2393_v42, %v2389_v14  ;;  %v2326_v34 = vpop.f32.mrb[48].mxu0  ;;  %v5495_v7 = vpack.c.bf16 %v2393_v42, %v2389_v14 }
 0xe96   :  { %v4019_v5 = vpack.i.bf16 %v2394_v62, %v2390_v57  ;;  %v5491_v33 = vpack.c.bf16 %v2394_v62, %v2390_v57  ;;  %v2327_v21 = vadd.f32 %v2326_v34, %v2259_v59  ;;  %v2328_v48 = vpop.f32.mrb[49].mxu0  ;;  %3970 = vrot.lane.b32.xlu1 %v3999_v20, %s4190_s6 }
 0xe97   :  { %v4024_v35 = vpack.i.bf16 %v2395_v26, %v2391_v2  ;;  %v2379_v19 = vpop.f32.mrb[48].mxu1  ;;  %v2329_v38 = vadd.f32 %v2328_v48, %v2259_v59  ;;  %v2330_v41 = vpop.f32.mrb[50].mxu0  ;;  %3980 = vrot.lane.b32.xlu0 %v4014_v44, %s4190_s6  ;;  %v5497_v22 = vpack.c.bf16 %v2395_v26, %v2391_v2 }
 0xe98   :  { %v2380_v1 = vadd.f32 %v2379_v19, %v2259_v59  ;;  %v2381_v6 = vpop.f32.mrb[49].mxu1  ;;  %v2331_v50 = vadd.f32 %v2330_v41, %v2264_v23  ;;  %v2332_v56 = vpop.f32.mrb[51].mxu0  ;;  %v2396_v25 = vmax.f32 %v2327_v21, 0.0  ;;  %v3356_v19 = vld [vmem:[%s5847_s10 + $0xa0] sm:$0xff] }
 0xe99   :  { %v2382_v43 = vadd.f32 %v2381_v6, %v2259_v59  ;;  %v2383_v47 = vpop.f32.mrb[50].mxu1  ;;  %v2333_v24 = vadd.f32 %v2332_v56, %v2264_v23  ;;  %v2397_v61 = vmax.f32 %v2329_v38, 0.0 }
 0xe9a   :  { %v2384_v10 = vadd.f32 %v2383_v47, %v2264_v23  ;;  %v2385_v16 = vpop.f32.mrb[51].mxu1  ;;  %v2400_v53 = vmax.f32 %v2331_v50, 0.0  ;;  %3975 = vrot.lane.b32.xlu1 %v4019_v5, %s4190_s6  ;;  %v2398_v37 = vmax.f32 %v2380_v1, 0.0 }
 0xe9b   :  { %v2386_v54 = vadd.f32 %v2385_v16, %v2264_v23  ;;  %v2399_v3 = vmax.f32 %v2382_v43, 0.0  ;;  %v2401_v57 = vmax.f32 %v2333_v24, 0.0  ;;  %3985 = vrot.lane.b32.xlu0 %v4024_v35, %s4190_s6 }
 0xe9c   :  { %v2402_v14 = vmax.f32 %v2384_v10, 0.0  ;;  %v4029_v2 = vpack.i.bf16 %v2400_v53, %v2396_v25  ;;  %v5501_v42 = vpack.c.bf16 %v2400_v53, %v2396_v25 }
 0xe9d   :  { %v2403_v62 = vmax.f32 %v2386_v54, 0.0  ;;  %v4039_v59 = vpack.i.bf16 %v2401_v57, %v2397_v61  ;;  %v5506_v23 = vpack.c.bf16 %v2401_v57, %v2397_v61 }
 0xe9e   :  { %v4034_v26 = vpack.i.bf16 %v2402_v14, %v2398_v37  ;;  %v5503_v34 = vpack.c.bf16 %v2402_v14, %v2398_v37  ;;  %3990 = vrot.lane.b32.xlu1 %v4029_v2, %s4190_s6 }
 0xe9f   :  { %v4044_v21 = vpack.i.bf16 %v2403_v62, %v2399_v3  ;;  %4005 = vrot.lane.b32.xlu0 %v4039_v59, %s4190_s6  ;;  %v5509_v48 = vpack.c.bf16 %v2403_v62, %v2399_v3 }
 0xea2   :  { %3995 = vrot.lane.b32.xlu1 %v4034_v26, %s4190_s6 }
 0xea3   :  { %4010 = vrot.lane.b32.xlu0 %v4044_v21, %s4190_s6 }
 0xea6   :  { %4000 = vrot.lane.b32.xlu1 %v3999_v20, %s4189_s4  ;;  %v3357_v20 = vld [vmem:[%s5847_s10 + $0xa8] sm:$0xff] }
 0xea7   :  { %4015 = vrot.lane.b32.xlu0 %v4014_v44, %s4189_s4  ;;  %v3358_v44 = vld [vmem:[%s5847_s10 + $0xb0] sm:$0xff] }
 0xeaa   :  { %4020 = vrot.lane.b32.xlu1 %v4019_v5, %s4189_s4  ;;  %v3359_v5 = vld [vmem:[%s5847_s10 + $0xb8] sm:$0xff] }
 0xeab   :  { %4025 = vrot.lane.b32.xlu0 %v4024_v35, %s4189_s4 }
 0xeae   :  { %4030 = vrot.lane.b32.xlu1 %v4029_v2, %s4189_s4 }
 0xeaf   :  { %4040 = vrot.lane.b32.xlu0 %v4039_v59, %s4189_s4 }
 0xeb2   :  { %4035 = vrot.lane.b32.xlu1 %v4034_v26, %s4189_s4 }
 0xeb3   :  { %4045 = vrot.lane.b32.xlu0 %v4044_v21, %s4189_s4 }
 0xeb6   :  { %2568 = vperm.xlu1 %3568, %v3356_v19  }
 0xeb7   :  { %2573 = vperm.xlu0 %3567, %v3357_v20  }
 0xeba   :  { %2578 = vperm.xlu1 %3568, %v3358_v44  }
 0xebb   :  { %2583 = vperm.xlu0 %3567, %v3359_v5  }
 0xf08   :  { %v3971_v35 = vpop.permute.xlu1 %3970 }
 0xf09   :  { %v3973_v38 = vunpack.i.h.bf16 %v3971_v35  ;;  %v3972_v1 = vunpack.i.l.bf16 %v3971_v35  ;;  %v3981_v41 = vpop.permute.xlu0 %3980 }
 0xf0a   :  { %v3983_v6 = vunpack.i.h.bf16 %v3981_v41  ;;  %v3982_v50 = vunpack.i.l.bf16 %v3981_v41 }
 0xf0c   :  { %v2449_v43 = vsel %vm529_vm5, %v3972_v1, %v3982_v50  ;;  %v2450_v56 = vsel %vm529_vm5, %v3973_v38, %v3983_v6  ;;  %v3976_v47 = vpop.permute.xlu1 %3975 }
 0xf0d   :  { %v3363_v24 = vpack.c.bf16 %v2450_v56, %v2449_v43  ;;  %v3978_v10 = vunpack.i.h.bf16 %v3976_v47  ;;  %v3977_v16 = vunpack.i.l.bf16 %v3976_v47  ;;  %v3986_v25 = vpop.permute.xlu0 %3985 }
 0xf0e   :  { %v3988_v61 = vunpack.i.h.bf16 %v3986_v25  ;;  %v3987_v53 = vunpack.i.l.bf16 %v3986_v25 }
 0xf0f   :  { %v2446_v54 = vsel %vm529_vm5, %v3983_v6, %v3978_v10  ;;  %v2445_v37 = vsel %vm529_vm5, %v3982_v50, %v3977_v16  ;;  %3364 = vmatprep.subr.msk.bf16.mxu0 %vm4550_vm2, %v3363_v24 }
 0xf10   :  { %v2441_v3 = vsel %vm529_vm5, %v3977_v16, %v3987_v53  ;;  %v2442_v57 = vsel %vm529_vm5, %v3978_v10, %v3988_v61  ;;  %v2453_v14 = vsel %vm529_vm5, %v3987_v53, %v3972_v1  ;;  %v3991_v2 = vpop.permute.xlu1 %3990  ;;  %v2454_v62 = vsel %vm529_vm5, %v3988_v61, %v3973_v38 }
 0xf11   :  { %v3389_v59 = vpack.c.bf16 %v2442_v57, %v2441_v3  ;;  %v3993_v26 = vunpack.i.h.bf16 %v3991_v2  ;;  %v3992_v21 = vunpack.i.l.bf16 %v3991_v2  ;;  %v4006_v19 = vpop.permute.xlu0 %4005  ;;  %v3392_v20 = vpack.c.bf16 %v2446_v54, %v2445_v37 }
 0xf12   :  { %v3366_v44 = vpack.c.bf16 %v2454_v62, %v2453_v14  ;;  %v4008_v5 = vunpack.i.h.bf16 %v4006_v19  ;;  %v4007_v35 = vunpack.i.l.bf16 %v4006_v19 }
 0xf13   :  { %3390 = vmatprep.subr.msk.bf16.mxu1 %vm4574_vm9, %v3389_v59 }
 0xf14   :  { %v2451_v41 = vsel %vm529_vm5, %v3992_v21, %v4007_v35  ;;  %v2452_v1 = vsel %vm529_vm5, %v3993_v26, %v4008_v5  ;;  %3367 = vmatpush1.bf16.msk.msra.mxu0 %vm4561_vm3, %v3366_v44  ;;  %v3996_v38 = vpop.permute.xlu1 %3995  ;;  %3393 = vmatpush1.bf16.msk.msra.mxu1 %vm4587_vm10, %v3392_v20 }
 0xf15   :  { %v3369_v6 = vpack.c.bf16 %v2452_v1, %v2451_v41  ;;  %v3998_v50 = vunpack.i.h.bf16 %v3996_v38  ;;  %v3997_v43 = vunpack.i.l.bf16 %v3996_v38  ;;  %v4011_v56 = vpop.permute.xlu0 %4010 }
 0xf16   :  { %v4013_v47 = vunpack.i.h.bf16 %v4011_v56  ;;  %v4012_v24 = vunpack.i.l.bf16 %v4011_v56 }
 0xf17   :  { %v2448_v10 = vsel %vm529_vm5, %v4008_v5, %v3998_v50  ;;  %v2447_v16 = vsel %vm529_vm5, %v4007_v35, %v3997_v43  ;;  %3370 = vmatprep.subr.msk.bf16.mxu0 %vm4550_vm2, %v3369_v6 }
 0xf18   :  { %v2443_v25 = vsel %vm529_vm5, %v3997_v43, %v4012_v24  ;;  %v2444_v61 = vsel %vm529_vm5, %v3998_v50, %v4013_v47  ;;  %v2455_v53 = vsel %vm529_vm5, %v4012_v24, %v3992_v21  ;;  %v4001_v54 = vpop.permute.xlu1 %4000  ;;  %v2456_v37 = vsel %vm529_vm5, %v4013_v47, %v3993_v26 }
 0xf19   :  { %v3395_v3 = vpack.c.bf16 %v2444_v61, %v2443_v25  ;;  %v4016_v57 = vpop.permute.xlu0 %4015  ;;  %v3398_v14 = vpack.c.bf16 %v2448_v10, %v2447_v16  ;;  %v3372_v2 = vpack.c.bf16 %v2456_v37, %v2455_v53  ;;  %v4002_v62 = vunpack.i.l.bf16 %v4001_v54 }
 0xf1a   :  { %v4018_v21 = vunpack.i.h.bf16 %v4016_v57  ;;  %v4017_v19 = vunpack.i.l.bf16 %v4016_v57  ;;  %v4003_v5 = vunpack.i.h.bf16 %v4001_v54 }
 0xf1b   :  { %3396 = vmatprep.subr.msk.bf16.mxu1 %vm4574_vm9, %v3395_v3  ;;  %3373 = vmatpush1.bf16.msk.msra.mxu0 %vm4561_vm3, %v3372_v2 }
 0xf1c   :  { %v4021_v59 = vpop.permute.xlu1 %4020  ;;  %3399 = vmatpush1.bf16.msk.msra.mxu1 %vm4587_vm10, %v3398_v14  ;;  %2606 = vmatprep.subr.bf16.mxu0 %v5495_v7  ;;  %v2513_v50 = vsel %vm501_vm4, %v4002_v62, %v4017_v19  ;;  %v2514_v56 = vsel %vm501_vm4, %v4003_v5, %v4018_v21 }
 0xf1d   :  { %v4023_v20 = vunpack.i.h.bf16 %v4021_v59  ;;  %v4022_v44 = vunpack.i.l.bf16 %v4021_v59  ;;  %v4026_v26 = vpop.permute.xlu0 %4025  ;;  %2659 = vmatprep.subr.bf16.mxu1 %v5497_v22  ;;  %v3378_v3 = vpack.c.bf16 %v2514_v56, %v2513_v50 }
 0xf1e   :  { %v4028_v35 = vunpack.i.h.bf16 %v4026_v26  ;;  %v4027_v41 = vunpack.i.l.bf16 %v4026_v26 }
 0xf1f   :  { %v2510_v1 = vsel %vm501_vm4, %v4018_v21, %v4023_v20  ;;  %v2509_v38 = vsel %vm501_vm4, %v4017_v19, %v4022_v44  ;;  %2607 = vmatpush1.bf16.msra.mxu0 %v5489_v11 }
 0xf20   :  { %v4031_v6 = vpop.permute.xlu1 %4030  ;;  %v2517_v7 = vsel %vm501_vm4, %v4027_v41, %v4002_v62  ;;  %v2518_v22 = vsel %vm501_vm4, %v4028_v35, %v4003_v5  ;;  %2608 = vmatprep.subr.bf16.mxu0 %v5506_v23  ;;  %2660 = vmatpush1.bf16.msra.mxu1 %v5491_v33  ;;  %v3375_v47 = vpack.c.bf16 %v2510_v1, %v2509_v38  ;;  %v4142_v1 = vld [vmem:[%s5846_s9 + $0x58] sm:$0xff]  }
 0xf21   :  { %v4041_v43 = vpop.permute.xlu0 %4040  ;;  %v2505_v11 = vsel %vm501_vm4, %v4022_v44, %v4027_v41  ;;  %v2506_v24 = vsel %vm501_vm4, %v4023_v20, %v4028_v35  ;;  %2661 = vmatprep.subr.bf16.mxu1 %v5509_v48  ;;  %v4033_v10 = vunpack.i.h.bf16 %v4031_v6  ;;  %v4032_v16 = vunpack.i.l.bf16 %v4031_v6  ;;  %v4141_v41 = vld [vmem:[%s5846_s9 + $0x50] sm:$0xff]  }
 0xf22   :  { %v4043_v25 = vunpack.i.h.bf16 %v4041_v43  ;;  %v4042_v61 = vunpack.i.l.bf16 %v4041_v43  ;;  %v3401_v23 = vpack.c.bf16 %v2518_v22, %v2517_v7  ;;  %v3404_v57 = vpack.c.bf16 %v2506_v24, %v2505_v11 }
 0xf23   :  { %2609 = vmatpush1.bf16.msra.mxu0 %v5501_v42 }
 0xf24   :  { %v4036_v33 = vpop.permute.xlu1 %4035  ;;  %3376 = vmatprep.subr.msk.bf16.mxu0 %vm4652_vm11, %v3375_v47  ;;  %2662 = vmatpush1.bf16.msra.mxu1 %v5503_v34  ;;  %v2515_v2 = vsel %vm501_vm4, %v4032_v16, %v4042_v61  ;;  %v2516_v42 = vsel %vm501_vm4, %v4033_v10, %v4043_v25 }
 0xf25   :  { %v4038_v53 = vunpack.i.h.bf16 %v4036_v33  ;;  %v4037_v54 = vunpack.i.l.bf16 %v4036_v33  ;;  %v4046_v37 = vpop.permute.xlu0 %4045  ;;  %3402 = vmatprep.subr.msk.bf16.mxu1 %vm4665_vm12, %v3401_v23  ;;  %v3384_v5 = vpack.c.bf16 %v2516_v42, %v2515_v2 }
 0xf26   :  { %v4048_v14 = vunpack.i.h.bf16 %v4046_v37  ;;  %v4047_v48 = vunpack.i.l.bf16 %v4046_v37 }
 0xf27   :  { %v2512_v62 = vsel %vm501_vm4, %v4043_v25, %v4038_v53  ;;  %v2511_v34 = vsel %vm501_vm4, %v4042_v61, %v4037_v54  ;;  %3379 = vmatpush1.bf16.msk.msra.mxu0 %vm4674_vm7, %v3378_v3 }
 0xf28   :  { %v3381_v59 = vpack.c.bf16 %v2512_v62, %v2511_v34  ;;  %v2507_v21 = vsel %vm501_vm4, %v4037_v54, %v4047_v48  ;;  %v2508_v19 = vsel %vm501_vm4, %v4038_v53, %v4048_v14  ;;  %v2519_v20 = vsel %vm501_vm4, %v4047_v48, %v4032_v16  ;;  %3405 = vmatpush1.bf16.msk.msra.mxu1 %vm4681_vm8, %v3404_v57 }
 0xf29   :  { %v2520_v44 = vsel %vm501_vm4, %v4048_v14, %v4033_v10  ;;  %v3410_v26 = vpack.c.bf16 %v2508_v19, %v2507_v21 }
 0xf2a   :  { %v3407_v35 = vpack.c.bf16 %v2520_v44, %v2519_v20  ;;  %3382 = vmatprep.subr.msk.bf16.mxu0 %vm4652_vm11, %v3381_v59 }
 0xf2b   :  { %3385 = vmatpush1.bf16.msk.msra.mxu0 %vm4674_vm7, %v3384_v5 }
 0xf2c   :  { %3408 = vmatprep.subr.msk.bf16.mxu1 %vm4665_vm12, %v3407_v35 }
 0xf2d   :  { %3411 = vmatpush1.bf16.msk.msra.mxu1 %vm4681_vm8, %v3410_v26 }
 0xf2e   :  { %3386 = vmatmul.mubr.msk.bf16.vlgmr.msra.gmra.mrb[52].mxu0 %vm963_vm6, %v4141_v41 }
 0xf2f   :  { %2644 = vmatprep.mubr.bf16.mxu0 %v4191_v12 }
 0xf30   :  { %3412 = vmatmul.mubr.msk.bf16.vlgmr.msra.gmra.mrb[52].mxu1 %vm963_vm6, %v4141_v41 }
 0xf31   :  { %2697 = vmatprep.mubr.bf16.mxu1 %v4191_v12 }
 0xf35   :  { %v2569_v38 = vpop.permute.xlu1 %2568 }
 0xf36   :  { %3387 = vmatmul.mubr.msk.bf16.gmra.mrb[56].mxu0 %vm963_vm6, %v4142_v1  ;;  %v2574_v6 = vpop.permute.xlu0 %2573 }
 0xf37   :  { %2929 = vmatprep.mubr.bf16.mxu0 %v4191_v12 }
 0xf38   :  { %3413 = vmatmul.mubr.msk.bf16.gmra.mrb[56].mxu1 %vm963_vm6, %v4142_v1 }
 0xf39   :  { %2970 = vmatprep.mubr.bf16.mxu1 %v4191_v12  ;;  %v2579_v2 = vpop.permute.xlu1 %2578 }
 0xf3a   :  { %v2584_v34 = vpop.permute.xlu0 %2583 }
0x1001   :  { %v2636_v50 = vpop.f32.mrb[52].mxu0 }
0x1002   :  { %v2637_v7 = vadd.f32 %v2636_v50, %v2569_v38  ;;  %v2638_v22 = vpop.f32.mrb[53].mxu0 }
0x1003   :  { %v2689_v43 = vpop.f32.mrb[52].mxu1  ;;  %v2639_v56 = vadd.f32 %v2638_v22, %v2569_v38  ;;  %v2640_v11 = vpop.f32.mrb[54].mxu0 }
0x1004   :  { %v2690_v47 = vadd.f32 %v2689_v43, %v2569_v38  ;;  %v2691_v24 = vpop.f32.mrb[53].mxu1  ;;  %v5652_v10 = vadd.f32 %v2637_v7, %v5277_v49  ;;  %v2641_v16 = vadd.f32 %v2640_v11, %v2574_v6  ;;  %v2642_v61 = vpop.f32.mrb[55].mxu0 }
0x1005   :  { %v2692_v25 = vadd.f32 %v2691_v24, %v2569_v38  ;;  %v2693_v23 = vpop.f32.mrb[54].mxu1  ;;  %v5655_v33 = vadd.f32 %v2639_v56, %v5283_v55  ;;  %v2643_v53 = vadd.f32 %v2642_v61, %v2574_v6 }
0x1006   :  { %v5658_v12 = vadd.f32 %v2690_v47, %v5291_v4  ;;  %v2694_v54 = vadd.f32 %v2693_v23, %v2574_v6  ;;  %v2695_v37 = vpop.f32.mrb[55].mxu1  ;;  %v5661_v3 = vadd.f32 %v2641_v16, %v5279_v39  ;;  %v2724_v55 = vmax.f32 %v5652_v10, 0.0 }
0x1007   :  { %v2711_v57 = vadd.f32 %v2692_v25, %v5297_v63  ;;  %v2696_v49 = vadd.f32 %v2695_v37, %v2574_v6  ;;  %v2713_v14 = vadd.f32 %v2643_v53, %v5285_v0  ;;  %v2725_v4 = vmax.f32 %v5655_v33, 0.0 }
0x1008   :  { %v5666_v48 = vadd.f32 %v2694_v54, %v5287_v9  ;;  %v2728_v42 = vmax.f32 %v5661_v3, 0.0  ;;  %v2726_v39 = vmax.f32 %v5658_v12, 0.0 }
0x1009   :  { %v2715_v62 = vadd.f32 %v2696_v49, %v5293_v52  ;;  %v2727_v59 = vmax.f32 %v2711_v57, 0.0  ;;  %v2729_v63 = vmax.f32 %v2713_v14, 0.0  ;;  %v2646_v0 = vpop.f32.mrb[56].mxu0 }
0x100a   :  { %v2730_v21 = vmax.f32 %v5666_v48, 0.0  ;;  %v2647_v9 = vadd.f32 %v2646_v0, %v2579_v2  ;;  %v2648_v20 = vpop.f32.mrb[57].mxu0  ;;  %v4049_v26 = vpack.i.bf16 %v2728_v42, %v2724_v55 }
0x100b   :  { %v2731_v19 = vmax.f32 %v2715_v62, 0.0  ;;  %v2699_v44 = vpop.f32.mrb[56].mxu1  ;;  %v2649_v5 = vadd.f32 %v2648_v20, %v2579_v2  ;;  %v2650_v41 = vpop.f32.mrb[58].mxu0  ;;  %v4059_v38 = vpack.i.bf16 %v2729_v63, %v2725_v4 }
0x100c   :  { %v2700_v35 = vadd.f32 %v2699_v44, %v2579_v2  ;;  %v2701_v1 = vpop.f32.mrb[57].mxu1  ;;  %v4054_v6 = vpack.i.bf16 %v2730_v21, %v2726_v39  ;;  %v2716_v52 = vadd.f32 %v2647_v9, %v5310_v8  ;;  %v2651_v50 = vadd.f32 %v2650_v41, %v2584_v34  ;;  %v2652_v22 = vpop.f32.mrb[59].mxu0  ;;  %4050 = vrot.lane.b32.xlu1 %v4049_v26, %s4190_s6 }
0x100d   :  { %v2702_v7 = vadd.f32 %v2701_v1, %v2579_v2  ;;  %v2703_v43 = vpop.f32.mrb[58].mxu1  ;;  %v4064_v56 = vpack.i.bf16 %v2731_v19, %v2727_v59  ;;  %v2717_v47 = vadd.f32 %v2649_v5, %v5317_v46  ;;  %v2653_v24 = vadd.f32 %v2652_v22, %v2584_v34  ;;  %4060 = vrot.lane.b32.xlu0 %v4059_v38, %s4190_s6 }
0x100e   :  { %v2718_v11 = vadd.f32 %v2700_v35, %v5331_v36  ;;  %v2704_v10 = vadd.f32 %v2703_v43, %v2584_v34  ;;  %v2705_v16 = vpop.f32.mrb[59].mxu1  ;;  %v2732_v25 = vmax.f32 %v2716_v52, 0.0  ;;  %v2720_v61 = vadd.f32 %v2651_v50, %v5313_v29 }
0x100f   :  { %v2719_v8 = vadd.f32 %v2702_v7, %v5334_v31  ;;  %v2706_v23 = vadd.f32 %v2705_v16, %v2584_v34  ;;  %v2733_v33 = vmax.f32 %v2717_v47, 0.0  ;;  %v2721_v53 = vadd.f32 %v2653_v24, %v5320_v13 }
0x1010   :  { %v2734_v12 = vmax.f32 %v2718_v11, 0.0  ;;  %v2722_v54 = vadd.f32 %v2704_v10, %v5323_v15  ;;  %v2736_v46 = vmax.f32 %v2720_v61, 0.0  ;;  %4055 = vrot.lane.b32.xlu1 %v4054_v6, %s4190_s6  ;;  %v5686_v31 = vpack.c.bf16 %v2729_v63, %v2725_v4 }
0x1011   :  { %v2735_v37 = vmax.f32 %v2719_v8, 0.0  ;;  %v2723_v36 = vadd.f32 %v2706_v23, %v5327_v58  ;;  %v2737_v3 = vmax.f32 %v2721_v53, 0.0  ;;  %4065 = vrot.lane.b32.xlu0 %v4064_v56, %s4190_s6  ;;  %v5689_v15 = vpack.c.bf16 %v2731_v19, %v2727_v59 }
0x1012   :  { %v2738_v57 = vmax.f32 %v2722_v54, 0.0  ;;  %v4069_v49 = vpack.i.bf16 %v2736_v46, %v2732_v25  ;;  %v5691_v2 = vpack.c.bf16 %v2728_v42, %v2724_v55  ;;  %v5696_v62 = vpack.c.bf16 %v2730_v21, %v2726_v39 }
0x1013   :  { %v2739_v29 = vmax.f32 %v2723_v36, 0.0  ;;  %v4084_v14 = vpack.i.bf16 %v2737_v3, %v2733_v33  ;;  %v5694_v58 = vpack.c.bf16 %v2737_v3, %v2733_v33  ;;  %v5700_v0 = vpack.c.bf16 %v2736_v46, %v2732_v25 }
0x1014   :  { %v4074_v48 = vpack.i.bf16 %v2738_v57, %v2734_v12  ;;  %4070 = vrot.lane.b32.xlu1 %v4069_v49, %s4190_s6  ;;  %v5702_v4 = vpack.c.bf16 %v2738_v57, %v2734_v12 }
0x1015   :  { %v4089_v13 = vpack.i.bf16 %v2739_v29, %v2735_v37  ;;  %4085 = vrot.lane.b32.xlu0 %v4084_v14, %s4190_s6  ;;  %v5698_v34 = vpack.c.bf16 %v2739_v29, %v2735_v37 }
0x1018   :  { %4075 = vrot.lane.b32.xlu1 %v4074_v48, %s4190_s6 }
0x1019   :  { %4090 = vrot.lane.b32.xlu0 %v4089_v13, %s4190_s6  ;;  %s3029_s6 = sld [smem:[#allocation2 + $0x2]] }
0x101c   :  { %4080 = vrot.lane.b32.xlu1 %v4049_v26, %s4189_s4 }
0x101d   :  { %4095 = vrot.lane.b32.xlu0 %v4059_v38, %s4189_s4 }
0x1020   :  { %4100 = vrot.lane.b32.xlu1 %v4054_v6, %s4189_s4 }
0x1021   :  { %4105 = vrot.lane.b32.xlu0 %v4064_v56, %s4189_s4 }
0x1024   :  { %4110 = vrot.lane.b32.xlu1 %v4069_v49, %s4189_s4 }
0x1025   :  { %4115 = vrot.lane.b32.xlu0 %v4084_v14, %s4189_s4 }
0x1028   :  { %4120 = vrot.lane.b32.xlu1 %v4074_v48, %s4189_s4 }
0x1029   :  { %4125 = vrot.lane.b32.xlu0 %v4089_v13, %s4189_s4 }
0x107e   :  { %v4051_v55 = vpop.permute.xlu1 %4050 }
0x107f   :  { %v4053_v42 = vunpack.i.h.bf16 %v4051_v55  ;;  %v4052_v39 = vunpack.i.l.bf16 %v4051_v55  ;;  %v4061_v59 = vpop.permute.xlu0 %4060 }
0x1080   :  { %v4063_v63 = vunpack.i.h.bf16 %v4061_v59  ;;  %v4062_v21 = vunpack.i.l.bf16 %v4061_v59 }
0x1082   :  { %v2781_v19 = vsel %vm529_vm5, %v4052_v39, %v4062_v21  ;;  %v2782_v9 = vsel %vm529_vm5, %v4053_v42, %v4063_v63  ;;  %v4056_v20 = vpop.permute.xlu1 %4055 }
0x1083   :  { %v3415_v44 = vpack.c.bf16 %v2782_v9, %v2781_v19  ;;  %v4058_v26 = vunpack.i.h.bf16 %v4056_v20  ;;  %v4057_v5 = vunpack.i.l.bf16 %v4056_v20  ;;  %v4066_v35 = vpop.permute.xlu0 %4065 }
0x1084   :  { %v4068_v41 = vunpack.i.h.bf16 %v4066_v35  ;;  %v4067_v1 = vunpack.i.l.bf16 %v4066_v35 }
0x1085   :  { %v2778_v38 = vsel %vm529_vm5, %v4063_v63, %v4058_v26  ;;  %v2777_v6 = vsel %vm529_vm5, %v4062_v21, %v4057_v5  ;;  %3416 = vmatprep.subr.msk.bf16.mxu0 %vm4550_vm2, %v3415_v44 }
0x1086   :  { %v2773_v52 = vsel %vm529_vm5, %v4057_v5, %v4067_v1  ;;  %v2774_v50 = vsel %vm529_vm5, %v4058_v26, %v4068_v41  ;;  %v2785_v7 = vsel %vm529_vm5, %v4067_v1, %v4052_v39  ;;  %v4071_v22 = vpop.permute.xlu1 %4070  ;;  %v2786_v43 = vsel %vm529_vm5, %v4068_v41, %v4053_v42 }
0x1087   :  { %v3440_v56 = vpack.c.bf16 %v2774_v50, %v2773_v52  ;;  %v4073_v47 = vunpack.i.h.bf16 %v4071_v22  ;;  %v4072_v11 = vunpack.i.l.bf16 %v4071_v22  ;;  %v4086_v24 = vpop.permute.xlu0 %4085  ;;  %v3443_v10 = vpack.c.bf16 %v2778_v38, %v2777_v6 }
0x1088   :  { %v3418_v16 = vpack.c.bf16 %v2786_v43, %v2785_v7  ;;  %v4088_v25 = vunpack.i.h.bf16 %v4086_v24  ;;  %v4087_v61 = vunpack.i.l.bf16 %v4086_v24 }
0x1089   :  { %3441 = vmatprep.subr.msk.bf16.mxu1 %vm4574_vm9, %v3440_v56 }
0x108a   :  { %v2783_v8 = vsel %vm529_vm5, %v4072_v11, %v4087_v61  ;;  %v2784_v23 = vsel %vm529_vm5, %v4073_v47, %v4088_v25  ;;  %3419 = vmatpush1.bf16.msk.msra.mxu0 %vm4561_vm3, %v3418_v16  ;;  %v4076_v33 = vpop.permute.xlu1 %4075  ;;  %3444 = vmatpush1.bf16.msk.msra.mxu1 %vm4587_vm10, %v3443_v10 }
0x108b   :  { %v3421_v12 = vpack.c.bf16 %v2784_v23, %v2783_v8  ;;  %v4078_v53 = vunpack.i.h.bf16 %v4076_v33  ;;  %v4077_v54 = vunpack.i.l.bf16 %v4076_v33  ;;  %v4091_v46 = vpop.permute.xlu0 %4090 }
0x108c   :  { %v4093_v37 = vunpack.i.h.bf16 %v4091_v46  ;;  %v4092_v36 = vunpack.i.l.bf16 %v4091_v46 }
0x108d   :  { %v2780_v3 = vsel %vm529_vm5, %v4088_v25, %v4078_v53  ;;  %v2779_v57 = vsel %vm529_vm5, %v4087_v61, %v4077_v54  ;;  %3422 = vmatprep.subr.msk.bf16.mxu0 %vm4550_vm2, %v3421_v12 }
0x108e   :  { %v2775_v29 = vsel %vm529_vm5, %v4077_v54, %v4092_v36  ;;  %v2776_v49 = vsel %vm529_vm5, %v4078_v53, %v4093_v37  ;;  %v2787_v14 = vsel %vm529_vm5, %v4092_v36, %v4072_v11  ;;  %v4081_v48 = vpop.permute.xlu1 %4080  ;;  %v2788_v13 = vsel %vm529_vm5, %v4093_v37, %v4073_v47 }
0x108f   :  { %v3446_v55 = vpack.c.bf16 %v2776_v49, %v2775_v29  ;;  %v4096_v42 = vpop.permute.xlu0 %4095  ;;  %v3449_v39 = vpack.c.bf16 %v2780_v3, %v2779_v57  ;;  %v3424_v59 = vpack.c.bf16 %v2788_v13, %v2787_v14  ;;  %v4082_v40 = vunpack.i.l.bf16 %v4081_v48 }
0x1090   :  { %v4098_v21 = vunpack.i.h.bf16 %v4096_v42  ;;  %v4097_v19 = vunpack.i.l.bf16 %v4096_v42  ;;  %v4083_v26 = vunpack.i.h.bf16 %v4081_v48  ;;  %v2986_v36 = vunpack.c.l.s4 %v4193_v32 }
0x1091   :  { %3447 = vmatprep.subr.msk.bf16.mxu1 %vm4574_vm9, %v3446_v55  ;;  %3425 = vmatpush1.bf16.msk.msra.mxu0 %vm4561_vm3, %v3424_v59  ;;  %v2893_v3 = vstv %s3029_s6  ;;  %v2989_v57 = vshrl.u32 %v444_v17, 7 }
0x1092   :  { %v4101_v63 = vpop.permute.xlu1 %4100  ;;  %3450 = vmatpush1.bf16.msk.msra.mxu1 %vm4587_vm10, %v3449_v39  ;;  %2901 = vmatprep.subr.bf16.mxu0 %v5686_v31  ;;  %v2845_v41 = vsel %vm501_vm4, %v4082_v40, %v4097_v19  ;;  %v2846_v38 = vsel %vm501_vm4, %v4083_v26, %v4098_v21  ;;  %v2987_v28 = vunpack.c.0.s8 %v2986_v36 }
0x1093   :  { %v4103_v9 = vunpack.i.h.bf16 %v4101_v63  ;;  %v4102_v20 = vunpack.i.l.bf16 %v4101_v63  ;;  %v4106_v44 = vpop.permute.xlu0 %4105  ;;  %2942 = vmatprep.subr.bf16.mxu1 %v5689_v15  ;;  %v3430_v24 = vpack.c.bf16 %v2846_v38, %v2845_v41 }
0x1094   :  { %v4108_v60 = vunpack.i.h.bf16 %v4106_v44  ;;  %v4107_v5 = vunpack.i.l.bf16 %v4106_v44  ;;  %v2990_v13 = vsub.s32 %v2987_v28, %v2989_v57 }
0x1095   :  { %v2842_v30 = vsel %vm501_vm4, %v4098_v21, %v4103_v9  ;;  %v2841_v35 = vsel %vm501_vm4, %v4097_v19, %v4102_v20  ;;  %2902 = vmatpush1.bf16.msra.mxu0 %v5691_v2 }
0x1096   :  { %v4111_v45 = vpop.permute.xlu1 %4110  ;;  %v2849_v31 = vsel %vm501_vm4, %v4107_v5, %v4082_v40  ;;  %v2850_v15 = vsel %vm501_vm4, %v4108_v60, %v4083_v26  ;;  %2903 = vmatprep.subr.bf16.mxu0 %v5694_v58  ;;  %2943 = vmatpush1.bf16.msra.mxu1 %v5696_v62  ;;  %v3427_v6 = vpack.c.bf16 %v2842_v30, %v2841_v35 }
0x1097   :  { %v4116_v1 = vpop.permute.xlu0 %4115  ;;  %v2837_v2 = vsel %vm501_vm4, %v4102_v20, %v4107_v5  ;;  %v2838_v52 = vsel %vm501_vm4, %v4103_v9, %v4108_v60  ;;  %2944 = vmatprep.subr.bf16.mxu1 %v5698_v34  ;;  %v4113_v50 = vunpack.i.h.bf16 %v4111_v45  ;;  %v4112_v7 = vunpack.i.l.bf16 %v4111_v45 }
0x1098   :  { %v4118_v22 = vunpack.i.h.bf16 %v4116_v1  ;;  %v4117_v43 = vunpack.i.l.bf16 %v4116_v1  ;;  %v3452_v58 = vpack.c.bf16 %v2850_v15, %v2849_v31  ;;  %v3455_v10 = vpack.c.bf16 %v2838_v52, %v2837_v2 }
0x1099   :  { %2904 = vmatpush1.bf16.msra.mxu0 %v5700_v0 }
0x109a   :  { %v4121_v62 = vpop.permute.xlu1 %4120  ;;  %3428 = vmatprep.subr.msk.bf16.mxu0 %vm4652_vm11, %v3427_v6  ;;  %2945 = vmatpush1.bf16.msra.mxu1 %v5702_v4  ;;  %v2847_v25 = vsel %vm501_vm4, %v4112_v7, %v4117_v43  ;;  %v2848_v0 = vsel %vm501_vm4, %v4113_v50, %v4118_v22 }
0x109b   :  { %v4123_v56 = vunpack.i.h.bf16 %v4121_v62  ;;  %v4122_v47 = vunpack.i.l.bf16 %v4121_v62  ;;  %v4126_v11 = vpop.permute.xlu0 %4125  ;;  %3453 = vmatprep.subr.msk.bf16.mxu1 %vm4665_vm12, %v3452_v58  ;;  %v3436_v46 = vpack.c.bf16 %v2848_v0, %v2847_v25 }
0x109c   :  { %v4128_v16 = vunpack.i.h.bf16 %v4126_v11  ;;  %v4127_v34 = vunpack.i.l.bf16 %v4126_v11 }
0x109d   :  { %v2844_v61 = vsel %vm501_vm4, %v4118_v22, %v4123_v56  ;;  %v2843_v4 = vsel %vm501_vm4, %v4117_v43, %v4122_v47  ;;  %3431 = vmatpush1.bf16.msk.msra.mxu0 %vm4674_vm7, %v3430_v24 }
0x109e   :  { %v3433_v8 = vpack.c.bf16 %v2844_v61, %v2843_v4  ;;  %v2839_v23 = vsel %vm501_vm4, %v4122_v47, %v4127_v34  ;;  %v2840_v33 = vsel %vm501_vm4, %v4123_v56, %v4128_v16  ;;  %v2851_v12 = vsel %vm501_vm4, %v4127_v34, %v4112_v7  ;;  %3456 = vmatpush1.bf16.msk.msra.mxu1 %vm4681_vm8, %v3455_v10 }
0x109f   :  { %v2852_v53 = vsel %vm501_vm4, %v4128_v16, %v4113_v50  ;;  %v3461_v54 = vpack.c.bf16 %v2840_v33, %v2839_v23  ;;  %vm3010_vm4 = vcmp.lt.s32.totalorder %v444_v17, 512 }
0x10a0   :  { %v3458_v37 = vpack.c.bf16 %v2852_v53, %v2851_v12  ;;  %3434 = vmatprep.subr.msk.bf16.mxu0 %vm4652_vm11, %v3433_v8 }
0x10a1   :  { %3437 = vmatpush1.bf16.msk.msra.mxu0 %vm4674_vm7, %v3436_v46 }
0x10a2   :  { %3459 = vmatprep.subr.msk.bf16.mxu1 %vm4665_vm12, %v3458_v37 }
0x10a3   :  { %3462 = vmatpush1.bf16.msk.msra.mxu1 %vm4681_vm8, %v3461_v54 }
0x10a4   :  { %3438 = vmatmul.mubr.msk.bf16.vlgmr.msra.gmra.mrb[60].mxu0 %vm963_vm6, %v2740_v18 }
0x10a6   :  { %3463 = vmatmul.mubr.msk.bf16.vlgmr.msra.gmra.mrb[60].mxu1 %vm963_vm6, %v2740_v18 }
0x1177   :  { %v2931_v27 = vpop.f32.mrb[60].mxu0 }
0x1178   :  { %v2932_v29 = vadd.f32 %v2931_v27, %v2893_v3  ;;  %v2933_v49 = vpop.f32.mrb[61].mxu0 }
0x1179   :  { %v2972_v14 = vpop.f32.mrb[60].mxu1  ;;  %v2934_v48 = vadd.f32 %v2933_v49, %v2893_v3  ;;  %v2935_v51 = vpop.f32.mrb[62].mxu0 }
0x117a   :  { %v2973_v55 = vadd.f32 %v2972_v14, %v2893_v3  ;;  %v2974_v42 = vpop.f32.mrb[61].mxu1  ;;  %v2936_v59 = vpop.f32.mrb[63].mxu0 }
0x117b   :  { %v2975_v39 = vadd.f32 %v2974_v42, %v2893_v3  ;;  %v2976_v40 = vpop.f32.mrb[62].mxu1  ;;  %v2983_v63 = vcombine.low %v2932_v29, %v2934_v48 }
0x117c   :  { %v2977_v21 = vpop.f32.mrb[63].mxu1 }
0x117d   :  { %v2984_v19 = vcombine.low %v2973_v55, %v2975_v39  ;;  %v2991_v9 = vrot.slane %v2983_v63, %v2990_v13 }
0x117f   :  { %v2998_v20 = vrot.slane %v2984_v19, %v2990_v13 }
0x1181   :  { %v2999_v44 = vcombine.low %v2991_v9, %v2998_v20 }
0x1183   :  { %v3006_v26 = vrot.slane %v2999_v44, %v2990_v13 }
0x1185   :  { %3012 = vst.msk [vmem:[#allocation5] sm:$0xf] %vm3010_vm4, %v3006_v26 }
0x1186   :  { %4170 = shalt.err (!%p4167_p9)
}
0x1187   :  { %s4171_s7 = scalar_lea.hbm %s5849_s12, 64 }
0x1188   :  { %p4172_p10 = scmp.ne.s32.totalorder %s5849_s12, %s4171_s7  ;;  %p4175_p11 = scmp.lt.u32.totalorder %s4171_s7, %s5849_s12 }
0x118a   :  { %p4177_p12 = pnand %p4175_p11, %p4172_p10 }
0x118c   :  { %4180 = shalt.err (!%p4177_p12)
}
0x118d   :  { %3022 = dma.vmem_to_hbm [thread:$0]  %s3020_s8, 64, %s5849_s12, [#allocation3]  }
0x118e   :  { %4183 = dma.done.wait [#allocation3], 64  }
0x118f   :  { %4184 = vsyncadd [#allocation3], 4294967232 }
0x1190   :  { %3026 = vsyncpa [#allocation3], 1 }
0x1191   :  { %3027 = vsyncpa [#allocation4], 1 }

</bundles_post_ra>
